<compile_context>
chip_gen: v7x
topology: tpu7x:2x2x1
jax: 0.10.0
libtpu: 0.0.40
codegen_flags: <defaults>
</compile_context>

<pallas_src>
import functools
import math

import jax
import jax.numpy as jnp
from jax.experimental import pallas as pl
from jax.experimental.pallas import tpu as pltpu

F32 = jnp.float32
BF16 = jnp.bfloat16
NEG_INF = -1e30


# ------------------------------------------------------------------ small helpers


def _ln2d(x, w, b, eps=1e-5):
    mean = jnp.mean(x, axis=-1, keepdims=True)
    var = jnp.mean(jnp.square(x - mean), axis=-1, keepdims=True)
    return (x - mean) * jax.lax.rsqrt(var + eps) * w + b


def _const_spec(shape):
    zeros = (0,) * len(shape)
    return pl.BlockSpec(shape, lambda i: zeros)


def _layer_spec(arr):
    # stacked per-layer weight (num_layers, a, b): select layer i, squeeze the axis
    return pl.BlockSpec((None,) + arr.shape[1:], lambda i: (i, 0, 0))


# ------------------------------------------------------------------ the tower kernel


def _tower_kernel(*refs, H, Dh, scale, causal, prompted, layer_e, epilogue):
    """Whole transformer tower.  grid=(num_layers,); the residual stream lives in a
    VMEM scratch across grid steps; per-layer weights are selected by the BlockSpec
    index_map.  Activations are 2-D (tokens flattened batch-major)."""
    it = iter(refs)
    x0_ref = next(it)                       # (Mq, C) input tokens (used at layer 0)
    qb_ref = next(it)                       # (Mq, 1) batch id per query row
    kb_ref = next(it)                       # (1, Mq) batch id per key row
    if causal:
        qt_ref = next(it)                   # (Mq, 1) token index per query row
        kt_ref = next(it)                   # (1, Mq) token index per key row
    if prompted:
        pk_ref = next(it)                   # (Bp, C) prompt K tokens (raw, no LN)
        pv_ref = next(it)                   # (Bp, C) prompt V tokens
        pb_ref = next(it)                   # (1, Bp) batch id per prompt row
    sel_ref = next(it)                      # (R, Mq) one-hot row-selection matrix
    if epilogue == "feature":
        lnf_w_ref = next(it); lnf_b_ref = next(it)
        proj_ref = next(it)                 # (C, out_dim)
    ln1w_ref = next(it); ln1b_ref = next(it)
    wqkv_ref = next(it); bqkv_ref = next(it)
    wo_ref = next(it); bo_ref = next(it)
    ln2w_ref = next(it); ln2b_ref = next(it)
    fcw_ref = next(it); fcb_ref = next(it)
    pw_ref = next(it); pb2_ref = next(it)
    out_ref = next(it)
    res_ref = next(it)                      # (Mq, C) f32 VMEM residual scratch

    i = pl.program_id(0)
    nl = pl.num_programs(0)
    HD = H * Dh

    @pl.when(i == 0)
    def _():
        res_ref[...] = x0_ref[...].astype(jnp.float32)

    x = res_ref[...]                                         # residual stream (f32)
    xn = _ln2d(x, ln1w_ref[...], ln1b_ref[...])

    # ---- additive attention mask built in-kernel (no (Mq,Mk) HBM operand) ----
    allowed = qb_ref[...] == kb_ref[...]                     # batch block-diagonal
    if causal:
        allowed = jnp.logical_and(allowed, kt_ref[...] <= qt_ref[...])
    mask = jnp.where(allowed, 0.0, NEG_INF)

    # ---- fused QKV projection (single lane-dense matmul, bf16 cast hoisted) ----
    wqkv = wqkv_ref[...]
    bqkv = bqkv_ref[...]
    qkv = jnp.dot(xn.astype(BF16), wqkv, preferred_element_type=jnp.float32) + bqkv
    q_all = (qkv[:, :HD] * scale).astype(BF16)               # scale folded into q
    k_all = qkv[:, HD:2 * HD].astype(BF16)
    v_all = qkv[:, 2 * HD:].astype(BF16)

    if prompted:
        # Prompt tokens are appended as extra K/V *columns* (permutation invariant);
        # they are NOT layer-normed (inserted after ln_1 in the reference).
        pkv_k = jnp.dot(pk_ref[...].astype(BF16), wqkv,
                        preferred_element_type=jnp.float32) + bqkv
        pkv_v = jnp.dot(pv_ref[...].astype(BF16), wqkv,
                        preferred_element_type=jnp.float32) + bqkv
        pk_all = pkv_k[:, HD:2 * HD].astype(BF16)
        pv_all = pkv_v[:, 2 * HD:].astype(BF16)
        if len(layer_e) == 0:
            gate = NEG_INF
        else:
            in_e = (i == layer_e[0])
            for l in layer_e[1:]:
                in_e = jnp.logical_or(in_e, i == l)
            gate = jnp.where(in_e, 0.0, NEG_INF)             # scalar per-layer gate
        pmask = jnp.where(qb_ref[...] == pb_ref[...], 0.0, NEG_INF) + gate

    # ---- per-head attention; heads are lane-slices of the fused projections ----
    outs = []
    for h in range(H):
        sl = slice(h * Dh, (h + 1) * Dh)
        s = jax.lax.dot_general(q_all[:, sl], k_all[:, sl],
                                (((1,), (1,)), ((), ())),
                                preferred_element_type=jnp.float32) + mask
        m = jnp.max(s, axis=-1, keepdims=True)
        if prompted:
            sp = jax.lax.dot_general(q_all[:, sl], pk_all[:, sl],
                                     (((1,), (1,)), ((), ())),
                                     preferred_element_type=jnp.float32) + pmask
            m = jnp.maximum(m, jnp.max(sp, axis=-1, keepdims=True))
        p = jnp.exp(s - m)
        den = jnp.sum(p, axis=-1, keepdims=True)
        num = jnp.dot(p.astype(BF16), v_all[:, sl],
                      preferred_element_type=jnp.float32)
        if prompted:
            pp = jnp.exp(sp - m)
            den = den + jnp.sum(pp, axis=-1, keepdims=True)
            num = num + jnp.dot(pp.astype(BF16), pv_all[:, sl],
                                preferred_element_type=jnp.float32)
        outs.append(num * pl.reciprocal(den, approx=True))

    o_all = (jnp.concatenate(outs, axis=-1) if H > 1 else outs[0]).astype(BF16)
    attn = jnp.dot(o_all, wo_ref[...], preferred_element_type=jnp.float32) + bo_ref[...]
    x1 = x + attn

    # ---- MLP (QuickGELU) + residual ----
    xn2 = _ln2d(x1, ln2w_ref[...], ln2b_ref[...])
    hmid = jnp.dot(xn2.astype(BF16), fcw_ref[...],
                   preferred_element_type=jnp.float32) + fcb_ref[...]
    hmid = hmid * jax.nn.sigmoid(1.702 * hmid)
    x2 = x1 + jnp.dot(hmid.astype(BF16), pw_ref[...],
                      preferred_element_type=jnp.float32) + pb2_ref[...]
    res_ref[...] = x2

    # ---- epilogue ----
    if epilogue == "cls":
        # per-layer CLS tokens via exact one-hot row selection (f32 matmul)
        out_ref[...] = jnp.dot(sel_ref[...], x2,
                               preferred_element_type=jnp.float32).astype(out_ref.dtype)
    else:  # "feature": fused ln_post/ln_final + projection on the last layer only
        @pl.when(i == nl - 1)
        def _():
            feats = jnp.dot(sel_ref[...], x2, preferred_element_type=jnp.float32)
            fn = _ln2d(feats, lnf_w_ref[...], lnf_b_ref[...])
            out_ref[...] = jnp.dot(fn, proj_ref[...],
                                   preferred_element_type=jnp.float32).astype(out_ref.dtype)


def run_tower(x0, blocks, *, H, Dh, qb, kb, sel, epilogue,
              causal=None, prompts=None, layer_e=(), lnf=None, proj=None):
    """One pallas_call over a whole transformer tower (grid = layers)."""
    Mq, C = x0.shape
    nl = blocks["ln1_w"].shape[0]

    inputs = [x0, qb, kb]
    in_specs = [_const_spec(x0.shape), _const_spec(qb.shape), _const_spec(kb.shape)]
    if causal is not None:
        qt, kt = causal
        inputs += [qt, kt]
        in_specs += [_const_spec(qt.shape), _const_spec(kt.shape)]
    if prompts is not None:
        pk, pv, pb = prompts
        inputs += [pk, pv, pb]
        in_specs += [_const_spec(pk.shape), _const_spec(pv.shape), _const_spec(pb.shape)]
    inputs.append(sel)
    in_specs.append(_const_spec(sel.shape))
    if epilogue == "feature":
        lw, lb = lnf
        inputs += [lw, lb, proj]
        in_specs += [_const_spec(lw.shape), _const_spec(lb.shape), _const_spec(proj.shape)]

    weight_names = ["ln1_w", "ln1_b", "wqkv", "bqkv", "wo", "bo",
                    "ln2_w", "ln2_b", "fc_w", "fc_b", "proj_w", "proj_b"]
    for name in weight_names:
        a = blocks[name]
        inputs.append(a)
        in_specs.append(_layer_spec(a))

    R = sel.shape[0]
    if epilogue == "feature":
        out_dim = proj.shape[1]
        out_shape = jax.ShapeDtypeStruct((R, out_dim), F32)
        out_specs = pl.BlockSpec((R, out_dim), lambda i: (0, 0))
    else:  # "cls": per-layer CLS tokens
        out_shape = jax.ShapeDtypeStruct((nl, R, C), F32)
        out_specs = pl.BlockSpec((None, R, C), lambda i: (i, 0, 0))

    kern = functools.partial(_tower_kernel, H=H, Dh=Dh, scale=1.0 / math.sqrt(Dh),
                             causal=causal is not None, prompted=prompts is not None,
                             layer_e=tuple(layer_e), epilogue=epilogue)
    return pl.pallas_call(
        kern,
        out_shape=out_shape,
        grid=(nl,),
        in_specs=in_specs,
        out_specs=out_specs,
        scratch_shapes=[pltpu.VMEM((Mq, C), F32)],
        compiler_params=pltpu.CompilerParams(dimension_semantics=("arbitrary",)),
    )(*inputs)


# ------------------------------------------------------------------ model glue (XLA)


def mint_forward(inputs, params, cfg):
    vp = params["visual"]
    te = params["text"]
    tp = params["text_prompt"]
    B = inputs.shape[0]
    C, H = cfg["width"], cfg["heads"]
    Dh = C // H
    P = cfg["patch"]
    topN = cfg["topN"]

    # ---- patch embed + cls + pos (XLA; a dedicated kernel costs more than it saves)
    _, Cin, Hh, Ww = inputs.shape
    nH, nW = Hh // P, Ww // P
    patches = (inputs.reshape(B, Cin, nH, P, nW, P)
                     .transpose(0, 2, 4, 1, 3, 5)
                     .reshape(B, nH * nW, Cin * P * P))
    emb = jnp.einsum('bpk,kc->bpc', patches, vp["conv1_w"])   # conv1 has no bias
    cls_tok = jnp.broadcast_to(vp["class_emb"][None, None, :], (B, 1, C))
    x_embed = jnp.concatenate([cls_tok, emb], axis=1) + vp["pos_emb"][None]
    L = x_embed.shape[1]
    Mq = B * L

    # ---- ln_pre (identical for frozen pre-pass and prompted pass) ----
    x0 = _ln2d(x_embed, vp["ln_pre_w"], vp["ln_pre_b"]).reshape(Mq, C)

    # tiny per-row id vectors (the kernel builds the mask from these)
    qb = jnp.repeat(jnp.arange(B, dtype=F32), L).reshape(Mq, 1)
    kb = qb.reshape(1, Mq)
    sel_cls = jax.nn.one_hot(jnp.arange(B) * L, Mq, dtype=F32)          # (B, Mq)

    # ---- frozen pre-pass tower: per-layer CLS tokens (Pallas call #1) ----
    cls_layers = run_tower(x0, vp["blocks"], H=H, Dh=Dh, qb=qb, kb=kb,
                           sel=sel_cls, epilogue="cls")                  # (layers, B, C)

    # ---- memory-bank key lookup (XLA: cosine distance + top-k + gather) ----
    qcat = jnp.concatenate([cls_layers[3], cls_layers[7], cls_layers[11]], axis=0)
    qn = qcat / jnp.maximum(jnp.linalg.norm(qcat, axis=-1, keepdims=True), 1e-12)
    kbank = params["bank_keys"]
    kn = kbank / jnp.maximum(jnp.linalg.norm(kbank, axis=-1, keepdims=True), 1e-12)
    dist = 1.0 - qn @ kn.T                                               # (3B, bank)
    picked, idxs = [], []
    for l in range(3):
        d = dist[l * B:(l + 1) * B]
        neg_vals, ix = jax.lax.top_k(-d, topN)                           # smallest dists
        picked.append(-neg_vals)
        idxs.append(ix)
    keys_idx = jnp.concatenate(idxs, axis=1)                             # (B, 3*topN)
    distance_selected = jnp.concatenate(picked, axis=1)
    # TODO(synk): host-side numpy prompt-usage counters (solve_selected_prompt) and the
    #             training-time frequency re-weighting in similarity() are stateful
    #             bookkeeping with no effect on eval outputs; omitted.

    # ---- prompted image pass (Pallas call #2) ----
    expert = params["bank_prompts_l0"][keys_idx]                         # (B, 3*topN, Pn, C)
    fused_prompts = jnp.mean(expert, axis=1)                             # (B, Pn, C)
    half = fused_prompts.shape[1] // 2
    pk = fused_prompts[:, :half].reshape(B * half, C)
    pv = fused_prompts[:, half:].reshape(B * half, C)
    pb = jnp.repeat(jnp.arange(B, dtype=F32), half).reshape(1, B * half)
    image_features = run_tower(x0, vp["blocks"], H=H, Dh=Dh, qb=qb, kb=kb,
                               sel=sel_cls, prompts=(pk, pv, pb),
                               layer_e=cfg["layer_e"], epilogue="feature",
                               lnf=(vp["ln_post_w"], vp["ln_post_b"]),
                               proj=vp["proj"])                          # (B, out_dim)

    # ---- text pass (Pallas call #3) ----
    n_cls = cfg["n_cls"]
    ctx = jnp.broadcast_to(tp["ctx"][None], (n_cls,) + tp["ctx"].shape)
    prompts_t = jnp.concatenate([tp["token_prefix"], ctx, tp["token_suffix"]], axis=1)
    xt3 = prompts_t + te["pos_emb"][None]                                # (n_cls, Lt, C)
    Lt = xt3.shape[1]
    Mt = n_cls * Lt
    xt = xt3.reshape(Mt, C)
    qb_t = jnp.repeat(jnp.arange(n_cls, dtype=F32), Lt).reshape(Mt, 1)
    kb_t = qb_t.reshape(1, Mt)
    qt_t = jnp.tile(jnp.arange(Lt, dtype=F32), n_cls).reshape(Mt, 1)
    kt_t = qt_t.reshape(1, Mt)
    eot = jnp.argmax(tp["tokenized"], axis=-1)
    sel_eot = jax.nn.one_hot(jnp.arange(n_cls) * Lt + eot, Mt, dtype=F32)
    text_features = run_tower(xt, te["blocks"], H=cfg["text_heads"],
                              Dh=C // cfg["text_heads"], qb=qb_t, kb=kb_t,
                              causal=(qt_t, kt_t), sel=sel_eot, epilogue="feature",
                              lnf=(te["ln_final_w"], te["ln_final_b"]),
                              proj=te["text_proj"])                      # (n_cls, out_dim)

    # ---- scaled cosine logits (XLA) ----
    imf = image_features / jnp.maximum(
        jnp.linalg.norm(image_features, axis=-1, keepdims=True), 1e-12)
    txf = text_features / jnp.maximum(
        jnp.linalg.norm(text_features, axis=-1, keepdims=True), 1e-12)
    logits = cfg["logit_scale_exp"] * imf @ txf.T
    return logits, distance_selected


# ------------------------------------------------------------------ deterministic init


def init_params(key):
    keys = jax.random.split(key, 64)
    it = iter(keys)

    def nrm(shape, std=0.02, dtype=F32):
        return (jax.random.normal(next(it), shape, F32) * std).astype(dtype)

    cfg = dict(width=32, heads=4, patch=8, layers=12,
               text_heads=4, text_layers=2, n_cls=3, topN=2,
               layer_e=(0,), out_dim=32,
               logit_scale_exp=float(math.exp(math.log(1.0 / 0.07))))
    C = cfg["width"]
    img_size, cin, P = 16, 3, cfg["patch"]
    seq_len = (img_size // P) ** 2 + 1
    out_dim = cfg["out_dim"]

    def tower_blocks(nl, C):
        HD = C  # H * Dh == C
        return dict(
            ln1_w=1.0 + nrm((nl, 1, C)), ln1_b=nrm((nl, 1, C)),
            # lane-dense fused QKV / out-proj weights in bf16 (MXU dtype)
            wqkv=nrm((nl, C, 3 * HD), dtype=BF16), bqkv=nrm((nl, 1, 3 * HD)),
            wo=nrm((nl, HD, C), dtype=BF16), bo=nrm((nl, 1, C)),
            ln2_w=1.0 + nrm((nl, 1, C)), ln2_b=nrm((nl, 1, C)),
            fc_w=nrm((nl, C, 4 * C), dtype=BF16), fc_b=nrm((nl, 1, 4 * C)),
            proj_w=nrm((nl, 4 * C, C), dtype=BF16), proj_b=nrm((nl, 1, C)),
        )

    visual = dict(
        conv1_w=nrm((cin * P * P, C)),
        class_emb=nrm((C,)),
        pos_emb=nrm((seq_len, C)),
        ln_pre_w=1.0 + nrm((1, C)), ln_pre_b=nrm((1, C)),
        blocks=tower_blocks(cfg["layers"], C),
        ln_post_w=1.0 + nrm((1, C)), ln_post_b=nrm((1, C)),
        proj=nrm((C, out_dim)),
    )

    # text side (TextPromptLearner with batch_size=None, ctx_position='end')
    n_cls, n_ctx, suffix_len = cfg["n_cls"], 4, 3
    lt = 1 + n_ctx + suffix_len
    eot_pos = jnp.array([6, 7, 5], dtype=jnp.int32)   # synthetic EOT (argmax) positions
    tokenized = jnp.where(jnp.arange(lt)[None, :] == eot_pos[:, None], 100, 1).astype(jnp.int32)
    text_prompt = dict(
        ctx=nrm((n_ctx, C)),
        token_prefix=nrm((n_cls, 1, C)),
        token_suffix=nrm((n_cls, suffix_len, C)),
        tokenized=tokenized,
    )
    text = dict(
        pos_emb=nrm((lt, C)),
        blocks=tower_blocks(cfg["text_layers"], C),
        ln_final_w=1.0 + nrm((1, C)), ln_final_b=nrm((1, C)),
        text_proj=nrm((C, out_dim)),
    )

    # memory prompt bank (only the layer-0 key/prompt group is used: layer_e=(0,))
    bank_size, prompt_num = 8, 2
    params = dict(
        visual=visual, text=text, text_prompt=text_prompt,
        bank_keys=nrm((bank_size, C)),
        bank_prompts_l0=nrm((bank_size, prompt_num, C)),
    )
    return params, cfg


# ------------------------------------------------------------------ main

if __name__ == "__main__":
    key = jax.random.PRNGKey(0)
    pkey, xkey = jax.random.split(key)
    params, cfg = init_params(pkey)

    # image batch: B=2, NCHW, 3x16x16 -> 2x2 patches of size 8
    inputs = jax.random.normal(xkey, (2, 3, 16, 16), F32)

    fwd = jax.jit(functools.partial(mint_forward, cfg=cfg))
    logits, distance_selected = fwd(inputs, params)
    jax.block_until_ready((logits, distance_selected))

    assert logits.shape == (2, cfg["n_cls"])
    assert distance_selected.shape == (2, 3 * cfg["topN"])
    assert bool(jnp.all(jnp.isfinite(logits)))
    assert bool(jnp.all(jnp.isfinite(distance_selected)))
    print("KERNEL_OK")
</pallas_src>

<mosaic_0001>
module attributes {stable_mosaic.version = 11 : i64} {
  func.func @_tower_kernel(%arg0: i32, %arg1: memref<10x32xf32, #tpu.memory_space<vmem>>, %arg2: memref<10x1xf32, #tpu.memory_space<vmem>>, %arg3: memref<1x10xf32, #tpu.memory_space<vmem>>, %arg4: memref<2x10xf32, #tpu.memory_space<vmem>>, %arg5: memref<1x1x32xf32, #tpu.memory_space<vmem>>, %arg6: memref<1x1x32xf32, #tpu.memory_space<vmem>>, %arg7: memref<1x32x96xbf16, #tpu.memory_space<vmem>>, %arg8: memref<1x1x96xf32, #tpu.memory_space<vmem>>, %arg9: memref<1x32x32xbf16, #tpu.memory_space<vmem>>, %arg10: memref<1x1x32xf32, #tpu.memory_space<vmem>>, %arg11: memref<1x1x32xf32, #tpu.memory_space<vmem>>, %arg12: memref<1x1x32xf32, #tpu.memory_space<vmem>>, %arg13: memref<1x32x128xbf16, #tpu.memory_space<vmem>>, %arg14: memref<1x1x128xf32, #tpu.memory_space<vmem>>, %arg15: memref<1x128x32xbf16, #tpu.memory_space<vmem>>, %arg16: memref<1x1x32xf32, #tpu.memory_space<vmem>>, %arg17: memref<1x2x32xf32, #tpu.memory_space<vmem>>, %arg18: memref<10x32xf32, #tpu.memory_space<vmem>>) attributes {dimension_semantics = [#tpu.dimension_semantics<arbitrary>], iteration_bounds = array<i64: 12>, scalar_prefetch = 0 : i64, scratch_operands = 1 : i64, tpu.core_type = #tpu.core_type<tc>, window_params = [{pipeline_mode = #tpu.pipeline_mode<synchronous>, transform_indices = @transform_0, window_bounds = array<i64: 10, 32>}, {pipeline_mode = #tpu.pipeline_mode<synchronous>, transform_indices = @transform_1, window_bounds = array<i64: 10, 1>}, {pipeline_mode = #tpu.pipeline_mode<synchronous>, transform_indices = @transform_2, window_bounds = array<i64: 1, 10>}, {pipeline_mode = #tpu.pipeline_mode<synchronous>, transform_indices = @transform_3, window_bounds = array<i64: 2, 10>}, {transform_indices = @transform_4, window_bounds = array<i64: 1, 1, 32>}, {transform_indices = @transform_5, window_bounds = array<i64: 1, 1, 32>}, {transform_indices = @transform_6, window_bounds = array<i64: 1, 32, 96>}, {transform_indices = @transform_7, window_bounds = array<i64: 1, 1, 96>}, {transform_indices = @transform_8, window_bounds = array<i64: 1, 32, 32>}, {transform_indices = @transform_9, window_bounds = array<i64: 1, 1, 32>}, {transform_indices = @transform_10, window_bounds = array<i64: 1, 1, 32>}, {transform_indices = @transform_11, window_bounds = array<i64: 1, 1, 32>}, {transform_indices = @transform_12, window_bounds = array<i64: 1, 32, 128>}, {transform_indices = @transform_13, window_bounds = array<i64: 1, 1, 128>}, {transform_indices = @transform_14, window_bounds = array<i64: 1, 128, 32>}, {transform_indices = @transform_15, window_bounds = array<i64: 1, 1, 32>}, {transform_indices = @transform_16, window_bounds = array<i64: 1, 2, 32>}]} {
    %c0_i32 = arith.constant 0 : i32
    %0 = arith.cmpi eq, %arg0, %c0_i32 : i32
    %1 = arith.extui %0 : i1 to i32
    %c0_i32_0 = arith.constant 0 : i32
    %2 = arith.cmpi ne, %1, %c0_i32_0 : i32
    scf.if %2 {
      %c0_84 = arith.constant 0 : index
      %c0_85 = arith.constant 0 : index
      %189 = vector.load %arg1[%c0_84, %c0_85] : memref<10x32xf32, #tpu.memory_space<vmem>>, vector<10x32xf32>
      %c0_86 = arith.constant 0 : index
      %c0_87 = arith.constant 0 : index
      %190 = vector.load %arg18[%c0_86, %c0_87] : memref<10x32xf32, #tpu.memory_space<vmem>>, vector<10x32xf32>
      tpu.vector_store %arg18[%c0_86, %c0_87], %189 {strides = array<i32>} : memref<10x32xf32, #tpu.memory_space<vmem>>, vector<10x32xf32>,
    } else {
    }
    %c0 = arith.constant 0 : index
    %c0_1 = arith.constant 0 : index
    %3 = vector.load %arg18[%c0, %c0_1] : memref<10x32xf32, #tpu.memory_space<vmem>>, vector<10x32xf32>
    %c0_2 = arith.constant 0 : index
    %c0_3 = arith.constant 0 : index
    %c0_4 = arith.constant 0 : index
    %4 = vector.load %arg5[%c0_2, %c0_3, %c0_4] : memref<1x1x32xf32, #tpu.memory_space<vmem>>, vector<1x1x32xf32>
    %5 = vector.shape_cast %4 : vector<1x1x32xf32> to vector<1x32xf32>
    %c0_5 = arith.constant 0 : index
    %c0_6 = arith.constant 0 : index
    %c0_7 = arith.constant 0 : index
    %6 = vector.load %arg6[%c0_5, %c0_6, %c0_7] : memref<1x1x32xf32, #tpu.memory_space<vmem>>, vector<1x1x32xf32>
    %7 = vector.shape_cast %6 : vector<1x1x32xf32> to vector<1x32xf32>
    %cst = arith.constant dense<0.000000e+00> : vector<10xf32>
    %8 = vector.multi_reduction <add>, %3, %cst [1] : vector<10x32xf32> to vector<10xf32>
    %9 = vector.shape_cast %8 : vector<10xf32> to vector<10x1xf32>
    %cst_8 = arith.constant 3.200000e+01 : f32
    %10 = vector.broadcast %cst_8 : f32 to vector<10x1xf32>
    %11 = arith.divf %9, %10 : vector<10x1xf32>
    %12 = vector.broadcast %11 : vector<10x1xf32> to vector<10x32xf32>
    %13 = arith.subf %3, %12 : vector<10x32xf32>
    %14 = arith.mulf %13, %13 : vector<10x32xf32>
    %cst_9 = arith.constant dense<0.000000e+00> : vector<10xf32>
    %15 = vector.multi_reduction <add>, %14, %cst_9 [1] : vector<10x32xf32> to vector<10xf32>
    %16 = vector.shape_cast %15 : vector<10xf32> to vector<10x1xf32>
    %cst_10 = arith.constant 3.200000e+01 : f32
    %17 = vector.broadcast %cst_10 : f32 to vector<10x1xf32>
    %18 = arith.divf %16, %17 : vector<10x1xf32>
    %19 = vector.broadcast %11 : vector<10x1xf32> to vector<10x32xf32>
    %20 = arith.subf %3, %19 : vector<10x32xf32>
    %cst_11 = arith.constant 9.99999974E-6 : f32
    %21 = vector.broadcast %cst_11 : f32 to vector<10x1xf32>
    %22 = arith.addf %18, %21 : vector<10x1xf32>
    %23 = math.rsqrt %22 : vector<10x1xf32>
    %24 = vector.broadcast %23 : vector<10x1xf32> to vector<10x32xf32>
    %25 = arith.mulf %20, %24 : vector<10x32xf32>
    %26 = vector.broadcast %5 : vector<1x32xf32> to vector<10x32xf32>
    %27 = arith.mulf %25, %26 : vector<10x32xf32>
    %28 = vector.broadcast %7 : vector<1x32xf32> to vector<10x32xf32>
    %29 = arith.addf %27, %28 : vector<10x32xf32>
    %c0_12 = arith.constant 0 : index
    %c0_13 = arith.constant 0 : index
    %30 = vector.load %arg2[%c0_12, %c0_13] : memref<10x1xf32, #tpu.memory_space<vmem>>, vector<10x1xf32>
    %c0_14 = arith.constant 0 : index
    %c0_15 = arith.constant 0 : index
    %31 = vector.load %arg3[%c0_14, %c0_15] : memref<1x10xf32, #tpu.memory_space<vmem>>, vector<1x10xf32>
    %32 = vector.broadcast %30 : vector<10x1xf32> to vector<10x10xf32>
    %33 = vector.broadcast %31 : vector<1x10xf32> to vector<10x10xf32>
    %34 = arith.cmpf oeq, %32, %33 : vector<10x10xf32>
    %cst_16 = arith.constant 0.000000e+00 : f32
    %cst_17 = arith.constant -1.000000e+30 : f32
    %35 = vector.broadcast %cst_16 : f32 to vector<10x10xf32>
    %36 = vector.broadcast %cst_17 : f32 to vector<10x10xf32>
    %37 = arith.select %34, %35, %36 : vector<10x10xi1>, vector<10x10xf32>
    %c0_18 = arith.constant 0 : index
    %c0_19 = arith.constant 0 : index
    %c0_20 = arith.constant 0 : index
    %38 = vector.load %arg7[%c0_18, %c0_19, %c0_20] : memref<1x32x96xbf16, #tpu.memory_space<vmem>>, vector<1x32x96xbf16>
    %39 = vector.shape_cast %38 : vector<1x32x96xbf16> to vector<32x96xbf16>
    %c0_21 = arith.constant 0 : index
    %c0_22 = arith.constant 0 : index
    %c0_23 = arith.constant 0 : index
    %40 = vector.load %arg8[%c0_21, %c0_22, %c0_23] : memref<1x1x96xf32, #tpu.memory_space<vmem>>, vector<1x1x96xf32>
    %41 = vector.shape_cast %40 : vector<1x1x96xf32> to vector<1x96xf32>
    %42 = arith.truncf %29 : vector<10x32xf32> to vector<10x32xbf16>
    %cst_24 = arith.constant dense<0.000000e+00> : vector<10x96xf32>
    %43 = tpu.matmul %42, %39, %cst_24 {dimension_numbers = #tpu.dot_dimension_numbers<[1], [0], [0], [1], [0, 0, 1, 1], [], []>} : vector<10x32xbf16>, vector<32x96xbf16>, vector<10x96xf32> -> vector<10x96xf32>
    %44 = vector.broadcast %41 : vector<1x96xf32> to vector<10x96xf32>
    %45 = arith.addf %43, %44 : vector<10x96xf32>
    %46 = vector.extract_strided_slice %45 {offsets = [0, 0], sizes = [10, 32], strides = [1, 1]} : vector<10x96xf32> to vector<10x32xf32>
    %cst_25 = arith.constant 0.353553385 : f32
    %47 = vector.broadcast %cst_25 : f32 to vector<10x32xf32>
    %48 = arith.mulf %46, %47 : vector<10x32xf32>
    %49 = arith.truncf %48 : vector<10x32xf32> to vector<10x32xbf16>
    %50 = vector.extract_strided_slice %45 {offsets = [0, 32], sizes = [10, 32], strides = [1, 1]} : vector<10x96xf32> to vector<10x32xf32>
    %51 = arith.truncf %50 : vector<10x32xf32> to vector<10x32xbf16>
    %52 = vector.extract_strided_slice %45 {offsets = [0, 64], sizes = [10, 32], strides = [1, 1]} : vector<10x96xf32> to vector<10x32xf32>
    %53 = arith.truncf %52 : vector<10x32xf32> to vector<10x32xbf16>
    %54 = vector.extract_strided_slice %49 {offsets = [0, 0], sizes = [10, 8], strides = [1, 1]} : vector<10x32xbf16> to vector<10x8xbf16>
    %55 = vector.extract_strided_slice %51 {offsets = [0, 0], sizes = [10, 8], strides = [1, 1]} : vector<10x32xbf16> to vector<10x8xbf16>
    %cst_26 = arith.constant dense<0.000000e+00> : vector<10x10xf32>
    %56 = tpu.matmul %54, %55, %cst_26 {dimension_numbers = #tpu.dot_dimension_numbers<[1], [1], [0], [0], [0, 0, 1, 0], [], []>} : vector<10x8xbf16>, vector<10x8xbf16>, vector<10x10xf32> -> vector<10x10xf32>
    %57 = arith.addf %56, %37 : vector<10x10xf32>
    %cst_27 = arith.constant dense<0xFF800000> : vector<10xf32>
    %58 = vector.multi_reduction <maximumf>, %57, %cst_27 [1] : vector<10x10xf32> to vector<10xf32>
    %59 = vector.shape_cast %58 : vector<10xf32> to vector<10x1xf32>
    %60 = vector.broadcast %59 : vector<10x1xf32> to vector<10x10xf32>
    %61 = arith.subf %57, %60 : vector<10x10xf32>
    %62 = math.exp %61 : vector<10x10xf32>
    %cst_28 = arith.constant dense<0.000000e+00> : vector<10xf32>
    %63 = vector.multi_reduction <add>, %62, %cst_28 [1] : vector<10x10xf32> to vector<10xf32>
    %64 = vector.shape_cast %63 : vector<10xf32> to vector<10x1xf32>
    %65 = arith.truncf %62 : vector<10x10xf32> to vector<10x10xbf16>
    %66 = vector.extract_strided_slice %53 {offsets = [0, 0], sizes = [10, 8], strides = [1, 1]} : vector<10x32xbf16> to vector<10x8xbf16>
    %cst_29 = arith.constant dense<0.000000e+00> : vector<10x8xf32>
    %67 = tpu.matmul %65, %66, %cst_29 {dimension_numbers = #tpu.dot_dimension_numbers<[1], [0], [0], [1], [0, 0, 1, 1], [], []>} : vector<10x10xbf16>, vector<10x8xbf16>, vector<10x8xf32> -> vector<10x8xf32>
    %68 = tpu.reciprocal %64 {approx = true} : vector<10x1xf32> -> vector<10x1xf32>
    %69 = vector.broadcast %68 : vector<10x1xf32> to vector<10x8xf32>
    %70 = arith.mulf %67, %69 : vector<10x8xf32>
    %71 = vector.extract_strided_slice %49 {offsets = [0, 8], sizes = [10, 8], strides = [1, 1]} : vector<10x32xbf16> to vector<10x8xbf16>
    %72 = vector.extract_strided_slice %51 {offsets = [0, 8], sizes = [10, 8], strides = [1, 1]} : vector<10x32xbf16> to vector<10x8xbf16>
    %cst_30 = arith.constant dense<0.000000e+00> : vector<10x10xf32>
    %73 = tpu.matmul %71, %72, %cst_30 {dimension_numbers = #tpu.dot_dimension_numbers<[1], [1], [0], [0], [0, 0, 1, 0], [], []>} : vector<10x8xbf16>, vector<10x8xbf16>, vector<10x10xf32> -> vector<10x10xf32>
    %74 = arith.addf %73, %37 : vector<10x10xf32>
    %cst_31 = arith.constant dense<0xFF800000> : vector<10xf32>
    %75 = vector.multi_reduction <maximumf>, %74, %cst_31 [1] : vector<10x10xf32> to vector<10xf32>
    %76 = vector.shape_cast %75 : vector<10xf32> to vector<10x1xf32>
    %77 = vector.broadcast %76 : vector<10x1xf32> to vector<10x10xf32>
    %78 = arith.subf %74, %77 : vector<10x10xf32>
    %79 = math.exp %78 : vector<10x10xf32>
    %cst_32 = arith.constant dense<0.000000e+00> : vector<10xf32>
    %80 = vector.multi_reduction <add>, %79, %cst_32 [1] : vector<10x10xf32> to vector<10xf32>
    %81 = vector.shape_cast %80 : vector<10xf32> to vector<10x1xf32>
    %82 = arith.truncf %79 : vector<10x10xf32> to vector<10x10xbf16>
    %83 = vector.extract_strided_slice %53 {offsets = [0, 8], sizes = [10, 8], strides = [1, 1]} : vector<10x32xbf16> to vector<10x8xbf16>
    %cst_33 = arith.constant dense<0.000000e+00> : vector<10x8xf32>
    %84 = tpu.matmul %82, %83, %cst_33 {dimension_numbers = #tpu.dot_dimension_numbers<[1], [0], [0], [1], [0, 0, 1, 1], [], []>} : vector<10x10xbf16>, vector<10x8xbf16>, vector<10x8xf32> -> vector<10x8xf32>
    %85 = tpu.reciprocal %81 {approx = true} : vector<10x1xf32> -> vector<10x1xf32>
    %86 = vector.broadcast %85 : vector<10x1xf32> to vector<10x8xf32>
    %87 = arith.mulf %84, %86 : vector<10x8xf32>
    %88 = vector.extract_strided_slice %49 {offsets = [0, 16], sizes = [10, 8], strides = [1, 1]} : vector<10x32xbf16> to vector<10x8xbf16>
    %89 = vector.extract_strided_slice %51 {offsets = [0, 16], sizes = [10, 8], strides = [1, 1]} : vector<10x32xbf16> to vector<10x8xbf16>
    %cst_34 = arith.constant dense<0.000000e+00> : vector<10x10xf32>
    %90 = tpu.matmul %88, %89, %cst_34 {dimension_numbers = #tpu.dot_dimension_numbers<[1], [1], [0], [0], [0, 0, 1, 0], [], []>} : vector<10x8xbf16>, vector<10x8xbf16>, vector<10x10xf32> -> vector<10x10xf32>
    %91 = arith.addf %90, %37 : vector<10x10xf32>
    %cst_35 = arith.constant dense<0xFF800000> : vector<10xf32>
    %92 = vector.multi_reduction <maximumf>, %91, %cst_35 [1] : vector<10x10xf32> to vector<10xf32>
    %93 = vector.shape_cast %92 : vector<10xf32> to vector<10x1xf32>
    %94 = vector.broadcast %93 : vector<10x1xf32> to vector<10x10xf32>
    %95 = arith.subf %91, %94 : vector<10x10xf32>
    %96 = math.exp %95 : vector<10x10xf32>
    %cst_36 = arith.constant dense<0.000000e+00> : vector<10xf32>
    %97 = vector.multi_reduction <add>, %96, %cst_36 [1] : vector<10x10xf32> to vector<10xf32>
    %98 = vector.shape_cast %97 : vector<10xf32> to vector<10x1xf32>
    %99 = arith.truncf %96 : vector<10x10xf32> to vector<10x10xbf16>
    %100 = vector.extract_strided_slice %53 {offsets = [0, 16], sizes = [10, 8], strides = [1, 1]} : vector<10x32xbf16> to vector<10x8xbf16>
    %cst_37 = arith.constant dense<0.000000e+00> : vector<10x8xf32>
    %101 = tpu.matmul %99, %100, %cst_37 {dimension_numbers = #tpu.dot_dimension_numbers<[1], [0], [0], [1], [0, 0, 1, 1], [], []>} : vector<10x10xbf16>, vector<10x8xbf16>, vector<10x8xf32> -> vector<10x8xf32>
    %102 = tpu.reciprocal %98 {approx = true} : vector<10x1xf32> -> vector<10x1xf32>
    %103 = vector.broadcast %102 : vector<10x1xf32> to vector<10x8xf32>
    %104 = arith.mulf %101, %103 : vector<10x8xf32>
    %105 = vector.extract_strided_slice %49 {offsets = [0, 24], sizes = [10, 8], strides = [1, 1]} : vector<10x32xbf16> to vector<10x8xbf16>
    %106 = vector.extract_strided_slice %51 {offsets = [0, 24], sizes = [10, 8], strides = [1, 1]} : vector<10x32xbf16> to vector<10x8xbf16>
    %cst_38 = arith.constant dense<0.000000e+00> : vector<10x10xf32>
    %107 = tpu.matmul %105, %106, %cst_38 {dimension_numbers = #tpu.dot_dimension_numbers<[1], [1], [0], [0], [0, 0, 1, 0], [], []>} : vector<10x8xbf16>, vector<10x8xbf16>, vector<10x10xf32> -> vector<10x10xf32>
    %108 = arith.addf %107, %37 : vector<10x10xf32>
    %cst_39 = arith.constant dense<0xFF800000> : vector<10xf32>
    %109 = vector.multi_reduction <maximumf>, %108, %cst_39 [1] : vector<10x10xf32> to vector<10xf32>
    %110 = vector.shape_cast %109 : vector<10xf32> to vector<10x1xf32>
    %111 = vector.broadcast %110 : vector<10x1xf32> to vector<10x10xf32>
    %112 = arith.subf %108, %111 : vector<10x10xf32>
    %113 = math.exp %112 : vector<10x10xf32>
    %cst_40 = arith.constant dense<0.000000e+00> : vector<10xf32>
    %114 = vector.multi_reduction <add>, %113, %cst_40 [1] : vector<10x10xf32> to vector<10xf32>
    %115 = vector.shape_cast %114 : vector<10xf32> to vector<10x1xf32>
    %116 = arith.truncf %113 : vector<10x10xf32> to vector<10x10xbf16>
    %117 = vector.extract_strided_slice %53 {offsets = [0, 24], sizes = [10, 8], strides = [1, 1]} : vector<10x32xbf16> to vector<10x8xbf16>
    %cst_41 = arith.constant dense<0.000000e+00> : vector<10x8xf32>
    %118 = tpu.matmul %116, %117, %cst_41 {dimension_numbers = #tpu.dot_dimension_numbers<[1], [0], [0], [1], [0, 0, 1, 1], [], []>} : vector<10x10xbf16>, vector<10x8xbf16>, vector<10x8xf32> -> vector<10x8xf32>
    %119 = tpu.reciprocal %115 {approx = true} : vector<10x1xf32> -> vector<10x1xf32>
    %120 = vector.broadcast %119 : vector<10x1xf32> to vector<10x8xf32>
    %121 = arith.mulf %118, %120 : vector<10x8xf32>
    %122 = tpu.concatenate %70, %87, %104, %121 in 1 : vector<10x8xf32>, vector<10x8xf32>, vector<10x8xf32>, vector<10x8xf32> -> vector<10x32xf32>
    %123 = arith.truncf %122 : vector<10x32xf32> to vector<10x32xbf16>
    %c0_42 = arith.constant 0 : index
    %c0_43 = arith.constant 0 : index
    %c0_44 = arith.constant 0 : index
    %124 = vector.load %arg9[%c0_42, %c0_43, %c0_44] : memref<1x32x32xbf16, #tpu.memory_space<vmem>>, vector<1x32x32xbf16>
    %125 = vector.shape_cast %124 : vector<1x32x32xbf16> to vector<32x32xbf16>
    %cst_45 = arith.constant dense<0.000000e+00> : vector<10x32xf32>
    %126 = tpu.matmul %123, %125, %cst_45 {dimension_numbers = #tpu.dot_dimension_numbers<[1], [0], [0], [1], [0, 0, 1, 1], [], []>} : vector<10x32xbf16>, vector<32x32xbf16>, vector<10x32xf32> -> vector<10x32xf32>
    %c0_46 = arith.constant 0 : index
    %c0_47 = arith.constant 0 : index
    %c0_48 = arith.constant 0 : index
    %127 = vector.load %arg10[%c0_46, %c0_47, %c0_48] : memref<1x1x32xf32, #tpu.memory_space<vmem>>, vector<1x1x32xf32>
    %128 = vector.shape_cast %127 : vector<1x1x32xf32> to vector<1x32xf32>
    %129 = vector.broadcast %128 : vector<1x32xf32> to vector<10x32xf32>
    %130 = arith.addf %126, %129 : vector<10x32xf32>
    %131 = arith.addf %3, %130 : vector<10x32xf32>
    %c0_49 = arith.constant 0 : index
    %c0_50 = arith.constant 0 : index
    %c0_51 = arith.constant 0 : index
    %132 = vector.load %arg11[%c0_49, %c0_50, %c0_51] : memref<1x1x32xf32, #tpu.memory_space<vmem>>, vector<1x1x32xf32>
    %133 = vector.shape_cast %132 : vector<1x1x32xf32> to vector<1x32xf32>
    %c0_52 = arith.constant 0 : index
    %c0_53 = arith.constant 0 : index
    %c0_54 = arith.constant 0 : index
    %134 = vector.load %arg12[%c0_52, %c0_53, %c0_54] : memref<1x1x32xf32, #tpu.memory_space<vmem>>, vector<1x1x32xf32>
    %135 = vector.shape_cast %134 : vector<1x1x32xf32> to vector<1x32xf32>
    %cst_55 = arith.constant dense<0.000000e+00> : vector<10xf32>
    %136 = vector.multi_reduction <add>, %131, %cst_55 [1] : vector<10x32xf32> to vector<10xf32>
    %137 = vector.shape_cast %136 : vector<10xf32> to vector<10x1xf32>
    %cst_56 = arith.constant 3.200000e+01 : f32
    %138 = vector.broadcast %cst_56 : f32 to vector<10x1xf32>
    %139 = arith.divf %137, %138 : vector<10x1xf32>
    %140 = vector.broadcast %139 : vector<10x1xf32> to vector<10x32xf32>
    %141 = arith.subf %131, %140 : vector<10x32xf32>
    %142 = arith.mulf %141, %141 : vector<10x32xf32>
    %cst_57 = arith.constant dense<0.000000e+00> : vector<10xf32>
    %143 = vector.multi_reduction <add>, %142, %cst_57 [1] : vector<10x32xf32> to vector<10xf32>
    %144 = vector.shape_cast %143 : vector<10xf32> to vector<10x1xf32>
    %cst_58 = arith.constant 3.200000e+01 : f32
    %145 = vector.broadcast %cst_58 : f32 to vector<10x1xf32>
    %146 = arith.divf %144, %145 : vector<10x1xf32>
    %147 = vector.broadcast %139 : vector<10x1xf32> to vector<10x32xf32>
    %148 = arith.subf %131, %147 : vector<10x32xf32>
    %cst_59 = arith.constant 9.99999974E-6 : f32
    %149 = vector.broadcast %cst_59 : f32 to vector<10x1xf32>
    %150 = arith.addf %146, %149 : vector<10x1xf32>
    %151 = math.rsqrt %150 : vector<10x1xf32>
    %152 = vector.broadcast %151 : vector<10x1xf32> to vector<10x32xf32>
    %153 = arith.mulf %148, %152 : vector<10x32xf32>
    %154 = vector.broadcast %133 : vector<1x32xf32> to vector<10x32xf32>
    %155 = arith.mulf %153, %154 : vector<10x32xf32>
    %156 = vector.broadcast %135 : vector<1x32xf32> to vector<10x32xf32>
    %157 = arith.addf %155, %156 : vector<10x32xf32>
    %158 = arith.truncf %157 : vector<10x32xf32> to vector<10x32xbf16>
    %c0_60 = arith.constant 0 : index
    %c0_61 = arith.constant 0 : index
    %c0_62 = arith.constant 0 : index
    %159 = vector.load %arg13[%c0_60, %c0_61, %c0_62] : memref<1x32x128xbf16, #tpu.memory_space<vmem>>, vector<1x32x128xbf16>
    %160 = vector.shape_cast %159 : vector<1x32x128xbf16> to vector<32x128xbf16>
    %cst_63 = arith.constant dense<0.000000e+00> : vector<10x128xf32>
    %161 = tpu.matmul %158, %160, %cst_63 {dimension_numbers = #tpu.dot_dimension_numbers<[1], [0], [0], [1], [0, 0, 1, 1], [], []>} : vector<10x32xbf16>, vector<32x128xbf16>, vector<10x128xf32> -> vector<10x128xf32>
    %c0_64 = arith.constant 0 : index
    %c0_65 = arith.constant 0 : index
    %c0_66 = arith.constant 0 : index
    %162 = vector.load %arg14[%c0_64, %c0_65, %c0_66] : memref<1x1x128xf32, #tpu.memory_space<vmem>>, vector<1x1x128xf32>
    %163 = vector.shape_cast %162 : vector<1x1x128xf32> to vector<1x128xf32>
    %164 = vector.broadcast %163 : vector<1x128xf32> to vector<10x128xf32>
    %165 = arith.addf %161, %164 : vector<10x128xf32>
    %cst_67 = arith.constant 1.702000e+00 : f32
    %166 = vector.broadcast %cst_67 : f32 to vector<10x128xf32>
    %167 = arith.mulf %166, %165 : vector<10x128xf32>
    %168 = arith.negf %167 : vector<10x128xf32>
    %169 = math.exp %168 : vector<10x128xf32>
    %cst_68 = arith.constant 1.000000e+00 : f32
    %170 = vector.broadcast %cst_68 : f32 to vector<10x128xf32>
    %171 = arith.addf %170, %169 : vector<10x128xf32>
    %172 = arith.divf %170, %171 : vector<10x128xf32>
    %173 = arith.mulf %165, %172 : vector<10x128xf32>
    %174 = arith.truncf %173 : vector<10x128xf32> to vector<10x128xbf16>
    %c0_69 = arith.constant 0 : index
    %c0_70 = arith.constant 0 : index
    %c0_71 = arith.constant 0 : index
    %175 = vector.load %arg15[%c0_69, %c0_70, %c0_71] : memref<1x128x32xbf16, #tpu.memory_space<vmem>>, vector<1x128x32xbf16>
    %176 = vector.shape_cast %175 : vector<1x128x32xbf16> to vector<128x32xbf16>
    %cst_72 = arith.constant dense<0.000000e+00> : vector<10x32xf32>
    %177 = tpu.matmul %174, %176, %cst_72 {dimension_numbers = #tpu.dot_dimension_numbers<[1], [0], [0], [1], [0, 0, 1, 1], [], []>} : vector<10x128xbf16>, vector<128x32xbf16>, vector<10x32xf32> -> vector<10x32xf32>
    %178 = arith.addf %131, %177 : vector<10x32xf32>
    %c0_73 = arith.constant 0 : index
    %c0_74 = arith.constant 0 : index
    %c0_75 = arith.constant 0 : index
    %179 = vector.load %arg16[%c0_73, %c0_74, %c0_75] : memref<1x1x32xf32, #tpu.memory_space<vmem>>, vector<1x1x32xf32>
    %180 = vector.shape_cast %179 : vector<1x1x32xf32> to vector<1x32xf32>
    %181 = vector.broadcast %180 : vector<1x32xf32> to vector<10x32xf32>
    %182 = arith.addf %178, %181 : vector<10x32xf32>
    %c0_76 = arith.constant 0 : index
    %c0_77 = arith.constant 0 : index
    %183 = vector.load %arg18[%c0_76, %c0_77] : memref<10x32xf32, #tpu.memory_space<vmem>>, vector<10x32xf32>
    tpu.vector_store %arg18[%c0_76, %c0_77], %182 {strides = array<i32>} : memref<10x32xf32, #tpu.memory_space<vmem>>, vector<10x32xf32>,
    %c0_78 = arith.constant 0 : index
    %c0_79 = arith.constant 0 : index
    %184 = vector.load %arg4[%c0_78, %c0_79] : memref<2x10xf32, #tpu.memory_space<vmem>>, vector<2x10xf32>
    %cst_80 = arith.constant dense<0.000000e+00> : vector<2x32xf32>
    %185 = tpu.matmul %184, %182, %cst_80 {dimension_numbers = #tpu.dot_dimension_numbers<[1], [0], [0], [1], [0, 0, 1, 1], [], []>} : vector<2x10xf32>, vector<10x32xf32>, vector<2x32xf32> -> vector<2x32xf32>
    %c0_81 = arith.constant 0 : index
    %c0_82 = arith.constant 0 : index
    %c0_83 = arith.constant 0 : index
    %186 = vector.load %arg17[%c0_81, %c0_82, %c0_83] : memref<1x2x32xf32, #tpu.memory_space<vmem>>, vector<1x2x32xf32>
    %187 = vector.shape_cast %186 : vector<1x2x32xf32> to vector<2x32xf32>
    %188 = vector.shape_cast %185 : vector<2x32xf32> to vector<1x2x32xf32>
    tpu.vector_store %arg17[%c0_81, %c0_82, %c0_83], %188 {strides = array<i32>} : memref<1x2x32xf32, #tpu.memory_space<vmem>>, vector<1x2x32xf32>,
    return
  }
  func.func @transform_0(%arg0: i32) -> (i32, i32) {
    %c0_i32 = arith.constant 0 : i32
    %c0_i32_0 = arith.constant 0 : i32
    %c0_i32_1 = arith.constant 0 : i32
    return %c0_i32, %c0_i32_0 : i32, i32
  }
  func.func @transform_1(%arg0: i32) -> (i32, i32) {
    %c0_i32 = arith.constant 0 : i32
    %c0_i32_0 = arith.constant 0 : i32
    %c0_i32_1 = arith.constant 0 : i32
    return %c0_i32, %c0_i32_0 : i32, i32
  }
  func.func @transform_2(%arg0: i32) -> (i32, i32) {
    %c0_i32 = arith.constant 0 : i32
    %c0_i32_0 = arith.constant 0 : i32
    %c0_i32_1 = arith.constant 0 : i32
    return %c0_i32, %c0_i32_0 : i32, i32
  }
  func.func @transform_3(%arg0: i32) -> (i32, i32) {
    %c0_i32 = arith.constant 0 : i32
    %c0_i32_0 = arith.constant 0 : i32
    %c0_i32_1 = arith.constant 0 : i32
    return %c0_i32, %c0_i32_0 : i32, i32
  }
  func.func @transform_4(%arg0: i32) -> (i32, i32, i32) {
    %c0_i32 = arith.constant 0 : i32
    %c0_i32_0 = arith.constant 0 : i32
    %c0_i32_1 = arith.constant 0 : i32
    return %arg0, %c0_i32, %c0_i32_0 : i32, i32, i32
  }
  func.func @transform_5(%arg0: i32) -> (i32, i32, i32) {
    %c0_i32 = arith.constant 0 : i32
    %c0_i32_0 = arith.constant 0 : i32
    %c0_i32_1 = arith.constant 0 : i32
    return %arg0, %c0_i32, %c0_i32_0 : i32, i32, i32
  }
  func.func @transform_6(%arg0: i32) -> (i32, i32, i32) {
    %c0_i32 = arith.constant 0 : i32
    %c0_i32_0 = arith.constant 0 : i32
    %c0_i32_1 = arith.constant 0 : i32
    return %arg0, %c0_i32, %c0_i32_0 : i32, i32, i32
  }
  func.func @transform_7(%arg0: i32) -> (i32, i32, i32) {
    %c0_i32 = arith.constant 0 : i32
    %c0_i32_0 = arith.constant 0 : i32
    %c0_i32_1 = arith.constant 0 : i32
    return %arg0, %c0_i32, %c0_i32_0 : i32, i32, i32
  }
  func.func @transform_8(%arg0: i32) -> (i32, i32, i32) {
    %c0_i32 = arith.constant 0 : i32
    %c0_i32_0 = arith.constant 0 : i32
    %c0_i32_1 = arith.constant 0 : i32
    return %arg0, %c0_i32, %c0_i32_0 : i32, i32, i32
  }
  func.func @transform_9(%arg0: i32) -> (i32, i32, i32) {
    %c0_i32 = arith.constant 0 : i32
    %c0_i32_0 = arith.constant 0 : i32
    %c0_i32_1 = arith.constant 0 : i32
    return %arg0, %c0_i32, %c0_i32_0 : i32, i32, i32
  }
  func.func @transform_10(%arg0: i32) -> (i32, i32, i32) {
    %c0_i32 = arith.constant 0 : i32
    %c0_i32_0 = arith.constant 0 : i32
    %c0_i32_1 = arith.constant 0 : i32
    return %arg0, %c0_i32, %c0_i32_0 : i32, i32, i32
  }
  func.func @transform_11(%arg0: i32) -> (i32, i32, i32) {
    %c0_i32 = arith.constant 0 : i32
    %c0_i32_0 = arith.constant 0 : i32
    %c0_i32_1 = arith.constant 0 : i32
    return %arg0, %c0_i32, %c0_i32_0 : i32, i32, i32
  }
  func.func @transform_12(%arg0: i32) -> (i32, i32, i32) {
    %c0_i32 = arith.constant 0 : i32
    %c0_i32_0 = arith.constant 0 : i32
    %c0_i32_1 = arith.constant 0 : i32
    return %arg0, %c0_i32, %c0_i32_0 : i32, i32, i32
  }
  func.func @transform_13(%arg0: i32) -> (i32, i32, i32) {
    %c0_i32 = arith.constant 0 : i32
    %c0_i32_0 = arith.constant 0 : i32
    %c0_i32_1 = arith.constant 0 : i32
    return %arg0, %c0_i32, %c0_i32_0 : i32, i32, i32
  }
  func.func @transform_14(%arg0: i32) -> (i32, i32, i32) {
    %c0_i32 = arith.constant 0 : i32
    %c0_i32_0 = arith.constant 0 : i32
    %c0_i32_1 = arith.constant 0 : i32
    return %arg0, %c0_i32, %c0_i32_0 : i32, i32, i32
  }
  func.func @transform_15(%arg0: i32) -> (i32, i32, i32) {
    %c0_i32 = arith.constant 0 : i32
    %c0_i32_0 = arith.constant 0 : i32
    %c0_i32_1 = arith.constant 0 : i32
    return %arg0, %c0_i32, %c0_i32_0 : i32, i32, i32
  }
  func.func @transform_16(%arg0: i32) -> (i32, i32, i32) {
    %c0_i32 = arith.constant 0 : i32
    %c0_i32_0 = arith.constant 0 : i32
    %c0_i32_1 = arith.constant 0 : i32
    return %arg0, %c0_i32, %c0_i32_0 : i32, i32, i32
  }
}

module attributes {stable_mosaic.version = 11 : i64} {
  func.func @_tower_kernel(%arg0: i32, %arg1: memref<10x32xf32, #tpu.memory_space<vmem>>, %arg2: memref<10x1xf32, #tpu.memory_space<vmem>>, %arg3: memref<1x10xf32, #tpu.memory_space<vmem>>, %arg4: memref<2x32xf32, #tpu.memory_space<vmem>>, %arg5: memref<2x32xf32, #tpu.memory_space<vmem>>, %arg6: memref<1x2xf32, #tpu.memory_space<vmem>>, %arg7: memref<2x10xf32, #tpu.memory_space<vmem>>, %arg8: memref<1x32xf32, #tpu.memory_space<vmem>>, %arg9: memref<1x32xf32, #tpu.memory_space<vmem>>, %arg10: memref<32x32xf32, #tpu.memory_space<vmem>>, %arg11: memref<1x1x32xf32, #tpu.memory_space<vmem>>, %arg12: memref<1x1x32xf32, #tpu.memory_space<vmem>>, %arg13: memref<1x32x96xbf16, #tpu.memory_space<vmem>>, %arg14: memref<1x1x96xf32, #tpu.memory_space<vmem>>, %arg15: memref<1x32x32xbf16, #tpu.memory_space<vmem>>, %arg16: memref<1x1x32xf32, #tpu.memory_space<vmem>>, %arg17: memref<1x1x32xf32, #tpu.memory_space<vmem>>, %arg18: memref<1x1x32xf32, #tpu.memory_space<vmem>>, %arg19: memref<1x32x128xbf16, #tpu.memory_space<vmem>>, %arg20: memref<1x1x128xf32, #tpu.memory_space<vmem>>, %arg21: memref<1x128x32xbf16, #tpu.memory_space<vmem>>, %arg22: memref<1x1x32xf32, #tpu.memory_space<vmem>>, %arg23: memref<2x32xf32, #tpu.memory_space<vmem>>, %arg24: memref<10x32xf32, #tpu.memory_space<vmem>>) attributes {dimension_semantics = [#tpu.dimension_semantics<arbitrary>], iteration_bounds = array<i64: 12>, scalar_prefetch = 0 : i64, scratch_operands = 1 : i64, tpu.core_type = #tpu.core_type<tc>, window_params = [{pipeline_mode = #tpu.pipeline_mode<synchronous>, transform_indices = @transform_0, window_bounds = array<i64: 10, 32>}, {pipeline_mode = #tpu.pipeline_mode<synchronous>, transform_indices = @transform_1, window_bounds = array<i64: 10, 1>}, {pipeline_mode = #tpu.pipeline_mode<synchronous>, transform_indices = @transform_2, window_bounds = array<i64: 1, 10>}, {pipeline_mode = #tpu.pipeline_mode<synchronous>, transform_indices = @transform_3, window_bounds = array<i64: 2, 32>}, {pipeline_mode = #tpu.pipeline_mode<synchronous>, transform_indices = @transform_4, window_bounds = array<i64: 2, 32>}, {pipeline_mode = #tpu.pipeline_mode<synchronous>, transform_indices = @transform_5, window_bounds = array<i64: 1, 2>}, {pipeline_mode = #tpu.pipeline_mode<synchronous>, transform_indices = @transform_6, window_bounds = array<i64: 2, 10>}, {pipeline_mode = #tpu.pipeline_mode<synchronous>, transform_indices = @transform_7, window_bounds = array<i64: 1, 32>}, {pipeline_mode = #tpu.pipeline_mode<synchronous>, transform_indices = @transform_8, window_bounds = array<i64: 1, 32>}, {pipeline_mode = #tpu.pipeline_mode<synchronous>, transform_indices = @transform_9, window_bounds = array<i64: 32, 32>}, {transform_indices = @transform_10, window_bounds = array<i64: 1, 1, 32>}, {transform_indices = @transform_11, window_bounds = array<i64: 1, 1, 32>}, {transform_indices = @transform_12, window_bounds = array<i64: 1, 32, 96>}, {transform_indices = @transform_13, window_bounds = array<i64: 1, 1, 96>}, {transform_indices = @transform_14, window_bounds = array<i64: 1, 32, 32>}, {transform_indices = @transform_15, window_bounds = array<i64: 1, 1, 32>}, {transform_indices = @transform_16, window_bounds = array<i64: 1, 1, 32>}, {transform_indices = @transform_17, window_bounds = array<i64: 1, 1, 32>}, {transform_indices = @transform_18, window_bounds = array<i64: 1, 32, 128>}, {transform_indices = @transform_19, window_bounds = array<i64: 1, 1, 128>}, {transform_indices = @transform_20, window_bounds = array<i64: 1, 128, 32>}, {transform_indices = @transform_21, window_bounds = array<i64: 1, 1, 32>}, {pipeline_mode = #tpu.pipeline_mode<synchronous>, transform_indices = @transform_22, window_bounds = array<i64: 2, 32>}]} {
    %c0_i32 = arith.constant 0 : i32
    %0 = arith.cmpi eq, %arg0, %c0_i32 : i32
    %1 = arith.extui %0 : i1 to i32
    %c0_i32_0 = arith.constant 0 : i32
    %2 = arith.cmpi ne, %1, %c0_i32_0 : i32
    scf.if %2 {
      %c0_110 = arith.constant 0 : index
      %c0_111 = arith.constant 0 : index
      %281 = vector.load %arg1[%c0_110, %c0_111] : memref<10x32xf32, #tpu.memory_space<vmem>>, vector<10x32xf32>
      %c0_112 = arith.constant 0 : index
      %c0_113 = arith.constant 0 : index
      %282 = vector.load %arg24[%c0_112, %c0_113] : memref<10x32xf32, #tpu.memory_space<vmem>>, vector<10x32xf32>
      tpu.vector_store %arg24[%c0_112, %c0_113], %281 {strides = array<i32>} : memref<10x32xf32, #tpu.memory_space<vmem>>, vector<10x32xf32>,
    } else {
    }
    %c0 = arith.constant 0 : index
    %c0_1 = arith.constant 0 : index
    %3 = vector.load %arg24[%c0, %c0_1] : memref<10x32xf32, #tpu.memory_space<vmem>>, vector<10x32xf32>
    %c0_2 = arith.constant 0 : index
    %c0_3 = arith.constant 0 : index
    %c0_4 = arith.constant 0 : index
    %4 = vector.load %arg11[%c0_2, %c0_3, %c0_4] : memref<1x1x32xf32, #tpu.memory_space<vmem>>, vector<1x1x32xf32>
    %5 = vector.shape_cast %4 : vector<1x1x32xf32> to vector<1x32xf32>
    %c0_5 = arith.constant 0 : index
    %c0_6 = arith.constant 0 : index
    %c0_7 = arith.constant 0 : index
    %6 = vector.load %arg12[%c0_5, %c0_6, %c0_7] : memref<1x1x32xf32, #tpu.memory_space<vmem>>, vector<1x1x32xf32>
    %7 = vector.shape_cast %6 : vector<1x1x32xf32> to vector<1x32xf32>
    %cst = arith.constant dense<0.000000e+00> : vector<10xf32>
    %8 = vector.multi_reduction <add>, %3, %cst [1] : vector<10x32xf32> to vector<10xf32>
    %9 = vector.shape_cast %8 : vector<10xf32> to vector<10x1xf32>
    %cst_8 = arith.constant 3.200000e+01 : f32
    %10 = vector.broadcast %cst_8 : f32 to vector<10x1xf32>
    %11 = arith.divf %9, %10 : vector<10x1xf32>
    %12 = vector.broadcast %11 : vector<10x1xf32> to vector<10x32xf32>
    %13 = arith.subf %3, %12 : vector<10x32xf32>
    %14 = arith.mulf %13, %13 : vector<10x32xf32>
    %cst_9 = arith.constant dense<0.000000e+00> : vector<10xf32>
    %15 = vector.multi_reduction <add>, %14, %cst_9 [1] : vector<10x32xf32> to vector<10xf32>
    %16 = vector.shape_cast %15 : vector<10xf32> to vector<10x1xf32>
    %cst_10 = arith.constant 3.200000e+01 : f32
    %17 = vector.broadcast %cst_10 : f32 to vector<10x1xf32>
    %18 = arith.divf %16, %17 : vector<10x1xf32>
    %19 = vector.broadcast %11 : vector<10x1xf32> to vector<10x32xf32>
    %20 = arith.subf %3, %19 : vector<10x32xf32>
    %cst_11 = arith.constant 9.99999974E-6 : f32
    %21 = vector.broadcast %cst_11 : f32 to vector<10x1xf32>
    %22 = arith.addf %18, %21 : vector<10x1xf32>
    %23 = math.rsqrt %22 : vector<10x1xf32>
    %24 = vector.broadcast %23 : vector<10x1xf32> to vector<10x32xf32>
    %25 = arith.mulf %20, %24 : vector<10x32xf32>
    %26 = vector.broadcast %5 : vector<1x32xf32> to vector<10x32xf32>
    %27 = arith.mulf %25, %26 : vector<10x32xf32>
    %28 = vector.broadcast %7 : vector<1x32xf32> to vector<10x32xf32>
    %29 = arith.addf %27, %28 : vector<10x32xf32>
    %c0_12 = arith.constant 0 : index
    %c0_13 = arith.constant 0 : index
    %30 = vector.load %arg2[%c0_12, %c0_13] : memref<10x1xf32, #tpu.memory_space<vmem>>, vector<10x1xf32>
    %c0_14 = arith.constant 0 : index
    %c0_15 = arith.constant 0 : index
    %31 = vector.load %arg3[%c0_14, %c0_15] : memref<1x10xf32, #tpu.memory_space<vmem>>, vector<1x10xf32>
    %32 = vector.broadcast %30 : vector<10x1xf32> to vector<10x10xf32>
    %33 = vector.broadcast %31 : vector<1x10xf32> to vector<10x10xf32>
    %34 = arith.cmpf oeq, %32, %33 : vector<10x10xf32>
    %cst_16 = arith.constant 0.000000e+00 : f32
    %cst_17 = arith.constant -1.000000e+30 : f32
    %35 = vector.broadcast %cst_16 : f32 to vector<10x10xf32>
    %36 = vector.broadcast %cst_17 : f32 to vector<10x10xf32>
    %37 = arith.select %34, %35, %36 : vector<10x10xi1>, vector<10x10xf32>
    %c0_18 = arith.constant 0 : index
    %c0_19 = arith.constant 0 : index
    %c0_20 = arith.constant 0 : index
    %38 = vector.load %arg13[%c0_18, %c0_19, %c0_20] : memref<1x32x96xbf16, #tpu.memory_space<vmem>>, vector<1x32x96xbf16>
    %39 = vector.shape_cast %38 : vector<1x32x96xbf16> to vector<32x96xbf16>
    %c0_21 = arith.constant 0 : index
    %c0_22 = arith.constant 0 : index
    %c0_23 = arith.constant 0 : index
    %40 = vector.load %arg14[%c0_21, %c0_22, %c0_23] : memref<1x1x96xf32, #tpu.memory_space<vmem>>, vector<1x1x96xf32>
    %41 = vector.shape_cast %40 : vector<1x1x96xf32> to vector<1x96xf32>
    %42 = arith.truncf %29 : vector<10x32xf32> to vector<10x32xbf16>
    %cst_24 = arith.constant dense<0.000000e+00> : vector<10x96xf32>
    %43 = tpu.matmul %42, %39, %cst_24 {dimension_numbers = #tpu.dot_dimension_numbers<[1], [0], [0], [1], [0, 0, 1, 1], [], []>} : vector<10x32xbf16>, vector<32x96xbf16>, vector<10x96xf32> -> vector<10x96xf32>
    %44 = vector.broadcast %41 : vector<1x96xf32> to vector<10x96xf32>
    %45 = arith.addf %43, %44 : vector<10x96xf32>
    %46 = vector.extract_strided_slice %45 {offsets = [0, 0], sizes = [10, 32], strides = [1, 1]} : vector<10x96xf32> to vector<10x32xf32>
    %cst_25 = arith.constant 0.353553385 : f32
    %47 = vector.broadcast %cst_25 : f32 to vector<10x32xf32>
    %48 = arith.mulf %46, %47 : vector<10x32xf32>
    %49 = arith.truncf %48 : vector<10x32xf32> to vector<10x32xbf16>
    %50 = vector.extract_strided_slice %45 {offsets = [0, 32], sizes = [10, 32], strides = [1, 1]} : vector<10x96xf32> to vector<10x32xf32>
    %51 = arith.truncf %50 : vector<10x32xf32> to vector<10x32xbf16>
    %52 = vector.extract_strided_slice %45 {offsets = [0, 64], sizes = [10, 32], strides = [1, 1]} : vector<10x96xf32> to vector<10x32xf32>
    %53 = arith.truncf %52 : vector<10x32xf32> to vector<10x32xbf16>
    %c0_26 = arith.constant 0 : index
    %c0_27 = arith.constant 0 : index
    %54 = vector.load %arg4[%c0_26, %c0_27] : memref<2x32xf32, #tpu.memory_space<vmem>>, vector<2x32xf32>
    %55 = arith.truncf %54 : vector<2x32xf32> to vector<2x32xbf16>
    %cst_28 = arith.constant dense<0.000000e+00> : vector<2x96xf32>
    %56 = tpu.matmul %55, %39, %cst_28 {dimension_numbers = #tpu.dot_dimension_numbers<[1], [0], [0], [1], [0, 0, 1, 1], [], []>} : vector<2x32xbf16>, vector<32x96xbf16>, vector<2x96xf32> -> vector<2x96xf32>
    %57 = vector.broadcast %41 : vector<1x96xf32> to vector<2x96xf32>
    %58 = arith.addf %56, %57 : vector<2x96xf32>
    %c0_29 = arith.constant 0 : index
    %c0_30 = arith.constant 0 : index
    %59 = vector.load %arg5[%c0_29, %c0_30] : memref<2x32xf32, #tpu.memory_space<vmem>>, vector<2x32xf32>
    %60 = arith.truncf %59 : vector<2x32xf32> to vector<2x32xbf16>
    %cst_31 = arith.constant dense<0.000000e+00> : vector<2x96xf32>
    %61 = tpu.matmul %60, %39, %cst_31 {dimension_numbers = #tpu.dot_dimension_numbers<[1], [0], [0], [1], [0, 0, 1, 1], [], []>} : vector<2x32xbf16>, vector<32x96xbf16>, vector<2x96xf32> -> vector<2x96xf32>
    %62 = vector.broadcast %41 : vector<1x96xf32> to vector<2x96xf32>
    %63 = arith.addf %61, %62 : vector<2x96xf32>
    %64 = vector.extract_strided_slice %58 {offsets = [0, 32], sizes = [2, 32], strides = [1, 1]} : vector<2x96xf32> to vector<2x32xf32>
    %65 = arith.truncf %64 : vector<2x32xf32> to vector<2x32xbf16>
    %66 = vector.extract_strided_slice %63 {offsets = [0, 64], sizes = [2, 32], strides = [1, 1]} : vector<2x96xf32> to vector<2x32xf32>
    %67 = arith.truncf %66 : vector<2x32xf32> to vector<2x32xbf16>
    %c0_i32_32 = arith.constant 0 : i32
    %68 = arith.cmpi eq, %arg0, %c0_i32_32 : i32
    %cst_33 = arith.constant 0.000000e+00 : f32
    %cst_34 = arith.constant -1.000000e+30 : f32
    %69 = arith.select %68, %cst_33, %cst_34 : f32
    %c0_35 = arith.constant 0 : index
    %c0_36 = arith.constant 0 : index
    %70 = vector.load %arg2[%c0_35, %c0_36] : memref<10x1xf32, #tpu.memory_space<vmem>>, vector<10x1xf32>
    %c0_37 = arith.constant 0 : index
    %c0_38 = arith.constant 0 : index
    %71 = vector.load %arg6[%c0_37, %c0_38] : memref<1x2xf32, #tpu.memory_space<vmem>>, vector<1x2xf32>
    %72 = vector.broadcast %70 : vector<10x1xf32> to vector<10x2xf32>
    %73 = vector.broadcast %71 : vector<1x2xf32> to vector<10x2xf32>
    %74 = arith.cmpf oeq, %72, %73 : vector<10x2xf32>
    %cst_39 = arith.constant 0.000000e+00 : f32
    %cst_40 = arith.constant -1.000000e+30 : f32
    %75 = vector.broadcast %cst_39 : f32 to vector<10x2xf32>
    %76 = vector.broadcast %cst_40 : f32 to vector<10x2xf32>
    %77 = arith.select %74, %75, %76 : vector<10x2xi1>, vector<10x2xf32>
    %78 = vector.broadcast %69 : f32 to vector<10x2xf32>
    %79 = arith.addf %77, %78 : vector<10x2xf32>
    %80 = vector.extract_strided_slice %49 {offsets = [0, 0], sizes = [10, 8], strides = [1, 1]} : vector<10x32xbf16> to vector<10x8xbf16>
    %81 = vector.extract_strided_slice %51 {offsets = [0, 0], sizes = [10, 8], strides = [1, 1]} : vector<10x32xbf16> to vector<10x8xbf16>
    %cst_41 = arith.constant dense<0.000000e+00> : vector<10x10xf32>
    %82 = tpu.matmul %80, %81, %cst_41 {dimension_numbers = #tpu.dot_dimension_numbers<[1], [1], [0], [0], [0, 0, 1, 0], [], []>} : vector<10x8xbf16>, vector<10x8xbf16>, vector<10x10xf32> -> vector<10x10xf32>
    %83 = arith.addf %82, %37 : vector<10x10xf32>
    %cst_42 = arith.constant dense<0xFF800000> : vector<10xf32>
    %84 = vector.multi_reduction <maximumf>, %83, %cst_42 [1] : vector<10x10xf32> to vector<10xf32>
    %85 = vector.shape_cast %84 : vector<10xf32> to vector<10x1xf32>
    %86 = vector.extract_strided_slice %49 {offsets = [0, 0], sizes = [10, 8], strides = [1, 1]} : vector<10x32xbf16> to vector<10x8xbf16>
    %87 = vector.extract_strided_slice %65 {offsets = [0, 0], sizes = [2, 8], strides = [1, 1]} : vector<2x32xbf16> to vector<2x8xbf16>
    %cst_43 = arith.constant dense<0.000000e+00> : vector<10x2xf32>
    %88 = tpu.matmul %86, %87, %cst_43 {dimension_numbers = #tpu.dot_dimension_numbers<[1], [1], [0], [0], [0, 0, 1, 0], [], []>} : vector<10x8xbf16>, vector<2x8xbf16>, vector<10x2xf32> -> vector<10x2xf32>
    %89 = arith.addf %88, %79 : vector<10x2xf32>
    %cst_44 = arith.constant dense<0xFF800000> : vector<10xf32>
    %90 = vector.multi_reduction <maximumf>, %89, %cst_44 [1] : vector<10x2xf32> to vector<10xf32>
    %91 = vector.shape_cast %90 : vector<10xf32> to vector<10x1xf32>
    %92 = arith.maximumf %85, %91 : vector<10x1xf32>
    %93 = vector.broadcast %92 : vector<10x1xf32> to vector<10x10xf32>
    %94 = arith.subf %83, %93 : vector<10x10xf32>
    %95 = math.exp %94 : vector<10x10xf32>
    %cst_45 = arith.constant dense<0.000000e+00> : vector<10xf32>
    %96 = vector.multi_reduction <add>, %95, %cst_45 [1] : vector<10x10xf32> to vector<10xf32>
    %97 = vector.shape_cast %96 : vector<10xf32> to vector<10x1xf32>
    %98 = arith.truncf %95 : vector<10x10xf32> to vector<10x10xbf16>
    %99 = vector.extract_strided_slice %53 {offsets = [0, 0], sizes = [10, 8], strides = [1, 1]} : vector<10x32xbf16> to vector<10x8xbf16>
    %cst_46 = arith.constant dense<0.000000e+00> : vector<10x8xf32>
    %100 = tpu.matmul %98, %99, %cst_46 {dimension_numbers = #tpu.dot_dimension_numbers<[1], [0], [0], [1], [0, 0, 1, 1], [], []>} : vector<10x10xbf16>, vector<10x8xbf16>, vector<10x8xf32> -> vector<10x8xf32>
    %101 = vector.broadcast %92 : vector<10x1xf32> to vector<10x2xf32>
    %102 = arith.subf %89, %101 : vector<10x2xf32>
    %103 = math.exp %102 : vector<10x2xf32>
    %cst_47 = arith.constant dense<0.000000e+00> : vector<10xf32>
    %104 = vector.multi_reduction <add>, %103, %cst_47 [1] : vector<10x2xf32> to vector<10xf32>
    %105 = vector.shape_cast %104 : vector<10xf32> to vector<10x1xf32>
    %106 = arith.addf %97, %105 : vector<10x1xf32>
    %107 = arith.truncf %103 : vector<10x2xf32> to vector<10x2xbf16>
    %108 = vector.extract_strided_slice %67 {offsets = [0, 0], sizes = [2, 8], strides = [1, 1]} : vector<2x32xbf16> to vector<2x8xbf16>
    %cst_48 = arith.constant dense<0.000000e+00> : vector<10x8xf32>
    %109 = tpu.matmul %107, %108, %cst_48 {dimension_numbers = #tpu.dot_dimension_numbers<[1], [0], [0], [1], [0, 0, 1, 1], [], []>} : vector<10x2xbf16>, vector<2x8xbf16>, vector<10x8xf32> -> vector<10x8xf32>
    %110 = arith.addf %100, %109 : vector<10x8xf32>
    %111 = tpu.reciprocal %106 {approx = true} : vector<10x1xf32> -> vector<10x1xf32>
    %112 = vector.broadcast %111 : vector<10x1xf32> to vector<10x8xf32>
    %113 = arith.mulf %110, %112 : vector<10x8xf32>
    %114 = vector.extract_strided_slice %49 {offsets = [0, 8], sizes = [10, 8], strides = [1, 1]} : vector<10x32xbf16> to vector<10x8xbf16>
    %115 = vector.extract_strided_slice %51 {offsets = [0, 8], sizes = [10, 8], strides = [1, 1]} : vector<10x32xbf16> to vector<10x8xbf16>
    %cst_49 = arith.constant dense<0.000000e+00> : vector<10x10xf32>
    %116 = tpu.matmul %114, %115, %cst_49 {dimension_numbers = #tpu.dot_dimension_numbers<[1], [1], [0], [0], [0, 0, 1, 0], [], []>} : vector<10x8xbf16>, vector<10x8xbf16>, vector<10x10xf32> -> vector<10x10xf32>
    %117 = arith.addf %116, %37 : vector<10x10xf32>
    %cst_50 = arith.constant dense<0xFF800000> : vector<10xf32>
    %118 = vector.multi_reduction <maximumf>, %117, %cst_50 [1] : vector<10x10xf32> to vector<10xf32>
    %119 = vector.shape_cast %118 : vector<10xf32> to vector<10x1xf32>
    %120 = vector.extract_strided_slice %49 {offsets = [0, 8], sizes = [10, 8], strides = [1, 1]} : vector<10x32xbf16> to vector<10x8xbf16>
    %121 = vector.extract_strided_slice %65 {offsets = [0, 8], sizes = [2, 8], strides = [1, 1]} : vector<2x32xbf16> to vector<2x8xbf16>
    %cst_51 = arith.constant dense<0.000000e+00> : vector<10x2xf32>
    %122 = tpu.matmul %120, %121, %cst_51 {dimension_numbers = #tpu.dot_dimension_numbers<[1], [1], [0], [0], [0, 0, 1, 0], [], []>} : vector<10x8xbf16>, vector<2x8xbf16>, vector<10x2xf32> -> vector<10x2xf32>
    %123 = arith.addf %122, %79 : vector<10x2xf32>
    %cst_52 = arith.constant dense<0xFF800000> : vector<10xf32>
    %124 = vector.multi_reduction <maximumf>, %123, %cst_52 [1] : vector<10x2xf32> to vector<10xf32>
    %125 = vector.shape_cast %124 : vector<10xf32> to vector<10x1xf32>
    %126 = arith.maximumf %119, %125 : vector<10x1xf32>
    %127 = vector.broadcast %126 : vector<10x1xf32> to vector<10x10xf32>
    %128 = arith.subf %117, %127 : vector<10x10xf32>
    %129 = math.exp %128 : vector<10x10xf32>
    %cst_53 = arith.constant dense<0.000000e+00> : vector<10xf32>
    %130 = vector.multi_reduction <add>, %129, %cst_53 [1] : vector<10x10xf32> to vector<10xf32>
    %131 = vector.shape_cast %130 : vector<10xf32> to vector<10x1xf32>
    %132 = arith.truncf %129 : vector<10x10xf32> to vector<10x10xbf16>
    %133 = vector.extract_strided_slice %53 {offsets = [0, 8], sizes = [10, 8], strides = [1, 1]} : vector<10x32xbf16> to vector<10x8xbf16>
    %cst_54 = arith.constant dense<0.000000e+00> : vector<10x8xf32>
    %134 = tpu.matmul %132, %133, %cst_54 {dimension_numbers = #tpu.dot_dimension_numbers<[1], [0], [0], [1], [0, 0, 1, 1], [], []>} : vector<10x10xbf16>, vector<10x8xbf16>, vector<10x8xf32> -> vector<10x8xf32>
    %135 = vector.broadcast %126 : vector<10x1xf32> to vector<10x2xf32>
    %136 = arith.subf %123, %135 : vector<10x2xf32>
    %137 = math.exp %136 : vector<10x2xf32>
    %cst_55 = arith.constant dense<0.000000e+00> : vector<10xf32>
    %138 = vector.multi_reduction <add>, %137, %cst_55 [1] : vector<10x2xf32> to vector<10xf32>
    %139 = vector.shape_cast %138 : vector<10xf32> to vector<10x1xf32>
    %140 = arith.addf %131, %139 : vector<10x1xf32>
    %141 = arith.truncf %137 : vector<10x2xf32> to vector<10x2xbf16>
    %142 = vector.extract_strided_slice %67 {offsets = [0, 8], sizes = [2, 8], strides = [1, 1]} : vector<2x32xbf16> to vector<2x8xbf16>
    %cst_56 = arith.constant dense<0.000000e+00> : vector<10x8xf32>
    %143 = tpu.matmul %141, %142, %cst_56 {dimension_numbers = #tpu.dot_dimension_numbers<[1], [0], [0], [1], [0, 0, 1, 1], [], []>} : vector<10x2xbf16>, vector<2x8xbf16>, vector<10x8xf32> -> vector<10x8xf32>
    %144 = arith.addf %134, %143 : vector<10x8xf32>
    %145 = tpu.reciprocal %140 {approx = true} : vector<10x1xf32> -> vector<10x1xf32>
    %146 = vector.broadcast %145 : vector<10x1xf32> to vector<10x8xf32>
    %147 = arith.mulf %144, %146 : vector<10x8xf32>
    %148 = vector.extract_strided_slice %49 {offsets = [0, 16], sizes = [10, 8], strides = [1, 1]} : vector<10x32xbf16> to vector<10x8xbf16>
    %149 = vector.extract_strided_slice %51 {offsets = [0, 16], sizes = [10, 8], strides = [1, 1]} : vector<10x32xbf16> to vector<10x8xbf16>
    %cst_57 = arith.constant dense<0.000000e+00> : vector<10x10xf32>
    %150 = tpu.matmul %148, %149, %cst_57 {dimension_numbers = #tpu.dot_dimension_numbers<[1], [1], [0], [0], [0, 0, 1, 0], [], []>} : vector<10x8xbf16>, vector<10x8xbf16>, vector<10x10xf32> -> vector<10x10xf32>
    %151 = arith.addf %150, %37 : vector<10x10xf32>
    %cst_58 = arith.constant dense<0xFF800000> : vector<10xf32>
    %152 = vector.multi_reduction <maximumf>, %151, %cst_58 [1] : vector<10x10xf32> to vector<10xf32>
    %153 = vector.shape_cast %152 : vector<10xf32> to vector<10x1xf32>
    %154 = vector.extract_strided_slice %49 {offsets = [0, 16], sizes = [10, 8], strides = [1, 1]} : vector<10x32xbf16> to vector<10x8xbf16>
    %155 = vector.extract_strided_slice %65 {offsets = [0, 16], sizes = [2, 8], strides = [1, 1]} : vector<2x32xbf16> to vector<2x8xbf16>
    %cst_59 = arith.constant dense<0.000000e+00> : vector<10x2xf32>
    %156 = tpu.matmul %154, %155, %cst_59 {dimension_numbers = #tpu.dot_dimension_numbers<[1], [1], [0], [0], [0, 0, 1, 0], [], []>} : vector<10x8xbf16>, vector<2x8xbf16>, vector<10x2xf32> -> vector<10x2xf32>
    %157 = arith.addf %156, %79 : vector<10x2xf32>
    %cst_60 = arith.constant dense<0xFF800000> : vector<10xf32>
    %158 = vector.multi_reduction <maximumf>, %157, %cst_60 [1] : vector<10x2xf32> to vector<10xf32>
    %159 = vector.shape_cast %158 : vector<10xf32> to vector<10x1xf32>
    %160 = arith.maximumf %153, %159 : vector<10x1xf32>
    %161 = vector.broadcast %160 : vector<10x1xf32> to vector<10x10xf32>
    %162 = arith.subf %151, %161 : vector<10x10xf32>
    %163 = math.exp %162 : vector<10x10xf32>
    %cst_61 = arith.constant dense<0.000000e+00> : vector<10xf32>
    %164 = vector.multi_reduction <add>, %163, %cst_61 [1] : vector<10x10xf32> to vector<10xf32>
    %165 = vector.shape_cast %164 : vector<10xf32> to vector<10x1xf32>
    %166 = arith.truncf %163 : vector<10x10xf32> to vector<10x10xbf16>
    %167 = vector.extract_strided_slice %53 {offsets = [0, 16], sizes = [10, 8], strides = [1, 1]} : vector<10x32xbf16> to vector<10x8xbf16>
    %cst_62 = arith.constant dense<0.000000e+00> : vector<10x8xf32>
    %168 = tpu.matmul %166, %167, %cst_62 {dimension_numbers = #tpu.dot_dimension_numbers<[1], [0], [0], [1], [0, 0, 1, 1], [], []>} : vector<10x10xbf16>, vector<10x8xbf16>, vector<10x8xf32> -> vector<10x8xf32>
    %169 = vector.broadcast %160 : vector<10x1xf32> to vector<10x2xf32>
    %170 = arith.subf %157, %169 : vector<10x2xf32>
    %171 = math.exp %170 : vector<10x2xf32>
    %cst_63 = arith.constant dense<0.000000e+00> : vector<10xf32>
    %172 = vector.multi_reduction <add>, %171, %cst_63 [1] : vector<10x2xf32> to vector<10xf32>
    %173 = vector.shape_cast %172 : vector<10xf32> to vector<10x1xf32>
    %174 = arith.addf %165, %173 : vector<10x1xf32>
    %175 = arith.truncf %171 : vector<10x2xf32> to vector<10x2xbf16>
    %176 = vector.extract_strided_slice %67 {offsets = [0, 16], sizes = [2, 8], strides = [1, 1]} : vector<2x32xbf16> to vector<2x8xbf16>
    %cst_64 = arith.constant dense<0.000000e+00> : vector<10x8xf32>
    %177 = tpu.matmul %175, %176, %cst_64 {dimension_numbers = #tpu.dot_dimension_numbers<[1], [0], [0], [1], [0, 0, 1, 1], [], []>} : vector<10x2xbf16>, vector<2x8xbf16>, vector<10x8xf32> -> vector<10x8xf32>
    %178 = arith.addf %168, %177 : vector<10x8xf32>
    %179 = tpu.reciprocal %174 {approx = true} : vector<10x1xf32> -> vector<10x1xf32>
    %180 = vector.broadcast %179 : vector<10x1xf32> to vector<10x8xf32>
    %181 = arith.mulf %178, %180 : vector<10x8xf32>
    %182 = vector.extract_strided_slice %49 {offsets = [0, 24], sizes = [10, 8], strides = [1, 1]} : vector<10x32xbf16> to vector<10x8xbf16>
    %183 = vector.extract_strided_slice %51 {offsets = [0, 24], sizes = [10, 8], strides = [1, 1]} : vector<10x32xbf16> to vector<10x8xbf16>
    %cst_65 = arith.constant dense<0.000000e+00> : vector<10x10xf32>
    %184 = tpu.matmul %182, %183, %cst_65 {dimension_numbers = #tpu.dot_dimension_numbers<[1], [1], [0], [0], [0, 0, 1, 0], [], []>} : vector<10x8xbf16>, vector<10x8xbf16>, vector<10x10xf32> -> vector<10x10xf32>
    %185 = arith.addf %184, %37 : vector<10x10xf32>
    %cst_66 = arith.constant dense<0xFF800000> : vector<10xf32>
    %186 = vector.multi_reduction <maximumf>, %185, %cst_66 [1] : vector<10x10xf32> to vector<10xf32>
    %187 = vector.shape_cast %186 : vector<10xf32> to vector<10x1xf32>
    %188 = vector.extract_strided_slice %49 {offsets = [0, 24], sizes = [10, 8], strides = [1, 1]} : vector<10x32xbf16> to vector<10x8xbf16>
    %189 = vector.extract_strided_slice %65 {offsets = [0, 24], sizes = [2, 8], strides = [1, 1]} : vector<2x32xbf16> to vector<2x8xbf16>
    %cst_67 = arith.constant dense<0.000000e+00> : vector<10x2xf32>
    %190 = tpu.matmul %188, %189, %cst_67 {dimension_numbers = #tpu.dot_dimension_numbers<[1], [1], [0], [0], [0, 0, 1, 0], [], []>} : vector<10x8xbf16>, vector<2x8xbf16>, vector<10x2xf32> -> vector<10x2xf32>
    %191 = arith.addf %190, %79 : vector<10x2xf32>
    %cst_68 = arith.constant dense<0xFF800000> : vector<10xf32>
    %192 = vector.multi_reduction <maximumf>, %191, %cst_68 [1] : vector<10x2xf32> to vector<10xf32>
    %193 = vector.shape_cast %192 : vector<10xf32> to vector<10x1xf32>
    %194 = arith.maximumf %187, %193 : vector<10x1xf32>
    %195 = vector.broadcast %194 : vector<10x1xf32> to vector<10x10xf32>
    %196 = arith.subf %185, %195 : vector<10x10xf32>
    %197 = math.exp %196 : vector<10x10xf32>
    %cst_69 = arith.constant dense<0.000000e+00> : vector<10xf32>
    %198 = vector.multi_reduction <add>, %197, %cst_69 [1] : vector<10x10xf32> to vector<10xf32>
    %199 = vector.shape_cast %198 : vector<10xf32> to vector<10x1xf32>
    %200 = arith.truncf %197 : vector<10x10xf32> to vector<10x10xbf16>
    %201 = vector.extract_strided_slice %53 {offsets = [0, 24], sizes = [10, 8], strides = [1, 1]} : vector<10x32xbf16> to vector<10x8xbf16>
    %cst_70 = arith.constant dense<0.000000e+00> : vector<10x8xf32>
    %202 = tpu.matmul %200, %201, %cst_70 {dimension_numbers = #tpu.dot_dimension_numbers<[1], [0], [0], [1], [0, 0, 1, 1], [], []>} : vector<10x10xbf16>, vector<10x8xbf16>, vector<10x8xf32> -> vector<10x8xf32>
    %203 = vector.broadcast %194 : vector<10x1xf32> to vector<10x2xf32>
    %204 = arith.subf %191, %203 : vector<10x2xf32>
    %205 = math.exp %204 : vector<10x2xf32>
    %cst_71 = arith.constant dense<0.000000e+00> : vector<10xf32>
    %206 = vector.multi_reduction <add>, %205, %cst_71 [1] : vector<10x2xf32> to vector<10xf32>
    %207 = vector.shape_cast %206 : vector<10xf32> to vector<10x1xf32>
    %208 = arith.addf %199, %207 : vector<10x1xf32>
    %209 = arith.truncf %205 : vector<10x2xf32> to vector<10x2xbf16>
    %210 = vector.extract_strided_slice %67 {offsets = [0, 24], sizes = [2, 8], strides = [1, 1]} : vector<2x32xbf16> to vector<2x8xbf16>
    %cst_72 = arith.constant dense<0.000000e+00> : vector<10x8xf32>
    %211 = tpu.matmul %209, %210, %cst_72 {dimension_numbers = #tpu.dot_dimension_numbers<[1], [0], [0], [1], [0, 0, 1, 1], [], []>} : vector<10x2xbf16>, vector<2x8xbf16>, vector<10x8xf32> -> vector<10x8xf32>
    %212 = arith.addf %202, %211 : vector<10x8xf32>
    %213 = tpu.reciprocal %208 {approx = true} : vector<10x1xf32> -> vector<10x1xf32>
    %214 = vector.broadcast %213 : vector<10x1xf32> to vector<10x8xf32>
    %215 = arith.mulf %212, %214 : vector<10x8xf32>
    %216 = tpu.concatenate %113, %147, %181, %215 in 1 : vector<10x8xf32>, vector<10x8xf32>, vector<10x8xf32>, vector<10x8xf32> -> vector<10x32xf32>
    %217 = arith.truncf %216 : vector<10x32xf32> to vector<10x32xbf16>
    %c0_73 = arith.constant 0 : index
    %c0_74 = arith.constant 0 : index
    %c0_75 = arith.constant 0 : index
    %218 = vector.load %arg15[%c0_73, %c0_74, %c0_75] : memref<1x32x32xbf16, #tpu.memory_space<vmem>>, vector<1x32x32xbf16>
    %219 = vector.shape_cast %218 : vector<1x32x32xbf16> to vector<32x32xbf16>
    %cst_76 = arith.constant dense<0.000000e+00> : vector<10x32xf32>
    %220 = tpu.matmul %217, %219, %cst_76 {dimension_numbers = #tpu.dot_dimension_numbers<[1], [0], [0], [1], [0, 0, 1, 1], [], []>} : vector<10x32xbf16>, vector<32x32xbf16>, vector<10x32xf32> -> vector<10x32xf32>
    %c0_77 = arith.constant 0 : index
    %c0_78 = arith.constant 0 : index
    %c0_79 = arith.constant 0 : index
    %221 = vector.load %arg16[%c0_77, %c0_78, %c0_79] : memref<1x1x32xf32, #tpu.memory_space<vmem>>, vector<1x1x32xf32>
    %222 = vector.shape_cast %221 : vector<1x1x32xf32> to vector<1x32xf32>
    %223 = vector.broadcast %222 : vector<1x32xf32> to vector<10x32xf32>
    %224 = arith.addf %220, %223 : vector<10x32xf32>
    %225 = arith.addf %3, %224 : vector<10x32xf32>
    %c0_80 = arith.constant 0 : index
    %c0_81 = arith.constant 0 : index
    %c0_82 = arith.constant 0 : index
    %226 = vector.load %arg17[%c0_80, %c0_81, %c0_82] : memref<1x1x32xf32, #tpu.memory_space<vmem>>, vector<1x1x32xf32>
    %227 = vector.shape_cast %226 : vector<1x1x32xf32> to vector<1x32xf32>
    %c0_83 = arith.constant 0 : index
    %c0_84 = arith.constant 0 : index
    %c0_85 = arith.constant 0 : index
    %228 = vector.load %arg18[%c0_83, %c0_84, %c0_85] : memref<1x1x32xf32, #tpu.memory_space<vmem>>, vector<1x1x32xf32>
    %229 = vector.shape_cast %228 : vector<1x1x32xf32> to vector<1x32xf32>
    %cst_86 = arith.constant dense<0.000000e+00> : vector<10xf32>
    %230 = vector.multi_reduction <add>, %225, %cst_86 [1] : vector<10x32xf32> to vector<10xf32>
    %231 = vector.shape_cast %230 : vector<10xf32> to vector<10x1xf32>
    %cst_87 = arith.constant 3.200000e+01 : f32
    %232 = vector.broadcast %cst_87 : f32 to vector<10x1xf32>
    %233 = arith.divf %231, %232 : vector<10x1xf32>
    %234 = vector.broadcast %233 : vector<10x1xf32> to vector<10x32xf32>
    %235 = arith.subf %225, %234 : vector<10x32xf32>
    %236 = arith.mulf %235, %235 : vector<10x32xf32>
    %cst_88 = arith.constant dense<0.000000e+00> : vector<10xf32>
    %237 = vector.multi_reduction <add>, %236, %cst_88 [1] : vector<10x32xf32> to vector<10xf32>
    %238 = vector.shape_cast %237 : vector<10xf32> to vector<10x1xf32>
    %cst_89 = arith.constant 3.200000e+01 : f32
    %239 = vector.broadcast %cst_89 : f32 to vector<10x1xf32>
    %240 = arith.divf %238, %239 : vector<10x1xf32>
    %241 = vector.broadcast %233 : vector<10x1xf32> to vector<10x32xf32>
    %242 = arith.subf %225, %241 : vector<10x32xf32>
    %cst_90 = arith.constant 9.99999974E-6 : f32
    %243 = vector.broadcast %cst_90 : f32 to vector<10x1xf32>
    %244 = arith.addf %240, %243 : vector<10x1xf32>
    %245 = math.rsqrt %244 : vector<10x1xf32>
    %246 = vector.broadcast %245 : vector<10x1xf32> to vector<10x32xf32>
    %247 = arith.mulf %242, %246 : vector<10x32xf32>
    %248 = vector.broadcast %227 : vector<1x32xf32> to vector<10x32xf32>
    %249 = arith.mulf %247, %248 : vector<10x32xf32>
    %250 = vector.broadcast %229 : vector<1x32xf32> to vector<10x32xf32>
    %251 = arith.addf %249, %250 : vector<10x32xf32>
    %252 = arith.truncf %251 : vector<10x32xf32> to vector<10x32xbf16>
    %c0_91 = arith.constant 0 : index
    %c0_92 = arith.constant 0 : index
    %c0_93 = arith.constant 0 : index
    %253 = vector.load %arg19[%c0_91, %c0_92, %c0_93] : memref<1x32x128xbf16, #tpu.memory_space<vmem>>, vector<1x32x128xbf16>
    %254 = vector.shape_cast %253 : vector<1x32x128xbf16> to vector<32x128xbf16>
    %cst_94 = arith.constant dense<0.000000e+00> : vector<10x128xf32>
    %255 = tpu.matmul %252, %254, %cst_94 {dimension_numbers = #tpu.dot_dimension_numbers<[1], [0], [0], [1], [0, 0, 1, 1], [], []>} : vector<10x32xbf16>, vector<32x128xbf16>, vector<10x128xf32> -> vector<10x128xf32>
    %c0_95 = arith.constant 0 : index
    %c0_96 = arith.constant 0 : index
    %c0_97 = arith.constant 0 : index
    %256 = vector.load %arg20[%c0_95, %c0_96, %c0_97] : memref<1x1x128xf32, #tpu.memory_space<vmem>>, vector<1x1x128xf32>
    %257 = vector.shape_cast %256 : vector<1x1x128xf32> to vector<1x128xf32>
    %258 = vector.broadcast %257 : vector<1x128xf32> to vector<10x128xf32>
    %259 = arith.addf %255, %258 : vector<10x128xf32>
    %cst_98 = arith.constant 1.702000e+00 : f32
    %260 = vector.broadcast %cst_98 : f32 to vector<10x128xf32>
    %261 = arith.mulf %260, %259 : vector<10x128xf32>
    %262 = arith.negf %261 : vector<10x128xf32>
    %263 = math.exp %262 : vector<10x128xf32>
    %cst_99 = arith.constant 1.000000e+00 : f32
    %264 = vector.broadcast %cst_99 : f32 to vector<10x128xf32>
    %265 = arith.addf %264, %263 : vector<10x128xf32>
    %266 = arith.divf %264, %265 : vector<10x128xf32>
    %267 = arith.mulf %259, %266 : vector<10x128xf32>
    %268 = arith.truncf %267 : vector<10x128xf32> to vector<10x128xbf16>
    %c0_100 = arith.constant 0 : index
    %c0_101 = arith.constant 0 : index
    %c0_102 = arith.constant 0 : index
    %269 = vector.load %arg21[%c0_100, %c0_101, %c0_102] : memref<1x128x32xbf16, #tpu.memory_space<vmem>>, vector<1x128x32xbf16>
    %270 = vector.shape_cast %269 : vector<1x128x32xbf16> to vector<128x32xbf16>
    %cst_103 = arith.constant dense<0.000000e+00> : vector<10x32xf32>
    %271 = tpu.matmul %268, %270, %cst_103 {dimension_numbers = #tpu.dot_dimension_numbers<[1], [0], [0], [1], [0, 0, 1, 1], [], []>} : vector<10x128xbf16>, vector<128x32xbf16>, vector<10x32xf32> -> vector<10x32xf32>
    %272 = arith.addf %225, %271 : vector<10x32xf32>
    %c0_104 = arith.constant 0 : index
    %c0_105 = arith.constant 0 : index
    %c0_106 = arith.constant 0 : index
    %273 = vector.load %arg22[%c0_104, %c0_105, %c0_106] : memref<1x1x32xf32, #tpu.memory_space<vmem>>, vector<1x1x32xf32>
    %274 = vector.shape_cast %273 : vector<1x1x32xf32> to vector<1x32xf32>
    %275 = vector.broadcast %274 : vector<1x32xf32> to vector<10x32xf32>
    %276 = arith.addf %272, %275 : vector<10x32xf32>
    %c0_107 = arith.constant 0 : index
    %c0_108 = arith.constant 0 : index
    %277 = vector.load %arg24[%c0_107, %c0_108] : memref<10x32xf32, #tpu.memory_space<vmem>>, vector<10x32xf32>
    tpu.vector_store %arg24[%c0_107, %c0_108], %276 {strides = array<i32>} : memref<10x32xf32, #tpu.memory_space<vmem>>, vector<10x32xf32>,
    %c11_i32 = arith.constant 11 : i32
    %278 = arith.cmpi eq, %arg0, %c11_i32 : i32
    %279 = arith.extui %278 : i1 to i32
    %c0_i32_109 = arith.constant 0 : i32
    %280 = arith.cmpi ne, %279, %c0_i32_109 : i32
    scf.if %280 {
      %c0_110 = arith.constant 0 : index
      %c0_111 = arith.constant 0 : index
      %281 = vector.load %arg7[%c0_110, %c0_111] : memref<2x10xf32, #tpu.memory_space<vmem>>, vector<2x10xf32>
      %cst_112 = arith.constant dense<0.000000e+00> : vector<2x32xf32>
      %282 = tpu.matmul %281, %276, %cst_112 {dimension_numbers = #tpu.dot_dimension_numbers<[1], [0], [0], [1], [0, 0, 1, 1], [], []>} : vector<2x10xf32>, vector<10x32xf32>, vector<2x32xf32> -> vector<2x32xf32>
      %c0_113 = arith.constant 0 : index
      %c0_114 = arith.constant 0 : index
      %283 = vector.load %arg8[%c0_113, %c0_114] : memref<1x32xf32, #tpu.memory_space<vmem>>, vector<1x32xf32>
      %c0_115 = arith.constant 0 : index
      %c0_116 = arith.constant 0 : index
      %284 = vector.load %arg9[%c0_115, %c0_116] : memref<1x32xf32, #tpu.memory_space<vmem>>, vector<1x32xf32>
      %cst_117 = arith.constant dense<0.000000e+00> : vector<2xf32>
      %285 = vector.multi_reduction <add>, %282, %cst_117 [1] : vector<2x32xf32> to vector<2xf32>
      %286 = vector.shape_cast %285 : vector<2xf32> to vector<2x1xf32>
      %cst_118 = arith.constant 3.200000e+01 : f32
      %287 = vector.broadcast %cst_118 : f32 to vector<2x1xf32>
      %288 = arith.divf %286, %287 : vector<2x1xf32>
      %289 = vector.broadcast %288 : vector<2x1xf32> to vector<2x32xf32>
      %290 = arith.subf %282, %289 : vector<2x32xf32>
      %291 = arith.mulf %290, %290 : vector<2x32xf32>
      %cst_119 = arith.constant dense<0.000000e+00> : vector<2xf32>
      %292 = vector.multi_reduction <add>, %291, %cst_119 [1] : vector<2x32xf32> to vector<2xf32>
      %293 = vector.shape_cast %292 : vector<2xf32> to vector<2x1xf32>
      %cst_120 = arith.constant 3.200000e+01 : f32
      %294 = vector.broadcast %cst_120 : f32 to vector<2x1xf32>
      %295 = arith.divf %293, %294 : vector<2x1xf32>
      %296 = vector.broadcast %288 : vector<2x1xf32> to vector<2x32xf32>
      %297 = arith.subf %282, %296 : vector<2x32xf32>
      %cst_121 = arith.constant 9.99999974E-6 : f32
      %298 = vector.broadcast %cst_121 : f32 to vector<2x1xf32>
      %299 = arith.addf %295, %298 : vector<2x1xf32>
      %300 = math.rsqrt %299 : vector<2x1xf32>
      %301 = vector.broadcast %300 : vector<2x1xf32> to vector<2x32xf32>
      %302 = arith.mulf %297, %301 : vector<2x32xf32>
      %303 = vector.broadcast %283 : vector<1x32xf32> to vector<2x32xf32>
      %304 = arith.mulf %302, %303 : vector<2x32xf32>
      %305 = vector.broadcast %284 : vector<1x32xf32> to vector<2x32xf32>
      %306 = arith.addf %304, %305 : vector<2x32xf32>
      %c0_122 = arith.constant 0 : index
      %c0_123 = arith.constant 0 : index
      %307 = vector.load %arg10[%c0_122, %c0_123] : memref<32x32xf32, #tpu.memory_space<vmem>>, vector<32x32xf32>
      %cst_124 = arith.constant dense<0.000000e+00> : vector<2x32xf32>
      %308 = tpu.matmul %306, %307, %cst_124 {dimension_numbers = #tpu.dot_dimension_numbers<[1], [0], [0], [1], [0, 0, 1, 1], [], []>} : vector<2x32xf32>, vector<32x32xf32>, vector<2x32xf32> -> vector<2x32xf32>
      %c0_125 = arith.constant 0 : index
      %c0_126 = arith.constant 0 : index
      %309 = vector.load %arg23[%c0_125, %c0_126] : memref<2x32xf32, #tpu.memory_space<vmem>>, vector<2x32xf32>
      tpu.vector_store %arg23[%c0_125, %c0_126], %308 {strides = array<i32>} : memref<2x32xf32, #tpu.memory_space<vmem>>, vector<2x32xf32>,
    } else {
    }
    return
  }
  func.func @transform_0(%arg0: i32) -> (i32, i32) {
    %c0_i32 = arith.constant 0 : i32
    %c0_i32_0 = arith.constant 0 : i32
    %c0_i32_1 = arith.constant 0 : i32
    return %c0_i32, %c0_i32_0 : i32, i32
  }
  func.func @transform_1(%arg0: i32) -> (i32, i32) {
    %c0_i32 = arith.constant 0 : i32
    %c0_i32_0 = arith.constant 0 : i32
    %c0_i32_1 = arith.constant 0 : i32
    return %c0_i32, %c0_i32_0 : i32, i32
  }
  func.func @transform_2(%arg0: i32) -> (i32, i32) {
    %c0_i32 = arith.constant 0 : i32
    %c0_i32_0 = arith.constant 0 : i32
    %c0_i32_1 = arith.constant 0 : i32
    return %c0_i32, %c0_i32_0 : i32, i32
  }
  func.func @transform_3(%arg0: i32) -> (i32, i32) {
    %c0_i32 = arith.constant 0 : i32
    %c0_i32_0 = arith.constant 0 : i32
    %c0_i32_1 = arith.constant 0 : i32
    return %c0_i32, %c0_i32_0 : i32, i32
  }
  func.func @transform_4(%arg0: i32) -> (i32, i32) {
    %c0_i32 = arith.constant 0 : i32
    %c0_i32_0 = arith.constant 0 : i32
    %c0_i32_1 = arith.constant 0 : i32
    return %c0_i32, %c0_i32_0 : i32, i32
  }
  func.func @transform_5(%arg0: i32) -> (i32, i32) {
    %c0_i32 = arith.constant 0 : i32
    %c0_i32_0 = arith.constant 0 : i32
    %c0_i32_1 = arith.constant 0 : i32
    return %c0_i32, %c0_i32_0 : i32, i32
  }
  func.func @transform_6(%arg0: i32) -> (i32, i32) {
    %c0_i32 = arith.constant 0 : i32
    %c0_i32_0 = arith.constant 0 : i32
    %c0_i32_1 = arith.constant 0 : i32
    return %c0_i32, %c0_i32_0 : i32, i32
  }
  func.func @transform_7(%arg0: i32) -> (i32, i32) {
    %c0_i32 = arith.constant 0 : i32
    %c0_i32_0 = arith.constant 0 : i32
    %c0_i32_1 = arith.constant 0 : i32
    return %c0_i32, %c0_i32_0 : i32, i32
  }
  func.func @transform_8(%arg0: i32) -> (i32, i32) {
    %c0_i32 = arith.constant 0 : i32
    %c0_i32_0 = arith.constant 0 : i32
    %c0_i32_1 = arith.constant 0 : i32
    return %c0_i32, %c0_i32_0 : i32, i32
  }
  func.func @transform_9(%arg0: i32) -> (i32, i32) {
    %c0_i32 = arith.constant 0 : i32
    %c0_i32_0 = arith.constant 0 : i32
    %c0_i32_1 = arith.constant 0 : i32
    return %c0_i32, %c0_i32_0 : i32, i32
  }
  func.func @transform_10(%arg0: i32) -> (i32, i32, i32) {
    %c0_i32 = arith.constant 0 : i32
    %c0_i32_0 = arith.constant 0 : i32
    %c0_i32_1 = arith.constant 0 : i32
    return %arg0, %c0_i32, %c0_i32_0 : i32, i32, i32
  }
  func.func @transform_11(%arg0: i32) -> (i32, i32, i32) {
    %c0_i32 = arith.constant 0 : i32
    %c0_i32_0 = arith.constant 0 : i32
    %c0_i32_1 = arith.constant 0 : i32
    return %arg0, %c0_i32, %c0_i32_0 : i32, i32, i32
  }
  func.func @transform_12(%arg0: i32) -> (i32, i32, i32) {
    %c0_i32 = arith.constant 0 : i32
    %c0_i32_0 = arith.constant 0 : i32
    %c0_i32_1 = arith.constant 0 : i32
    return %arg0, %c0_i32, %c0_i32_0 : i32, i32, i32
  }
  func.func @transform_13(%arg0: i32) -> (i32, i32, i32) {
    %c0_i32 = arith.constant 0 : i32
    %c0_i32_0 = arith.constant 0 : i32
    %c0_i32_1 = arith.constant 0 : i32
    return %arg0, %c0_i32, %c0_i32_0 : i32, i32, i32
  }
  func.func @transform_14(%arg0: i32) -> (i32, i32, i32) {
    %c0_i32 = arith.constant 0 : i32
    %c0_i32_0 = arith.constant 0 : i32
    %c0_i32_1 = arith.constant 0 : i32
    return %arg0, %c0_i32, %c0_i32_0 : i32, i32, i32
  }
  func.func @transform_15(%arg0: i32) -> (i32, i32, i32) {
    %c0_i32 = arith.constant 0 : i32
    %c0_i32_0 = arith.constant 0 : i32
    %c0_i32_1 = arith.constant 0 : i32
    return %arg0, %c0_i32, %c0_i32_0 : i32, i32, i32
  }
  func.func @transform_16(%arg0: i32) -> (i32, i32, i32) {
    %c0_i32 = arith.constant 0 : i32
    %c0_i32_0 = arith.constant 0 : i32
    %c0_i32_1 = arith.constant 0 : i32
    return %arg0, %c0_i32, %c0_i32_0 : i32, i32, i32
  }
  func.func @transform_17(%arg0: i32) -> (i32, i32, i32) {
    %c0_i32 = arith.constant 0 : i32
    %c0_i32_0 = arith.constant 0 : i32
    %c0_i32_1 = arith.constant 0 : i32
    return %arg0, %c0_i32, %c0_i32_0 : i32, i32, i32
  }
  func.func @transform_18(%arg0: i32) -> (i32, i32, i32) {
    %c0_i32 = arith.constant 0 : i32
    %c0_i32_0 = arith.constant 0 : i32
    %c0_i32_1 = arith.constant 0 : i32
    return %arg0, %c0_i32, %c0_i32_0 : i32, i32, i32
  }
  func.func @transform_19(%arg0: i32) -> (i32, i32, i32) {
    %c0_i32 = arith.constant 0 : i32
    %c0_i32_0 = arith.constant 0 : i32
    %c0_i32_1 = arith.constant 0 : i32
    return %arg0, %c0_i32, %c0_i32_0 : i32, i32, i32
  }
  func.func @transform_20(%arg0: i32) -> (i32, i32, i32) {
    %c0_i32 = arith.constant 0 : i32
    %c0_i32_0 = arith.constant 0 : i32
    %c0_i32_1 = arith.constant 0 : i32
    return %arg0, %c0_i32, %c0_i32_0 : i32, i32, i32
  }
  func.func @transform_21(%arg0: i32) -> (i32, i32, i32) {
    %c0_i32 = arith.constant 0 : i32
    %c0_i32_0 = arith.constant 0 : i32
    %c0_i32_1 = arith.constant 0 : i32
    return %arg0, %c0_i32, %c0_i32_0 : i32, i32, i32
  }
  func.func @transform_22(%arg0: i32) -> (i32, i32) {
    %c0_i32 = arith.constant 0 : i32
    %c0_i32_0 = arith.constant 0 : i32
    %c0_i32_1 = arith.constant 0 : i32
    return %c0_i32, %c0_i32_0 : i32, i32
  }
}

module attributes {stable_mosaic.version = 11 : i64} {
  func.func @_tower_kernel(%arg0: i32, %arg1: memref<24x32xf32, #tpu.memory_space<vmem>>, %arg2: memref<24x1xf32, #tpu.memory_space<vmem>>, %arg3: memref<1x24xf32, #tpu.memory_space<vmem>>, %arg4: memref<24x1xf32, #tpu.memory_space<vmem>>, %arg5: memref<1x24xf32, #tpu.memory_space<vmem>>, %arg6: memref<3x24xf32, #tpu.memory_space<vmem>>, %arg7: memref<1x32xf32, #tpu.memory_space<vmem>>, %arg8: memref<1x32xf32, #tpu.memory_space<vmem>>, %arg9: memref<32x32xf32, #tpu.memory_space<vmem>>, %arg10: memref<1x1x32xf32, #tpu.memory_space<vmem>>, %arg11: memref<1x1x32xf32, #tpu.memory_space<vmem>>, %arg12: memref<1x32x96xbf16, #tpu.memory_space<vmem>>, %arg13: memref<1x1x96xf32, #tpu.memory_space<vmem>>, %arg14: memref<1x32x32xbf16, #tpu.memory_space<vmem>>, %arg15: memref<1x1x32xf32, #tpu.memory_space<vmem>>, %arg16: memref<1x1x32xf32, #tpu.memory_space<vmem>>, %arg17: memref<1x1x32xf32, #tpu.memory_space<vmem>>, %arg18: memref<1x32x128xbf16, #tpu.memory_space<vmem>>, %arg19: memref<1x1x128xf32, #tpu.memory_space<vmem>>, %arg20: memref<1x128x32xbf16, #tpu.memory_space<vmem>>, %arg21: memref<1x1x32xf32, #tpu.memory_space<vmem>>, %arg22: memref<3x32xf32, #tpu.memory_space<vmem>>, %arg23: memref<24x32xf32, #tpu.memory_space<vmem>>) attributes {dimension_semantics = [#tpu.dimension_semantics<arbitrary>], iteration_bounds = array<i64: 2>, scalar_prefetch = 0 : i64, scratch_operands = 1 : i64, tpu.core_type = #tpu.core_type<tc>, window_params = [{pipeline_mode = #tpu.pipeline_mode<synchronous>, transform_indices = @transform_0, window_bounds = array<i64: 24, 32>}, {pipeline_mode = #tpu.pipeline_mode<synchronous>, transform_indices = @transform_1, window_bounds = array<i64: 24, 1>}, {pipeline_mode = #tpu.pipeline_mode<synchronous>, transform_indices = @transform_2, window_bounds = array<i64: 1, 24>}, {pipeline_mode = #tpu.pipeline_mode<synchronous>, transform_indices = @transform_3, window_bounds = array<i64: 24, 1>}, {pipeline_mode = #tpu.pipeline_mode<synchronous>, transform_indices = @transform_4, window_bounds = array<i64: 1, 24>}, {pipeline_mode = #tpu.pipeline_mode<synchronous>, transform_indices = @transform_5, window_bounds = array<i64: 3, 24>}, {pipeline_mode = #tpu.pipeline_mode<synchronous>, transform_indices = @transform_6, window_bounds = array<i64: 1, 32>}, {pipeline_mode = #tpu.pipeline_mode<synchronous>, transform_indices = @transform_7, window_bounds = array<i64: 1, 32>}, {pipeline_mode = #tpu.pipeline_mode<synchronous>, transform_indices = @transform_8, window_bounds = array<i64: 32, 32>}, {transform_indices = @transform_9, window_bounds = array<i64: 1, 1, 32>}, {transform_indices = @transform_10, window_bounds = array<i64: 1, 1, 32>}, {transform_indices = @transform_11, window_bounds = array<i64: 1, 32, 96>}, {transform_indices = @transform_12, window_bounds = array<i64: 1, 1, 96>}, {transform_indices = @transform_13, window_bounds = array<i64: 1, 32, 32>}, {transform_indices = @transform_14, window_bounds = array<i64: 1, 1, 32>}, {transform_indices = @transform_15, window_bounds = array<i64: 1, 1, 32>}, {transform_indices = @transform_16, window_bounds = array<i64: 1, 1, 32>}, {transform_indices = @transform_17, window_bounds = array<i64: 1, 32, 128>}, {transform_indices = @transform_18, window_bounds = array<i64: 1, 1, 128>}, {transform_indices = @transform_19, window_bounds = array<i64: 1, 128, 32>}, {transform_indices = @transform_20, window_bounds = array<i64: 1, 1, 32>}, {pipeline_mode = #tpu.pipeline_mode<synchronous>, transform_indices = @transform_21, window_bounds = array<i64: 3, 32>}]} {
    %c0_i32 = arith.constant 0 : i32
    %0 = arith.cmpi eq, %arg0, %c0_i32 : i32
    %1 = arith.extui %0 : i1 to i32
    %c0_i32_0 = arith.constant 0 : i32
    %2 = arith.cmpi ne, %1, %c0_i32_0 : i32
    scf.if %2 {
      %c0_83 = arith.constant 0 : index
      %c0_84 = arith.constant 0 : index
      %193 = vector.load %arg1[%c0_83, %c0_84] : memref<24x32xf32, #tpu.memory_space<vmem>>, vector<24x32xf32>
      %c0_85 = arith.constant 0 : index
      %c0_86 = arith.constant 0 : index
      %194 = vector.load %arg23[%c0_85, %c0_86] : memref<24x32xf32, #tpu.memory_space<vmem>>, vector<24x32xf32>
      tpu.vector_store %arg23[%c0_85, %c0_86], %193 {strides = array<i32>} : memref<24x32xf32, #tpu.memory_space<vmem>>, vector<24x32xf32>,
    } else {
    }
    %c0 = arith.constant 0 : index
    %c0_1 = arith.constant 0 : index
    %3 = vector.load %arg23[%c0, %c0_1] : memref<24x32xf32, #tpu.memory_space<vmem>>, vector<24x32xf32>
    %c0_2 = arith.constant 0 : index
    %c0_3 = arith.constant 0 : index
    %c0_4 = arith.constant 0 : index
    %4 = vector.load %arg10[%c0_2, %c0_3, %c0_4] : memref<1x1x32xf32, #tpu.memory_space<vmem>>, vector<1x1x32xf32>
    %5 = vector.shape_cast %4 : vector<1x1x32xf32> to vector<1x32xf32>
    %c0_5 = arith.constant 0 : index
    %c0_6 = arith.constant 0 : index
    %c0_7 = arith.constant 0 : index
    %6 = vector.load %arg11[%c0_5, %c0_6, %c0_7] : memref<1x1x32xf32, #tpu.memory_space<vmem>>, vector<1x1x32xf32>
    %7 = vector.shape_cast %6 : vector<1x1x32xf32> to vector<1x32xf32>
    %cst = arith.constant dense<0.000000e+00> : vector<24xf32>
    %8 = vector.multi_reduction <add>, %3, %cst [1] : vector<24x32xf32> to vector<24xf32>
    %9 = vector.shape_cast %8 : vector<24xf32> to vector<24x1xf32>
    %cst_8 = arith.constant 3.200000e+01 : f32
    %10 = vector.broadcast %cst_8 : f32 to vector<24x1xf32>
    %11 = arith.divf %9, %10 : vector<24x1xf32>
    %12 = vector.broadcast %11 : vector<24x1xf32> to vector<24x32xf32>
    %13 = arith.subf %3, %12 : vector<24x32xf32>
    %14 = arith.mulf %13, %13 : vector<24x32xf32>
    %cst_9 = arith.constant dense<0.000000e+00> : vector<24xf32>
    %15 = vector.multi_reduction <add>, %14, %cst_9 [1] : vector<24x32xf32> to vector<24xf32>
    %16 = vector.shape_cast %15 : vector<24xf32> to vector<24x1xf32>
    %cst_10 = arith.constant 3.200000e+01 : f32
    %17 = vector.broadcast %cst_10 : f32 to vector<24x1xf32>
    %18 = arith.divf %16, %17 : vector<24x1xf32>
    %19 = vector.broadcast %11 : vector<24x1xf32> to vector<24x32xf32>
    %20 = arith.subf %3, %19 : vector<24x32xf32>
    %cst_11 = arith.constant 9.99999974E-6 : f32
    %21 = vector.broadcast %cst_11 : f32 to vector<24x1xf32>
    %22 = arith.addf %18, %21 : vector<24x1xf32>
    %23 = math.rsqrt %22 : vector<24x1xf32>
    %24 = vector.broadcast %23 : vector<24x1xf32> to vector<24x32xf32>
    %25 = arith.mulf %20, %24 : vector<24x32xf32>
    %26 = vector.broadcast %5 : vector<1x32xf32> to vector<24x32xf32>
    %27 = arith.mulf %25, %26 : vector<24x32xf32>
    %28 = vector.broadcast %7 : vector<1x32xf32> to vector<24x32xf32>
    %29 = arith.addf %27, %28 : vector<24x32xf32>
    %c0_12 = arith.constant 0 : index
    %c0_13 = arith.constant 0 : index
    %30 = vector.load %arg2[%c0_12, %c0_13] : memref<24x1xf32, #tpu.memory_space<vmem>>, vector<24x1xf32>
    %c0_14 = arith.constant 0 : index
    %c0_15 = arith.constant 0 : index
    %31 = vector.load %arg3[%c0_14, %c0_15] : memref<1x24xf32, #tpu.memory_space<vmem>>, vector<1x24xf32>
    %32 = vector.broadcast %30 : vector<24x1xf32> to vector<24x24xf32>
    %33 = vector.broadcast %31 : vector<1x24xf32> to vector<24x24xf32>
    %34 = arith.cmpf oeq, %32, %33 : vector<24x24xf32>
    %c0_16 = arith.constant 0 : index
    %c0_17 = arith.constant 0 : index
    %35 = vector.load %arg5[%c0_16, %c0_17] : memref<1x24xf32, #tpu.memory_space<vmem>>, vector<1x24xf32>
    %c0_18 = arith.constant 0 : index
    %c0_19 = arith.constant 0 : index
    %36 = vector.load %arg4[%c0_18, %c0_19] : memref<24x1xf32, #tpu.memory_space<vmem>>, vector<24x1xf32>
    %37 = vector.broadcast %35 : vector<1x24xf32> to vector<24x24xf32>
    %38 = vector.broadcast %36 : vector<24x1xf32> to vector<24x24xf32>
    %39 = arith.cmpf ole, %37, %38 : vector<24x24xf32>
    %40 = arith.andi %34, %39 : vector<24x24xi1>
    %cst_20 = arith.constant 0.000000e+00 : f32
    %cst_21 = arith.constant -1.000000e+30 : f32
    %41 = vector.broadcast %cst_20 : f32 to vector<24x24xf32>
    %42 = vector.broadcast %cst_21 : f32 to vector<24x24xf32>
    %43 = arith.select %40, %41, %42 : vector<24x24xi1>, vector<24x24xf32>
    %c0_22 = arith.constant 0 : index
    %c0_23 = arith.constant 0 : index
    %c0_24 = arith.constant 0 : index
    %44 = vector.load %arg12[%c0_22, %c0_23, %c0_24] : memref<1x32x96xbf16, #tpu.memory_space<vmem>>, vector<1x32x96xbf16>
    %45 = vector.shape_cast %44 : vector<1x32x96xbf16> to vector<32x96xbf16>
    %c0_25 = arith.constant 0 : index
    %c0_26 = arith.constant 0 : index
    %c0_27 = arith.constant 0 : index
    %46 = vector.load %arg13[%c0_25, %c0_26, %c0_27] : memref<1x1x96xf32, #tpu.memory_space<vmem>>, vector<1x1x96xf32>
    %47 = vector.shape_cast %46 : vector<1x1x96xf32> to vector<1x96xf32>
    %48 = arith.truncf %29 : vector<24x32xf32> to vector<24x32xbf16>
    %cst_28 = arith.constant dense<0.000000e+00> : vector<24x96xf32>
    %49 = tpu.matmul %48, %45, %cst_28 {dimension_numbers = #tpu.dot_dimension_numbers<[1], [0], [0], [1], [0, 0, 1, 1], [], []>} : vector<24x32xbf16>, vector<32x96xbf16>, vector<24x96xf32> -> vector<24x96xf32>
    %50 = vector.broadcast %47 : vector<1x96xf32> to vector<24x96xf32>
    %51 = arith.addf %49, %50 : vector<24x96xf32>
    %52 = vector.extract_strided_slice %51 {offsets = [0, 0], sizes = [24, 32], strides = [1, 1]} : vector<24x96xf32> to vector<24x32xf32>
    %cst_29 = arith.constant 0.353553385 : f32
    %53 = vector.broadcast %cst_29 : f32 to vector<24x32xf32>
    %54 = arith.mulf %52, %53 : vector<24x32xf32>
    %55 = arith.truncf %54 : vector<24x32xf32> to vector<24x32xbf16>
    %56 = vector.extract_strided_slice %51 {offsets = [0, 32], sizes = [24, 32], strides = [1, 1]} : vector<24x96xf32> to vector<24x32xf32>
    %57 = arith.truncf %56 : vector<24x32xf32> to vector<24x32xbf16>
    %58 = vector.extract_strided_slice %51 {offsets = [0, 64], sizes = [24, 32], strides = [1, 1]} : vector<24x96xf32> to vector<24x32xf32>
    %59 = arith.truncf %58 : vector<24x32xf32> to vector<24x32xbf16>
    %60 = vector.extract_strided_slice %55 {offsets = [0, 0], sizes = [24, 8], strides = [1, 1]} : vector<24x32xbf16> to vector<24x8xbf16>
    %61 = vector.extract_strided_slice %57 {offsets = [0, 0], sizes = [24, 8], strides = [1, 1]} : vector<24x32xbf16> to vector<24x8xbf16>
    %cst_30 = arith.constant dense<0.000000e+00> : vector<24x24xf32>
    %62 = tpu.matmul %60, %61, %cst_30 {dimension_numbers = #tpu.dot_dimension_numbers<[1], [1], [0], [0], [0, 0, 1, 0], [], []>} : vector<24x8xbf16>, vector<24x8xbf16>, vector<24x24xf32> -> vector<24x24xf32>
    %63 = arith.addf %62, %43 : vector<24x24xf32>
    %cst_31 = arith.constant dense<0xFF800000> : vector<24xf32>
    %64 = vector.multi_reduction <maximumf>, %63, %cst_31 [1] : vector<24x24xf32> to vector<24xf32>
    %65 = vector.shape_cast %64 : vector<24xf32> to vector<24x1xf32>
    %66 = vector.broadcast %65 : vector<24x1xf32> to vector<24x24xf32>
    %67 = arith.subf %63, %66 : vector<24x24xf32>
    %68 = math.exp %67 : vector<24x24xf32>
    %cst_32 = arith.constant dense<0.000000e+00> : vector<24xf32>
    %69 = vector.multi_reduction <add>, %68, %cst_32 [1] : vector<24x24xf32> to vector<24xf32>
    %70 = vector.shape_cast %69 : vector<24xf32> to vector<24x1xf32>
    %71 = arith.truncf %68 : vector<24x24xf32> to vector<24x24xbf16>
    %72 = vector.extract_strided_slice %59 {offsets = [0, 0], sizes = [24, 8], strides = [1, 1]} : vector<24x32xbf16> to vector<24x8xbf16>
    %cst_33 = arith.constant dense<0.000000e+00> : vector<24x8xf32>
    %73 = tpu.matmul %71, %72, %cst_33 {dimension_numbers = #tpu.dot_dimension_numbers<[1], [0], [0], [1], [0, 0, 1, 1], [], []>} : vector<24x24xbf16>, vector<24x8xbf16>, vector<24x8xf32> -> vector<24x8xf32>
    %74 = tpu.reciprocal %70 {approx = true} : vector<24x1xf32> -> vector<24x1xf32>
    %75 = vector.broadcast %74 : vector<24x1xf32> to vector<24x8xf32>
    %76 = arith.mulf %73, %75 : vector<24x8xf32>
    %77 = vector.extract_strided_slice %55 {offsets = [0, 8], sizes = [24, 8], strides = [1, 1]} : vector<24x32xbf16> to vector<24x8xbf16>
    %78 = vector.extract_strided_slice %57 {offsets = [0, 8], sizes = [24, 8], strides = [1, 1]} : vector<24x32xbf16> to vector<24x8xbf16>
    %cst_34 = arith.constant dense<0.000000e+00> : vector<24x24xf32>
    %79 = tpu.matmul %77, %78, %cst_34 {dimension_numbers = #tpu.dot_dimension_numbers<[1], [1], [0], [0], [0, 0, 1, 0], [], []>} : vector<24x8xbf16>, vector<24x8xbf16>, vector<24x24xf32> -> vector<24x24xf32>
    %80 = arith.addf %79, %43 : vector<24x24xf32>
    %cst_35 = arith.constant dense<0xFF800000> : vector<24xf32>
    %81 = vector.multi_reduction <maximumf>, %80, %cst_35 [1] : vector<24x24xf32> to vector<24xf32>
    %82 = vector.shape_cast %81 : vector<24xf32> to vector<24x1xf32>
    %83 = vector.broadcast %82 : vector<24x1xf32> to vector<24x24xf32>
    %84 = arith.subf %80, %83 : vector<24x24xf32>
    %85 = math.exp %84 : vector<24x24xf32>
    %cst_36 = arith.constant dense<0.000000e+00> : vector<24xf32>
    %86 = vector.multi_reduction <add>, %85, %cst_36 [1] : vector<24x24xf32> to vector<24xf32>
    %87 = vector.shape_cast %86 : vector<24xf32> to vector<24x1xf32>
    %88 = arith.truncf %85 : vector<24x24xf32> to vector<24x24xbf16>
    %89 = vector.extract_strided_slice %59 {offsets = [0, 8], sizes = [24, 8], strides = [1, 1]} : vector<24x32xbf16> to vector<24x8xbf16>
    %cst_37 = arith.constant dense<0.000000e+00> : vector<24x8xf32>
    %90 = tpu.matmul %88, %89, %cst_37 {dimension_numbers = #tpu.dot_dimension_numbers<[1], [0], [0], [1], [0, 0, 1, 1], [], []>} : vector<24x24xbf16>, vector<24x8xbf16>, vector<24x8xf32> -> vector<24x8xf32>
    %91 = tpu.reciprocal %87 {approx = true} : vector<24x1xf32> -> vector<24x1xf32>
    %92 = vector.broadcast %91 : vector<24x1xf32> to vector<24x8xf32>
    %93 = arith.mulf %90, %92 : vector<24x8xf32>
    %94 = vector.extract_strided_slice %55 {offsets = [0, 16], sizes = [24, 8], strides = [1, 1]} : vector<24x32xbf16> to vector<24x8xbf16>
    %95 = vector.extract_strided_slice %57 {offsets = [0, 16], sizes = [24, 8], strides = [1, 1]} : vector<24x32xbf16> to vector<24x8xbf16>
    %cst_38 = arith.constant dense<0.000000e+00> : vector<24x24xf32>
    %96 = tpu.matmul %94, %95, %cst_38 {dimension_numbers = #tpu.dot_dimension_numbers<[1], [1], [0], [0], [0, 0, 1, 0], [], []>} : vector<24x8xbf16>, vector<24x8xbf16>, vector<24x24xf32> -> vector<24x24xf32>
    %97 = arith.addf %96, %43 : vector<24x24xf32>
    %cst_39 = arith.constant dense<0xFF800000> : vector<24xf32>
    %98 = vector.multi_reduction <maximumf>, %97, %cst_39 [1] : vector<24x24xf32> to vector<24xf32>
    %99 = vector.shape_cast %98 : vector<24xf32> to vector<24x1xf32>
    %100 = vector.broadcast %99 : vector<24x1xf32> to vector<24x24xf32>
    %101 = arith.subf %97, %100 : vector<24x24xf32>
    %102 = math.exp %101 : vector<24x24xf32>
    %cst_40 = arith.constant dense<0.000000e+00> : vector<24xf32>
    %103 = vector.multi_reduction <add>, %102, %cst_40 [1] : vector<24x24xf32> to vector<24xf32>
    %104 = vector.shape_cast %103 : vector<24xf32> to vector<24x1xf32>
    %105 = arith.truncf %102 : vector<24x24xf32> to vector<24x24xbf16>
    %106 = vector.extract_strided_slice %59 {offsets = [0, 16], sizes = [24, 8], strides = [1, 1]} : vector<24x32xbf16> to vector<24x8xbf16>
    %cst_41 = arith.constant dense<0.000000e+00> : vector<24x8xf32>
    %107 = tpu.matmul %105, %106, %cst_41 {dimension_numbers = #tpu.dot_dimension_numbers<[1], [0], [0], [1], [0, 0, 1, 1], [], []>} : vector<24x24xbf16>, vector<24x8xbf16>, vector<24x8xf32> -> vector<24x8xf32>
    %108 = tpu.reciprocal %104 {approx = true} : vector<24x1xf32> -> vector<24x1xf32>
    %109 = vector.broadcast %108 : vector<24x1xf32> to vector<24x8xf32>
    %110 = arith.mulf %107, %109 : vector<24x8xf32>
    %111 = vector.extract_strided_slice %55 {offsets = [0, 24], sizes = [24, 8], strides = [1, 1]} : vector<24x32xbf16> to vector<24x8xbf16>
    %112 = vector.extract_strided_slice %57 {offsets = [0, 24], sizes = [24, 8], strides = [1, 1]} : vector<24x32xbf16> to vector<24x8xbf16>
    %cst_42 = arith.constant dense<0.000000e+00> : vector<24x24xf32>
    %113 = tpu.matmul %111, %112, %cst_42 {dimension_numbers = #tpu.dot_dimension_numbers<[1], [1], [0], [0], [0, 0, 1, 0], [], []>} : vector<24x8xbf16>, vector<24x8xbf16>, vector<24x24xf32> -> vector<24x24xf32>
    %114 = arith.addf %113, %43 : vector<24x24xf32>
    %cst_43 = arith.constant dense<0xFF800000> : vector<24xf32>
    %115 = vector.multi_reduction <maximumf>, %114, %cst_43 [1] : vector<24x24xf32> to vector<24xf32>
    %116 = vector.shape_cast %115 : vector<24xf32> to vector<24x1xf32>
    %117 = vector.broadcast %116 : vector<24x1xf32> to vector<24x24xf32>
    %118 = arith.subf %114, %117 : vector<24x24xf32>
    %119 = math.exp %118 : vector<24x24xf32>
    %cst_44 = arith.constant dense<0.000000e+00> : vector<24xf32>
    %120 = vector.multi_reduction <add>, %119, %cst_44 [1] : vector<24x24xf32> to vector<24xf32>
    %121 = vector.shape_cast %120 : vector<24xf32> to vector<24x1xf32>
    %122 = arith.truncf %119 : vector<24x24xf32> to vector<24x24xbf16>
    %123 = vector.extract_strided_slice %59 {offsets = [0, 24], sizes = [24, 8], strides = [1, 1]} : vector<24x32xbf16> to vector<24x8xbf16>
    %cst_45 = arith.constant dense<0.000000e+00> : vector<24x8xf32>
    %124 = tpu.matmul %122, %123, %cst_45 {dimension_numbers = #tpu.dot_dimension_numbers<[1], [0], [0], [1], [0, 0, 1, 1], [], []>} : vector<24x24xbf16>, vector<24x8xbf16>, vector<24x8xf32> -> vector<24x8xf32>
    %125 = tpu.reciprocal %121 {approx = true} : vector<24x1xf32> -> vector<24x1xf32>
    %126 = vector.broadcast %125 : vector<24x1xf32> to vector<24x8xf32>
    %127 = arith.mulf %124, %126 : vector<24x8xf32>
    %128 = tpu.concatenate %76, %93, %110, %127 in 1 : vector<24x8xf32>, vector<24x8xf32>, vector<24x8xf32>, vector<24x8xf32> -> vector<24x32xf32>
    %129 = arith.truncf %128 : vector<24x32xf32> to vector<24x32xbf16>
    %c0_46 = arith.constant 0 : index
    %c0_47 = arith.constant 0 : index
    %c0_48 = arith.constant 0 : index
    %130 = vector.load %arg14[%c0_46, %c0_47, %c0_48] : memref<1x32x32xbf16, #tpu.memory_space<vmem>>, vector<1x32x32xbf16>
    %131 = vector.shape_cast %130 : vector<1x32x32xbf16> to vector<32x32xbf16>
    %cst_49 = arith.constant dense<0.000000e+00> : vector<24x32xf32>
    %132 = tpu.matmul %129, %131, %cst_49 {dimension_numbers = #tpu.dot_dimension_numbers<[1], [0], [0], [1], [0, 0, 1, 1], [], []>} : vector<24x32xbf16>, vector<32x32xbf16>, vector<24x32xf32> -> vector<24x32xf32>
    %c0_50 = arith.constant 0 : index
    %c0_51 = arith.constant 0 : index
    %c0_52 = arith.constant 0 : index
    %133 = vector.load %arg15[%c0_50, %c0_51, %c0_52] : memref<1x1x32xf32, #tpu.memory_space<vmem>>, vector<1x1x32xf32>
    %134 = vector.shape_cast %133 : vector<1x1x32xf32> to vector<1x32xf32>
    %135 = vector.broadcast %134 : vector<1x32xf32> to vector<24x32xf32>
    %136 = arith.addf %132, %135 : vector<24x32xf32>
    %137 = arith.addf %3, %136 : vector<24x32xf32>
    %c0_53 = arith.constant 0 : index
    %c0_54 = arith.constant 0 : index
    %c0_55 = arith.constant 0 : index
    %138 = vector.load %arg16[%c0_53, %c0_54, %c0_55] : memref<1x1x32xf32, #tpu.memory_space<vmem>>, vector<1x1x32xf32>
    %139 = vector.shape_cast %138 : vector<1x1x32xf32> to vector<1x32xf32>
    %c0_56 = arith.constant 0 : index
    %c0_57 = arith.constant 0 : index
    %c0_58 = arith.constant 0 : index
    %140 = vector.load %arg17[%c0_56, %c0_57, %c0_58] : memref<1x1x32xf32, #tpu.memory_space<vmem>>, vector<1x1x32xf32>
    %141 = vector.shape_cast %140 : vector<1x1x32xf32> to vector<1x32xf32>
    %cst_59 = arith.constant dense<0.000000e+00> : vector<24xf32>
    %142 = vector.multi_reduction <add>, %137, %cst_59 [1] : vector<24x32xf32> to vector<24xf32>
    %143 = vector.shape_cast %142 : vector<24xf32> to vector<24x1xf32>
    %cst_60 = arith.constant 3.200000e+01 : f32
    %144 = vector.broadcast %cst_60 : f32 to vector<24x1xf32>
    %145 = arith.divf %143, %144 : vector<24x1xf32>
    %146 = vector.broadcast %145 : vector<24x1xf32> to vector<24x32xf32>
    %147 = arith.subf %137, %146 : vector<24x32xf32>
    %148 = arith.mulf %147, %147 : vector<24x32xf32>
    %cst_61 = arith.constant dense<0.000000e+00> : vector<24xf32>
    %149 = vector.multi_reduction <add>, %148, %cst_61 [1] : vector<24x32xf32> to vector<24xf32>
    %150 = vector.shape_cast %149 : vector<24xf32> to vector<24x1xf32>
    %cst_62 = arith.constant 3.200000e+01 : f32
    %151 = vector.broadcast %cst_62 : f32 to vector<24x1xf32>
    %152 = arith.divf %150, %151 : vector<24x1xf32>
    %153 = vector.broadcast %145 : vector<24x1xf32> to vector<24x32xf32>
    %154 = arith.subf %137, %153 : vector<24x32xf32>
    %cst_63 = arith.constant 9.99999974E-6 : f32
    %155 = vector.broadcast %cst_63 : f32 to vector<24x1xf32>
    %156 = arith.addf %152, %155 : vector<24x1xf32>
    %157 = math.rsqrt %156 : vector<24x1xf32>
    %158 = vector.broadcast %157 : vector<24x1xf32> to vector<24x32xf32>
    %159 = arith.mulf %154, %158 : vector<24x32xf32>
    %160 = vector.broadcast %139 : vector<1x32xf32> to vector<24x32xf32>
    %161 = arith.mulf %159, %160 : vector<24x32xf32>
    %162 = vector.broadcast %141 : vector<1x32xf32> to vector<24x32xf32>
    %163 = arith.addf %161, %162 : vector<24x32xf32>
    %164 = arith.truncf %163 : vector<24x32xf32> to vector<24x32xbf16>
    %c0_64 = arith.constant 0 : index
    %c0_65 = arith.constant 0 : index
    %c0_66 = arith.constant 0 : index
    %165 = vector.load %arg18[%c0_64, %c0_65, %c0_66] : memref<1x32x128xbf16, #tpu.memory_space<vmem>>, vector<1x32x128xbf16>
    %166 = vector.shape_cast %165 : vector<1x32x128xbf16> to vector<32x128xbf16>
    %cst_67 = arith.constant dense<0.000000e+00> : vector<24x128xf32>
    %167 = tpu.matmul %164, %166, %cst_67 {dimension_numbers = #tpu.dot_dimension_numbers<[1], [0], [0], [1], [0, 0, 1, 1], [], []>} : vector<24x32xbf16>, vector<32x128xbf16>, vector<24x128xf32> -> vector<24x128xf32>
    %c0_68 = arith.constant 0 : index
    %c0_69 = arith.constant 0 : index
    %c0_70 = arith.constant 0 : index
    %168 = vector.load %arg19[%c0_68, %c0_69, %c0_70] : memref<1x1x128xf32, #tpu.memory_space<vmem>>, vector<1x1x128xf32>
    %169 = vector.shape_cast %168 : vector<1x1x128xf32> to vector<1x128xf32>
    %170 = vector.broadcast %169 : vector<1x128xf32> to vector<24x128xf32>
    %171 = arith.addf %167, %170 : vector<24x128xf32>
    %cst_71 = arith.constant 1.702000e+00 : f32
    %172 = vector.broadcast %cst_71 : f32 to vector<24x128xf32>
    %173 = arith.mulf %172, %171 : vector<24x128xf32>
    %174 = arith.negf %173 : vector<24x128xf32>
    %175 = math.exp %174 : vector<24x128xf32>
    %cst_72 = arith.constant 1.000000e+00 : f32
    %176 = vector.broadcast %cst_72 : f32 to vector<24x128xf32>
    %177 = arith.addf %176, %175 : vector<24x128xf32>
    %178 = arith.divf %176, %177 : vector<24x128xf32>
    %179 = arith.mulf %171, %178 : vector<24x128xf32>
    %180 = arith.truncf %179 : vector<24x128xf32> to vector<24x128xbf16>
    %c0_73 = arith.constant 0 : index
    %c0_74 = arith.constant 0 : index
    %c0_75 = arith.constant 0 : index
    %181 = vector.load %arg20[%c0_73, %c0_74, %c0_75] : memref<1x128x32xbf16, #tpu.memory_space<vmem>>, vector<1x128x32xbf16>
    %182 = vector.shape_cast %181 : vector<1x128x32xbf16> to vector<128x32xbf16>
    %cst_76 = arith.constant dense<0.000000e+00> : vector<24x32xf32>
    %183 = tpu.matmul %180, %182, %cst_76 {dimension_numbers = #tpu.dot_dimension_numbers<[1], [0], [0], [1], [0, 0, 1, 1], [], []>} : vector<24x128xbf16>, vector<128x32xbf16>, vector<24x32xf32> -> vector<24x32xf32>
    %184 = arith.addf %137, %183 : vector<24x32xf32>
    %c0_77 = arith.constant 0 : index
    %c0_78 = arith.constant 0 : index
    %c0_79 = arith.constant 0 : index
    %185 = vector.load %arg21[%c0_77, %c0_78, %c0_79] : memref<1x1x32xf32, #tpu.memory_space<vmem>>, vector<1x1x32xf32>
    %186 = vector.shape_cast %185 : vector<1x1x32xf32> to vector<1x32xf32>
    %187 = vector.broadcast %186 : vector<1x32xf32> to vector<24x32xf32>
    %188 = arith.addf %184, %187 : vector<24x32xf32>
    %c0_80 = arith.constant 0 : index
    %c0_81 = arith.constant 0 : index
    %189 = vector.load %arg23[%c0_80, %c0_81] : memref<24x32xf32, #tpu.memory_space<vmem>>, vector<24x32xf32>
    tpu.vector_store %arg23[%c0_80, %c0_81], %188 {strides = array<i32>} : memref<24x32xf32, #tpu.memory_space<vmem>>, vector<24x32xf32>,
    %c1_i32 = arith.constant 1 : i32
    %190 = arith.cmpi eq, %arg0, %c1_i32 : i32
    %191 = arith.extui %190 : i1 to i32
    %c0_i32_82 = arith.constant 0 : i32
    %192 = arith.cmpi ne, %191, %c0_i32_82 : i32
    scf.if %192 {
      %c0_83 = arith.constant 0 : index
      %c0_84 = arith.constant 0 : index
      %193 = vector.load %arg6[%c0_83, %c0_84] : memref<3x24xf32, #tpu.memory_space<vmem>>, vector<3x24xf32>
      %cst_85 = arith.constant dense<0.000000e+00> : vector<3x32xf32>
      %194 = tpu.matmul %193, %188, %cst_85 {dimension_numbers = #tpu.dot_dimension_numbers<[1], [0], [0], [1], [0, 0, 1, 1], [], []>} : vector<3x24xf32>, vector<24x32xf32>, vector<3x32xf32> -> vector<3x32xf32>
      %c0_86 = arith.constant 0 : index
      %c0_87 = arith.constant 0 : index
      %195 = vector.load %arg7[%c0_86, %c0_87] : memref<1x32xf32, #tpu.memory_space<vmem>>, vector<1x32xf32>
      %c0_88 = arith.constant 0 : index
      %c0_89 = arith.constant 0 : index
      %196 = vector.load %arg8[%c0_88, %c0_89] : memref<1x32xf32, #tpu.memory_space<vmem>>, vector<1x32xf32>
      %cst_90 = arith.constant dense<0.000000e+00> : vector<3xf32>
      %197 = vector.multi_reduction <add>, %194, %cst_90 [1] : vector<3x32xf32> to vector<3xf32>
      %198 = vector.shape_cast %197 : vector<3xf32> to vector<3x1xf32>
      %cst_91 = arith.constant 3.200000e+01 : f32
      %199 = vector.broadcast %cst_91 : f32 to vector<3x1xf32>
      %200 = arith.divf %198, %199 : vector<3x1xf32>
      %201 = vector.broadcast %200 : vector<3x1xf32> to vector<3x32xf32>
      %202 = arith.subf %194, %201 : vector<3x32xf32>
      %203 = arith.mulf %202, %202 : vector<3x32xf32>
      %cst_92 = arith.constant dense<0.000000e+00> : vector<3xf32>
      %204 = vector.multi_reduction <add>, %203, %cst_92 [1] : vector<3x32xf32> to vector<3xf32>
      %205 = vector.shape_cast %204 : vector<3xf32> to vector<3x1xf32>
      %cst_93 = arith.constant 3.200000e+01 : f32
      %206 = vector.broadcast %cst_93 : f32 to vector<3x1xf32>
      %207 = arith.divf %205, %206 : vector<3x1xf32>
      %208 = vector.broadcast %200 : vector<3x1xf32> to vector<3x32xf32>
      %209 = arith.subf %194, %208 : vector<3x32xf32>
      %cst_94 = arith.constant 9.99999974E-6 : f32
      %210 = vector.broadcast %cst_94 : f32 to vector<3x1xf32>
      %211 = arith.addf %207, %210 : vector<3x1xf32>
      %212 = math.rsqrt %211 : vector<3x1xf32>
      %213 = vector.broadcast %212 : vector<3x1xf32> to vector<3x32xf32>
      %214 = arith.mulf %209, %213 : vector<3x32xf32>
      %215 = vector.broadcast %195 : vector<1x32xf32> to vector<3x32xf32>
      %216 = arith.mulf %214, %215 : vector<3x32xf32>
      %217 = vector.broadcast %196 : vector<1x32xf32> to vector<3x32xf32>
      %218 = arith.addf %216, %217 : vector<3x32xf32>
      %c0_95 = arith.constant 0 : index
      %c0_96 = arith.constant 0 : index
      %219 = vector.load %arg9[%c0_95, %c0_96] : memref<32x32xf32, #tpu.memory_space<vmem>>, vector<32x32xf32>
      %cst_97 = arith.constant dense<0.000000e+00> : vector<3x32xf32>
      %220 = tpu.matmul %218, %219, %cst_97 {dimension_numbers = #tpu.dot_dimension_numbers<[1], [0], [0], [1], [0, 0, 1, 1], [], []>} : vector<3x32xf32>, vector<32x32xf32>, vector<3x32xf32> -> vector<3x32xf32>
      %c0_98 = arith.constant 0 : index
      %c0_99 = arith.constant 0 : index
      %221 = vector.load %arg22[%c0_98, %c0_99] : memref<3x32xf32, #tpu.memory_space<vmem>>, vector<3x32xf32>
      tpu.vector_store %arg22[%c0_98, %c0_99], %220 {strides = array<i32>} : memref<3x32xf32, #tpu.memory_space<vmem>>, vector<3x32xf32>,
    } else {
    }
    return
  }
  func.func @transform_0(%arg0: i32) -> (i32, i32) {
    %c0_i32 = arith.constant 0 : i32
    %c0_i32_0 = arith.constant 0 : i32
    %c0_i32_1 = arith.constant 0 : i32
    return %c0_i32, %c0_i32_0 : i32, i32
  }
  func.func @transform_1(%arg0: i32) -> (i32, i32) {
    %c0_i32 = arith.constant 0 : i32
    %c0_i32_0 = arith.constant 0 : i32
    %c0_i32_1 = arith.constant 0 : i32
    return %c0_i32, %c0_i32_0 : i32, i32
  }
  func.func @transform_2(%arg0: i32) -> (i32, i32) {
    %c0_i32 = arith.constant 0 : i32
    %c0_i32_0 = arith.constant 0 : i32
    %c0_i32_1 = arith.constant 0 : i32
    return %c0_i32, %c0_i32_0 : i32, i32
  }
  func.func @transform_3(%arg0: i32) -> (i32, i32) {
    %c0_i32 = arith.constant 0 : i32
    %c0_i32_0 = arith.constant 0 : i32
    %c0_i32_1 = arith.constant 0 : i32
    return %c0_i32, %c0_i32_0 : i32, i32
  }
  func.func @transform_4(%arg0: i32) -> (i32, i32) {
    %c0_i32 = arith.constant 0 : i32
    %c0_i32_0 = arith.constant 0 : i32
    %c0_i32_1 = arith.constant 0 : i32
    return %c0_i32, %c0_i32_0 : i32, i32
  }
  func.func @transform_5(%arg0: i32) -> (i32, i32) {
    %c0_i32 = arith.constant 0 : i32
    %c0_i32_0 = arith.constant 0 : i32
    %c0_i32_1 = arith.constant 0 : i32
    return %c0_i32, %c0_i32_0 : i32, i32
  }
  func.func @transform_6(%arg0: i32) -> (i32, i32) {
    %c0_i32 = arith.constant 0 : i32
    %c0_i32_0 = arith.constant 0 : i32
    %c0_i32_1 = arith.constant 0 : i32
    return %c0_i32, %c0_i32_0 : i32, i32
  }
  func.func @transform_7(%arg0: i32) -> (i32, i32) {
    %c0_i32 = arith.constant 0 : i32
    %c0_i32_0 = arith.constant 0 : i32
    %c0_i32_1 = arith.constant 0 : i32
    return %c0_i32, %c0_i32_0 : i32, i32
  }
  func.func @transform_8(%arg0: i32) -> (i32, i32) {
    %c0_i32 = arith.constant 0 : i32
    %c0_i32_0 = arith.constant 0 : i32
    %c0_i32_1 = arith.constant 0 : i32
    return %c0_i32, %c0_i32_0 : i32, i32
  }
  func.func @transform_9(%arg0: i32) -> (i32, i32, i32) {
    %c0_i32 = arith.constant 0 : i32
    %c0_i32_0 = arith.constant 0 : i32
    %c0_i32_1 = arith.constant 0 : i32
    return %arg0, %c0_i32, %c0_i32_0 : i32, i32, i32
  }
  func.func @transform_10(%arg0: i32) -> (i32, i32, i32) {
    %c0_i32 = arith.constant 0 : i32
    %c0_i32_0 = arith.constant 0 : i32
    %c0_i32_1 = arith.constant 0 : i32
    return %arg0, %c0_i32, %c0_i32_0 : i32, i32, i32
  }
  func.func @transform_11(%arg0: i32) -> (i32, i32, i32) {
    %c0_i32 = arith.constant 0 : i32
    %c0_i32_0 = arith.constant 0 : i32
    %c0_i32_1 = arith.constant 0 : i32
    return %arg0, %c0_i32, %c0_i32_0 : i32, i32, i32
  }
  func.func @transform_12(%arg0: i32) -> (i32, i32, i32) {
    %c0_i32 = arith.constant 0 : i32
    %c0_i32_0 = arith.constant 0 : i32
    %c0_i32_1 = arith.constant 0 : i32
    return %arg0, %c0_i32, %c0_i32_0 : i32, i32, i32
  }
  func.func @transform_13(%arg0: i32) -> (i32, i32, i32) {
    %c0_i32 = arith.constant 0 : i32
    %c0_i32_0 = arith.constant 0 : i32
    %c0_i32_1 = arith.constant 0 : i32
    return %arg0, %c0_i32, %c0_i32_0 : i32, i32, i32
  }
  func.func @transform_14(%arg0: i32) -> (i32, i32, i32) {
    %c0_i32 = arith.constant 0 : i32
    %c0_i32_0 = arith.constant 0 : i32
    %c0_i32_1 = arith.constant 0 : i32
    return %arg0, %c0_i32, %c0_i32_0 : i32, i32, i32
  }
  func.func @transform_15(%arg0: i32) -> (i32, i32, i32) {
    %c0_i32 = arith.constant 0 : i32
    %c0_i32_0 = arith.constant 0 : i32
    %c0_i32_1 = arith.constant 0 : i32
    return %arg0, %c0_i32, %c0_i32_0 : i32, i32, i32
  }
  func.func @transform_16(%arg0: i32) -> (i32, i32, i32) {
    %c0_i32 = arith.constant 0 : i32
    %c0_i32_0 = arith.constant 0 : i32
    %c0_i32_1 = arith.constant 0 : i32
    return %arg0, %c0_i32, %c0_i32_0 : i32, i32, i32
  }
  func.func @transform_17(%arg0: i32) -> (i32, i32, i32) {
    %c0_i32 = arith.constant 0 : i32
    %c0_i32_0 = arith.constant 0 : i32
    %c0_i32_1 = arith.constant 0 : i32
    return %arg0, %c0_i32, %c0_i32_0 : i32, i32, i32
  }
  func.func @transform_18(%arg0: i32) -> (i32, i32, i32) {
    %c0_i32 = arith.constant 0 : i32
    %c0_i32_0 = arith.constant 0 : i32
    %c0_i32_1 = arith.constant 0 : i32
    return %arg0, %c0_i32, %c0_i32_0 : i32, i32, i32
  }
  func.func @transform_19(%arg0: i32) -> (i32, i32, i32) {
    %c0_i32 = arith.constant 0 : i32
    %c0_i32_0 = arith.constant 0 : i32
    %c0_i32_1 = arith.constant 0 : i32
    return %arg0, %c0_i32, %c0_i32_0 : i32, i32, i32
  }
  func.func @transform_20(%arg0: i32) -> (i32, i32, i32) {
    %c0_i32 = arith.constant 0 : i32
    %c0_i32_0 = arith.constant 0 : i32
    %c0_i32_1 = arith.constant 0 : i32
    return %arg0, %c0_i32, %c0_i32_0 : i32, i32, i32
  }
  func.func @transform_21(%arg0: i32) -> (i32, i32) {
    %c0_i32 = arith.constant 0 : i32
    %c0_i32_0 = arith.constant 0 : i32
    %c0_i32_1 = arith.constant 0 : i32
    return %c0_i32, %c0_i32_0 : i32, i32
  }
}

</mosaic_0001>

<bundles_post_ra>
// kernel: mint_forward.3
= control target key start
LH: loop header
LB: loop body
LE: loop exit
PB: predicated region body
PF: predicated region fallthrough
CT: control target
= control target key end

     0   :  { %s2351_s21 = smov 0   ;;  %s2628_s0 = inlined_call_operand.vmem [shape: f32[10,32], index: 0, kind: input, shape index: {}]   ;;  %s2629_s1 = inlined_call_operand.vmem [shape: f32[10,1], index: 1, kind: input, shape index: {}]   ;;  %s2630_s2 = inlined_call_operand.vmem [shape: f32[1,10], index: 2, kind: input, shape index: {}]   ;;  %s2631_s3 = inlined_call_operand.vmem [shape: f32[2,10], index: 3, kind: input, shape index: {}]   ;;  %s2632_s4 = inlined_call_operand.vmem [shape: f32[12,1,32], index: 4, kind: input, shape index: {}]   ;;  %s2633_s5 = inlined_call_operand.vmem [shape: f32[12,1,32], index: 5, kind: input, shape index: {}]   ;;  %s2634_s6 = inlined_call_operand.vmem [shape: bf16[12,32,96], index: 6, kind: input, shape index: {}]   ;;  %s2635_s7 = inlined_call_operand.vmem [shape: f32[12,1,96], index: 7, kind: input, shape index: {}]   ;;  %s2636_s8 = inlined_call_operand.vmem [shape: bf16[12,32,32], index: 8, kind: input, shape index: {}]   ;;  %s2637_s9 = inlined_call_operand.vmem [shape: f32[12,1,32], index: 9, kind: input, shape index: {}]   ;;  %s2638_s10 = inlined_call_operand.vmem [shape: f32[12,1,32], index: 10, kind: input, shape index: {}]   ;;  %s2639_s11 = inlined_call_operand.vmem [shape: f32[12,1,32], index: 11, kind: input, shape index: {}]   ;;  %s2640_s12 = inlined_call_operand.vmem [shape: bf16[12,32,128], index: 12, kind: input, shape index: {}]   ;;  %s2641_s13 = inlined_call_operand.vmem [shape: f32[12,1,128], index: 13, kind: input, shape index: {}]   ;;  %s2642_s14 = inlined_call_operand.vmem [shape: bf16[12,128,32], index: 14, kind: input, shape index: {}]   ;;  %s2643_s15 = inlined_call_operand.vmem [shape: f32[12,1,32], index: 15, kind: input, shape index: {}]   ;;  %s2644_s16 = inlined_call_operand.vmem [shape: f32[12,2,32], index: 16, kind: output, shape index: {}]  }
   0x1   :  { %2649 = sst [smem:[#allocation5_spill]] %s2628_s0 }
   0x2   :  { %2650 = sst [smem:[#allocation6_spill]] %s2629_s1 }
   0x3   :  { %2651 = sst [smem:[#allocation7_spill]] %s2630_s2 }
   0x4   :  { %2652 = sst [smem:[#allocation8_spill]] %s2631_s3 }
   0x5   :  { %2653 = sst [smem:[#allocation9_spill]] %s2634_s6 }
   0x6   :  { %2654 = sst [smem:[#allocation10_spill]] %s2636_s8 }
   0x7 LB: > { %2655 = sst [smem:[#allocation3_spill]] %s2244_s21  ;;  %s1932_s22 = sadd.s32 4294967295, %s2244_s21   ;;  %s2244_s21 = sphi %s2351_s21, %s26_s21  }
   0x8   : > { %p1936_p0 = scmp.ge.s32.totalorder %s2244_s21, 1  ;;  %p556_p1 = scmp.lt.s32.totalorder %s2244_s21, 13 }
   0xa   : > { %p557_p2 = pnand %p1936_p0, %p556_p1 }
   0xc   : > { %560 = sbr.rel (%p557_p2) target bundleno = 2698 (0xa8a), region = 84 }
  0x13   : > { %p644_p3 = scmp.lt.s32.totalorder %s1932_s22, 11  ;;  %s2656_s6 = sld [smem:[#allocation9_spill]] }
  0x14   : > { %s2657_s8 = sld [smem:[#allocation10_spill]]  ;;  %p1946_p4 = scmp.ne.s32.totalorder %s1932_s22, 0 }
  0x15   : > { %s2359_s23 = scalar_select %p644_p3, %s1932_s22, 11 }
  0x16   : > { %696 = sbr.rel (%p1946_p4) target bundleno = 32 (0x20), region = 88  ;;  %s2659_s21 = sld [smem:[#allocation5_spill]] (!%p1946_p4)  ;;  %vm699_vm0 = vcmask (!%p1946_p4), 261120   ;;  %vm701_vm1 = vcmask (!%p1946_p4), 254976  }
  0x17   : > { %s1987_s30 = sshll.u32 %s2359_s23, 4  ;;  %s687_s0 = scalar_lea.vmem %s2643_s15, %s2359_s23 }
  0x18   : > { %s1945_s17 = sshll.u32 %s2359_s23, 1 }
  0x19   : > { %s2377_s24 = scalar_lea.vmem %s2656_s6, %s1987_s30  ;;  %s2399_s6 = scalar_lea.vmem %s2640_s12, %s1987_s30 }
  0x1a   : > { %s2382_s3 = scalar_lea.vmem %s2657_s8, %s1987_s30  ;;  %s679_s8 = scalar_lea.vmem %s2641_s13, %s2359_s23 }
  0x1b   : > { %2658 = sst [smem:[#allocation4_spill]] %s2382_s3  ;;  %s1990_s3 = sshll.u32 %s2359_s23, 6 }
  0x1c   : > { %s2409_s27 = scalar_lea.vmem %s2642_s14, %s1990_s3  ;;  %s2419_s30 = scalar_lea.vmem %s2644_s16, %s1945_s17  ;;  %v697_v0 = vld [vmem:[%s2659_s21] sm:$0xff] (!%p1946_p4) }
  0x1d   : > { %s2660_s25 = smov %s2659_s21  ;;  %700 = vst.msk [vmem:[#allocation2] sm:$0xff] %vm699_vm0, %v697_v0 }
  0x1e   : > { %v698_v1 = vld [vmem:[%s2660_s25 + $0x8] sm:$0x3] }
  0x1f   : > { %702 = vst.msk [vmem:[#allocation2 + $0x8] sm:$0x3] %vm701_vm1, %v698_v1 }
  0x20 PF: > { %vm707_vm2 = vcmask 261120   ;;  %vm711_vm3 = vcmask 254976   ;;  %v2176_v16 = vld [vmem:[%s2377_s24] sm:$0xff]   ;;  %v2246_v17 = vmov 0.0   ;;  %v2177_v18 = vld [vmem:[%s2377_s24 + $0x8] sm:$0xff]   ;;  %vm2247_vm4 = vmmov 0   ;;  %s2661_s18 = scalar_lea.vmem %s2632_s4, %s2359_s23  ;;  %s2662_s29 = scalar_lea.vmem %s2633_s5, %s2359_s23 }
  0x21   : > { %2028 = vmatprep.subr.bf16.mxu0 %v2246_v17  ;;  %2048 = vmatprep.subr.bf16.mxu1 %v2246_v17  ;;  %v1947_v27 = vld [vmem:[%s2661_s18] ss:$0 sm:$0xff]  ;;  %s2663_s19 = scalar_lea.vmem %s2635_s7, %s2359_s23  ;;  %s2248_s20 = smov 88   ;;  %v2255_v48 = vmov 0   ;;  %vm850_vm5 = vcmask 64512   ;;  %vm898_vm8 = vcmask 80896  }
  0x22   : > { %2029 = vmatpush3.bf16.msra.mxu0 %v2176_v16  ;;  %2032 = vmatprep.mubr.msk.bf16.mxu0 %vm2247_vm4, %v2246_v17  ;;  %v1948_v31 = vld [vmem:[%s2662_s29] ss:$0 sm:$0xff]  ;;  %s2249_s21 = smov 96   ;;  %s2250_s2 = smov 112   ;;  %v2256_v0 = vmov -1e+30  }
  0x23   : > { %2030 = vmatprep.subr.bf16.mxu0 %v2246_v17  ;;  %2050 = vmatprep.mubr.msk.bf16.mxu1 %vm2247_vm4, %v2246_v17  ;;  %v1950_v36 = vld [vmem:[%s2663_s19] ss:$0 sm:$0xff]  ;;  %s2251_s3 = smov 120   ;;  %s2252_s1 = smov 104   ;;  %vm902_vm9 = vcmask 74752   ;;  %vm924_vm10 = vcmask 1044480  }
  0x24   : > { %s2253_s22 = smov 80   ;;  %s2664_s26 = sld [smem:[#allocation6_spill]]  ;;  %2160 = vset.pattern.permute.xlu0 %v2255_v48  ;;  %2159 = vset.pattern.permute.xlu1 %v2255_v48  ;;  %vm1369_vm11 = vcmask 130048   ;;  %vm1372_vm12 = vcmask 195584   ;;  %vm1696_vm13 = vcmask 1041408   ;;  %vm2265_vm14 = vmmov 1  }
  0x25   : > { %s2254_s29 = smov 72   ;;  %s2666_s18 = sld [smem:[#allocation4_spill]]  ;;  %vm2129_vm15 = vmpackc.low %vm1696_vm13, %vm2265_vm14 }
  0x26   : > { %v2429_v3 = vld [vmem:[#allocation2 + $0x8] sm:$0x3]  ;;  %2031 = vmatpush3.bf16.msra.mxu0 %v2177_v18  ;;  %s2261_s24 = smov 8   ;;  %s2263_s28 = smov 24  }
  0x27   : > { %v2427_v2 = vld [vmem:[#allocation2] sm:$0xff]  ;;  %v712_v5 = vsel %vm711_vm3, %v2429_v3, 0.0  ;;  %2036 = vmatprep.subr.bf16.mxu0 %v2246_v17 }
  0x28   : > { %v708_v4 = vsel %vm707_vm2, %v2427_v2, 0.0 }
  0x29   : > { %709 = vadd.xlane.f32.xlu0 %v708_v4 }
  0x2a   : > { %v753_v47 = vld [vmem:[%s2664_s26 + $0x8] sm:$0x3]  ;;  %v752_v49 = vld [vmem:[%s2664_s26] sm:$0xff] }
  0x2d   : > { %713 = vadd.xlane.f32.xlu0 %v712_v5 }
  0xb6   : > { %v710_v6 = vpop.xlane.xlu0 %709 }
  0xb7   : > { %v716_v7 = vmul.f32 0.03125, %v710_v6 }
  0xb9   : > { %v718_v8 = vsub.f32 %v2427_v2, %v716_v7 }
  0xba   : > { %v714_v9 = vpop.xlane.xlu0 %713 }
  0xbb   : > { %v717_v10 = vmul.f32 0.03125, %v714_v9  ;;  %v720_v11 = vmul.f32 %v718_v8, %v718_v8 }
  0xbd   : > { %v719_v12 = vsub.f32 %v2429_v3, %v717_v10  ;;  %v722_v13 = vsel %vm707_vm2, %v720_v11, 0.0 }
  0xbe   : > { %723 = vadd.xlane.f32.xlu1 %v722_v13 }
  0xbf   : > { %v721_v14 = vmul.f32 %v719_v12, %v719_v12 }
  0xc1   : > { %v725_v15 = vsel %vm711_vm3, %v721_v14, 0.0 }
  0xc2   : > { %726 = vadd.xlane.f32.xlu1 %v725_v15 }
 0x14b   : > { %v724_v19 = vpop.xlane.xlu1 %723 }
 0x14c   : > { %v728_v20 = vmul.f32 0.03125, %v724_v19 }
 0x14e   : > { %v730_v21 = vadd.f32 1e-05, %v728_v20 }
 0x14f   : > { %v727_v22 = vpop.xlane.xlu1 %726 }
 0x150   : > { %2190 = vrsqrt.f32 %v730_v21  ;;  %v729_v23 = vmul.f32 0.03125, %v727_v22 }
 0x152   : > { %v731_v24 = vadd.f32 1e-05, %v729_v23 }
 0x154   : > { %2192 = vrsqrt.f32 %v731_v24 }
 0x15a   : > { %v2191_v25 = vpop.eup %2190 }
 0x15b   : > { %v734_v26 = vmul.f32 %v2191_v25, %v718_v8 }
 0x15d   : > { %v742_v30 = vmul.f32 %v1947_v27, %v734_v26 }
 0x15e   : > { %v2193_v28 = vpop.eup %2192 }
 0x15f   : > { %v735_v29 = vmul.f32 %v2193_v28, %v719_v12  ;;  %v750_v33 = vadd.f32 %v1948_v31, %v742_v30 }
 0x161   : > { %v743_v32 = vmul.f32 %v1947_v27, %v735_v29 }
 0x163   : > { %v751_v34 = vadd.f32 %v1948_v31, %v743_v32 }
 0x165   : > { %v780_v35 = vpack.c.bf16 %v751_v34, %v750_v33 }
 0x167   : > { %2033 = vmatmul.mubr.msk.bf16.vlgmr.msra.gmra.mrb[0].mxu0 %vm707_vm2, %v780_v35 }
 0x168   : > { %2038 = vmatprep.mubr.msk.bf16.mxu0 %vm2247_vm4, %v2246_v17 }
 0x23a   : > { %v836_v37 = vpop.f32.mrb[0].mxu0 }
 0x23b   : > { %v837_v38 = vadd.f32 %v1950_v36, %v836_v37  ;;  %v2034_v39 = vpop.f32.mrb[1].mxu0 }
 0x23c   : > { %v839_v40 = vpop.f32.mrb[2].mxu0 }
 0x23d   : > { %v840_v41 = vadd.f32 %v1950_v36, %v839_v40  ;;  %v2035_v42 = vpop.f32.mrb[3].mxu0  ;;  %v843_v43 = vmul.f32 0.35355338, %v837_v38 }
 0x23f   : > { %v844_v44 = vmul.f32 0.35355338, %v840_v41  ;;  %v2467_v45 = vpack.c.bf16 %v840_v41, %v837_v38 }
 0x241   : > { %v845_v46 = vpack.c.bf16 %v844_v44, %v843_v43  ;;  %976 = vrot.lane.b32.xlu1 %v2467_v45, %s2248_s20  ;;  %848 = vrot.lane.b32.xlu0 %v2467_v45, %s2249_s21  ;;  %s2665_s21 = sld [smem:[#allocation7_spill]]  ;;  %s2667_s20 = scalar_lea.vmem %s2637_s9, %s2359_s23 }
 0x245   : > { %1097 = vrot.lane.b32.xlu0 %v845_v46, %s2250_s2  ;;  %974 = vrot.lane.b32.xlu1 %v845_v46, %s2251_s3  ;;  %s2257_s2 = smov 56   ;;  %s2258_s3 = smov 48  }
 0x247   : > { %v1949_v61 = vld [vmem:[%s2665_s21] ss:$0 sm:$0xff] }
 0x249   : > { %1220 = vrot.lane.b32.xlu0 %v845_v46, %s2252_s1  ;;  %1099 = vrot.lane.b32.xlu1 %v2467_v45, %s2253_s22  ;;  %s2259_s1 = smov 64   ;;  %s2260_s22 = smov 40  }
 0x24d   : > { %1222 = vrot.lane.b32.xlu1 %v2467_v45, %s2254_s29  ;;  %762 = vperm.xlu0 %2160, %v753_v47   ;;  %s2262_s29 = smov 16  }
 0x251   : > { %757 = vperm.xlu1 %2159, %v752_v49  }
 0x2b3   : > { %v977_v50 = vpop.permute.xlu1 %976  ;;  %v849_v51 = vpop.permute.xlu0 %848 }
 0x2b4   : > { %v855_v52 = vsel %vm850_vm5, %v849_v51, 0  ;;  %v982_v53 = vsel %vm850_vm5, %v977_v50, 0 }
 0x2b5   : > { %2037 = vmatpush3.bf16.xpose.msra.mxu0 %v855_v52  ;;  %2049 = vmatpush3.bf16.xpose.msra.mxu1 %v982_v53 }
 0x2b6   : > { %2060 = vmatprep.subr.bf16.mxu1 %v2246_v17  ;;  %2042 = vmatprep.subr.bf16.mxu0 %v2246_v17 }
 0x2b7   : > { %v975_v54 = vpop.permute.xlu1 %974  ;;  %v1098_v58 = vpop.permute.xlu0 %1097 }
 0x2bb   : > { %v1100_v55 = vpop.permute.xlu1 %1099  ;;  %v1221_v60 = vpop.permute.xlu0 %1220 }
 0x2bc   : > { %v1105_v56 = vsel %vm850_vm5, %v1100_v55, 0  ;;  %2039 = vmatmul.mubr.msk.bf16.vlgmr.msra.gmra.mrb[4].mxu0 %vm850_vm5, %v845_v46  ;;  %2051 = vmatmul.mubr.msk.bf16.vlgmr.msra.gmra.mrb[0].mxu1 %vm850_vm5, %v975_v54 }
 0x2bd   : > { %2061 = vmatpush3.bf16.xpose.msra.mxu1 %v1105_v56  ;;  %2062 = vmatprep.mubr.msk.bf16.mxu1 %vm2247_vm4, %v2246_v17 }
 0x2be   : > { %2072 = vmatprep.subr.bf16.mxu1 %v2246_v17  ;;  %2044 = vmatprep.mubr.msk.bf16.mxu0 %vm2247_vm4, %v2246_v17 }
 0x2bf   : > { %v1223_v57 = vpop.permute.xlu1 %1222 }
 0x2c0   : > { %v1228_v59 = vsel %vm850_vm5, %v1223_v57, 0 }
 0x2c4   : > { %2063 = vmatmul.mubr.msk.bf16.vlgmr.msra.gmra.mrb[4].mxu1 %vm850_vm5, %v1098_v58 }
 0x2c5   : > { %2073 = vmatpush3.bf16.xpose.msra.mxu1 %v1228_v59  ;;  %2074 = vmatprep.mubr.msk.bf16.mxu1 %vm2247_vm4, %v2246_v17 }
 0x2c6   : > { %2084 = vmatprep.subr.bf16.mxu1 %v2246_v17 }
 0x2cc   : > { %2075 = vmatmul.mubr.msk.bf16.vlgmr.msra.gmra.mrb[8].mxu1 %vm850_vm5, %v1221_v60  ;;  %v763_v63 = vpop.permute.xlu0 %762 }
 0x2cd   : > { %2088 = vmatprep.mubr.msk.bf16.mxu1 %vm2247_vm4, %v2246_v17  ;;  %vm772_vm7 = vcmp.eq.f32.partialorder %v763_v63, %v1949_v61 }
 0x2ce   : > { %v774_v4 = vsel %vm772_vm7, 0.0, %v2256_v0 }
 0x2d0   : > { %v758_v62 = vpop.permute.xlu1 %757 }
 0x2d1   : > { %vm771_vm6 = vcmp.eq.f32.partialorder %v758_v62, %v1949_v61 }
 0x2d2   : > { %v773_v1 = vsel %vm771_vm6, 0.0, %v2256_v0 }
 0x38f   : > { %v891_v5 = vpop.f32.mrb[4].mxu0  ;;  %v1018_v6 = vpop.f32.mrb[0].mxu1 }
 0x390   : > { %v892_v7 = vadd.f32 %v891_v5, %v773_v1  ;;  %v1019_v8 = vadd.f32 %v1018_v6, %v773_v1  ;;  %v2040_v9 = vpop.f32.mrb[5].mxu0  ;;  %v2052_v10 = vpop.f32.mrb[1].mxu1 }
 0x391   : > { %v894_v11 = vpop.f32.mrb[6].mxu0  ;;  %v1021_v12 = vpop.f32.mrb[2].mxu1 }
 0x392   : > { %v895_v13 = vadd.f32 %v894_v11, %v774_v4  ;;  %v1022_v14 = vadd.f32 %v1021_v12, %v774_v4  ;;  %v2041_v15 = vpop.f32.mrb[7].mxu0  ;;  %v2053_v16 = vpop.f32.mrb[3].mxu1  ;;  %v1025_v18 = vsel %vm898_vm8, %v1019_v8, -inf  ;;  %v899_v19 = vsel %vm898_vm8, %v892_v7, -inf }
 0x393   : > { %1026 = vmax.xlane.f32.xlu0 %v1025_v18  ;;  %900 = vmax.xlane.f32.xlu1 %v899_v19 }
 0x394   : > { %v1028_v20 = vsel %vm902_vm9, %v1022_v14, -inf  ;;  %v903_v21 = vsel %vm902_vm9, %v895_v13, -inf }
 0x397   : > { %v1141_v22 = vpop.f32.mrb[4].mxu1  ;;  %1029 = vmax.xlane.f32.xlu1 %v1028_v20  ;;  %904 = vmax.xlane.f32.xlu0 %v903_v21 }
 0x398   : > { %v1142_v23 = vadd.f32 %v1141_v22, %v773_v1  ;;  %v2064_v24 = vpop.f32.mrb[5].mxu1 }
 0x399   : > { %v1144_v25 = vpop.f32.mrb[6].mxu1 }
 0x39a   : > { %v1145_v26 = vadd.f32 %v1144_v25, %v774_v4  ;;  %v2065_v27 = vpop.f32.mrb[7].mxu1  ;;  %v1148_v28 = vsel %vm898_vm8, %v1142_v23, -inf }
 0x39b   : > { %1149 = vmax.xlane.f32.xlu0 %v1148_v28 }
 0x39c   : > { %v1151_v29 = vsel %vm902_vm9, %v1145_v26, -inf }
 0x39d   : > { %1152 = vmax.xlane.f32.xlu1 %v1151_v29 }
 0x39f   : > { %v1264_v30 = vpop.f32.mrb[8].mxu1 }
 0x3a0   : > { %v1265_v31 = vadd.f32 %v1264_v30, %v773_v1  ;;  %v2076_v32 = vpop.f32.mrb[9].mxu1 }
 0x3a1   : > { %v1267_v33 = vpop.f32.mrb[10].mxu1 }
 0x3a2   : > { %v2077_v34 = vpop.f32.mrb[11].mxu1  ;;  %v1271_v35 = vsel %vm898_vm8, %v1265_v31, -inf  ;;  %v2512_v36 = vadd.f32 %v1267_v33, %v774_v4 }
 0x3a3   : > { %1272 = vmax.xlane.f32.xlu0 %v1271_v35 }
 0x3a4   : > { %v1274_v37 = vsel %vm902_vm9, %v2512_v36, -inf }
 0x3ae   : > { %1044 = vrot.lane.b32.xlu1 %v2467_v45, %s2257_s2 }
 0x3b2   : > { %1167 = vrot.lane.b32.xlu1 %v2467_v45, %s2258_s3 }
 0x3b9   : > { %919 = vrot.lane.b32.xlu0 %v2467_v45, %s2259_s1 }
 0x3d6   : > { %1275 = vmax.xlane.f32.xlu1 %v1274_v37 }
 0x3e7   : > { %1290 = vrot.lane.b32.xlu1 %v2467_v45, %s2260_s22  ;;  %s2669_s22 = scalar_lea.vmem %s2639_s11, %s2359_s23 }
 0x420   : > { %v1027_v38 = vpop.xlane.xlu0 %1026  ;;  %v901_v39 = vpop.xlane.xlu1 %900 }
 0x421   : > { %v1031_v40 = vsub.f32 %v1019_v8, %v1027_v38  ;;  %v906_v42 = vsub.f32 %v892_v7, %v901_v39 }
 0x423   : > { %v1033_v41 = vmul.f32 1.442695, %v1031_v40  ;;  %v908_v50 = vmul.f32 1.442695, %v906_v42 }
 0x424   : > { %v1030_v43 = vpop.xlane.xlu1 %1029  ;;  %v905_v44 = vpop.xlane.xlu0 %904 }
 0x425   : > { %2194 = vpow2.f32 %v1033_v41  ;;  %v1032_v46 = vsub.f32 %v1022_v14, %v1030_v43  ;;  %v907_v47 = vsub.f32 %v895_v13, %v905_v44 }
 0x427   : > { %v1035_v48 = vmul.f32 1.442695, %v1032_v46  ;;  %v910_v49 = vmul.f32 1.442695, %v907_v47  ;;  %v2178_v46 = vld [vmem:[%s2666_s18] sm:$0xff]  }
 0x428   : > { %v1150_v51 = vpop.xlane.xlu0 %1149  ;;  %2085 = vmatpush3.bf16.msra.mxu1 %v2178_v46 }
 0x429   : > { %2196 = vpow2.f32 %v1035_v48  ;;  %v1154_v52 = vsub.f32 %v1142_v23, %v1150_v51  ;;  %2086 = vmatprep.subr.bf16.mxu1 %v2246_v17 }
 0x42a   : > { %2198 = vpow2.f32 %v910_v49  ;;  %v1153_v53 = vpop.xlane.xlu1 %1152 }
 0x42b   : > { %v1156_v54 = vmul.f32 1.442695, %v1154_v52  ;;  %v1155_v45 = vsub.f32 %v1145_v26, %v1153_v53  ;;  %2200 = vpow2.f32 %v908_v50 }
 0x42d   : > { %2202 = vpow2.f32 %v1156_v54  ;;  %v1158_v55 = vmul.f32 1.442695, %v1155_v45 }
 0x42e   : > { %v1045_v5 = vpop.permute.xlu1 %1044 }
 0x42f   : > { %v2195_v56 = vpop.eup %2194  ;;  %2204 = vpow2.f32 %v1158_v55  ;;  %v1050_v10 = vsel %vm924_vm10, %v1045_v5, 0 }
 0x430   : > { %v1273_v57 = vpop.xlane.xlu0 %1272  ;;  %v1037_v58 = vsel %vm898_vm8, %v2195_v56, 0.0 }
 0x431   : > { %v1277_v59 = vsub.f32 %v1265_v31, %v1273_v57  ;;  %1038 = vadd.xlane.f32.xlu0 %v1037_v58  ;;  %v2179_v58 = vld [vmem:[%s2666_s18 + $0x8] sm:$0xff]  }
 0x432   : > { %v1168_v12 = vpop.permute.xlu1 %1167  ;;  %2087 = vmatpush3.bf16.msra.mxu1 %v2179_v58 }
 0x433   : > { %v2197_v60 = vpop.eup %2196  ;;  %v1279_v61 = vmul.f32 1.442695, %v1277_v59  ;;  %v1173_v16 = vsel %vm924_vm10, %v1168_v12, 0  ;;  %2100 = vmatprep.subr.bf16.mxu1 %v2246_v17 }
 0x434   : > { %v2199_v62 = vpop.eup %2198  ;;  %v920_v63 = vpop.permute.xlu0 %919  ;;  %v1040_v0 = vsel %vm902_vm9, %v2197_v60, 0.0  ;;  %v1043_v14 = vpack.c.bf16 %v2197_v60, %v2195_v56 }
 0x435   : > { %2206 = vpow2.f32 %v1279_v61  ;;  %v926_v1 = vsel %vm924_vm10, %v920_v63, 0  ;;  %1041 = vadd.xlane.f32.xlu1 %v1040_v0  ;;  %v2201_v4 = vpop.eup %2200  ;;  %v915_v28 = vsel %vm902_vm9, %v2199_v62, 0.0 }
 0x436   : > { %2043 = vmatpush3.bf16.msra.mxu0 %v926_v1  ;;  %v918_v7 = vpack.c.bf16 %v2199_v62, %v2201_v4  ;;  %v912_v18 = vsel %vm898_vm8, %v2201_v4, 0.0 }
 0x437   : > { %v2203_v6 = vpop.eup %2202  ;;  %2054 = vmatprep.subr.bf16.mxu0 %v2246_v17 }
 0x438   : > { %v1160_v8 = vsel %vm898_vm8, %v2203_v6, 0.0 }
 0x439   : > { %v2205_v9 = vpop.eup %2204  ;;  %1161 = vadd.xlane.f32.xlu0 %v1160_v8  ;;  %2045 = vmatmul.mubr.msk.bf16.vlgmr.msra.gmra.mrb[8].mxu0 %vm898_vm8, %v918_v7 }
 0x43a   : > { %2055 = vmatpush3.bf16.msra.mxu0 %v1050_v10  ;;  %2056 = vmatprep.mubr.msk.bf16.mxu0 %vm2247_vm4, %v2246_v17  ;;  %v1163_v11 = vsel %vm902_vm9, %v2205_v9, 0.0  ;;  %v1166_v19 = vpack.c.bf16 %v2205_v9, %v2203_v6 }
 0x43b   : > { %2066 = vmatprep.subr.bf16.mxu0 %v2246_v17 }
 0x43d   : > { %1164 = vadd.xlane.f32.xlu0 %v1163_v11 }
 0x43f   : > { %v2207_v13 = vpop.eup %2206 }
 0x440   : > { %v1283_v15 = vsel %vm898_vm8, %v2207_v13, 0.0 }
 0x441   : > { %1284 = vadd.xlane.f32.xlu0 %v1283_v15  ;;  %2057 = vmatmul.mubr.msk.bf16.vlgmr.msra.gmra.mrb[12].mxu0 %vm898_vm8, %v1043_v14 }
 0x442   : > { %2067 = vmatpush3.bf16.msra.mxu0 %v1173_v16  ;;  %2068 = vmatprep.mubr.msk.bf16.mxu0 %vm2247_vm4, %v2246_v17 }
 0x443   : > { %2078 = vmatprep.subr.bf16.mxu0 %v2246_v17 }
 0x445   : > { %913 = vadd.xlane.f32.xlu0 %v912_v18 }
 0x449   : > { %2069 = vmatmul.mubr.msk.bf16.vlgmr.msra.gmra.mrb[16].mxu0 %vm898_vm8, %v1166_v19 }
 0x44a   : > { %2080 = vmatprep.mubr.msk.bf16.mxu0 %vm2247_vm4, %v2246_v17 }
 0x463   : > { %v1276_v20 = vpop.xlane.xlu1 %1275 }
 0x464   : > { %v1278_v21 = vsub.f32 %v2512_v36, %v1276_v20 }
 0x466   : > { %v1281_v22 = vmul.f32 1.442695, %v1278_v21 }
 0x467   : > { %v1291_v23 = vpop.permute.xlu1 %1290 }
 0x468   : > { %2208 = vpow2.f32 %v1281_v22  ;;  %v1296_v24 = vsel %vm924_vm10, %v1291_v23, 0 }
 0x469   : > { %2079 = vmatpush3.bf16.msra.mxu0 %v1296_v24 }
 0x46a   : > { %2092 = vmatprep.subr.bf16.mxu0 %v2246_v17 }
 0x472   : > { %v2209_v25 = vpop.eup %2208 }
 0x473   : > { %v1286_v26 = vsel %vm902_vm9, %v2209_v25, 0.0  ;;  %v1289_v27 = vpack.c.bf16 %v2209_v25, %v2207_v13 }
 0x474   : > { %1287 = vadd.xlane.f32.xlu1 %v1286_v26 }
 0x475   : > { %2081 = vmatmul.mubr.msk.bf16.vlgmr.msra.gmra.mrb[20].mxu0 %vm898_vm8, %v1289_v27 }
 0x476   : > { %2096 = vmatprep.mubr.msk.bf16.mxu0 %vm2247_vm4, %v2246_v17 }
 0x478   : > { %916 = vadd.xlane.f32.xlu1 %v915_v28 }
 0x4be   : > { %v1039_v29 = vpop.xlane.xlu0 %1038 }
 0x4bf   : > { %2210 = vrcp.f32 %v1039_v29  ;;  %v1962_v29 = vld [vmem:[%s2667_s20] ss:$0 sm:$0xff] }
 0x4c2   : > { %v1042_v30 = vpop.xlane.xlu1 %1041 }
 0x4c3   : > { %2212 = vrcp.f32 %v1042_v30 }
 0x4c6   : > { %v1162_v31 = vpop.xlane.xlu0 %1161 }
 0x4c7   : > { %2214 = vrcp.f32 %v1162_v31 }
 0x4c9   : > { %v2211_v38 = vpop.eup %2210 }
 0x4ca   : > { %v1165_v36 = vpop.xlane.xlu0 %1164 }
 0x4cb   : > { %2216 = vrcp.f32 %v1165_v36 }
 0x4cd   : > { %v2213_v40 = vpop.eup %2212 }
 0x4ce   : > { %v1285_v56 = vpop.xlane.xlu0 %1284 }
 0x4cf   : > { %2218 = vrcp.f32 %v1285_v56 }
 0x4d1   : > { %v2215_v49 = vpop.eup %2214 }
 0x4d2   : > { %v914_v7 = vpop.xlane.xlu0 %913 }
 0x4d5   : > { %v2217_v51 = vpop.eup %2216 }
 0x4d9   : > { %v2219_v60 = vpop.eup %2218 }
 0x501   : > { %v1288_v57 = vpop.xlane.xlu1 %1287 }
 0x502   : > { %2220 = vrcp.f32 %v1288_v57 }
 0x505   : > { %v917_v6 = vpop.xlane.xlu1 %916 }
 0x506   : > { %2222 = vrcp.f32 %v917_v6  ;;  %v2183_v6 = vld [vmem:[%s2409_s27 + $0x8] sm:$0xff]  }
 0x507   : > { %2224 = vrcp.f32 %v914_v7  ;;  %v2184_v7 = vld [vmem:[%s2409_s27 + $0x10] sm:$0xff]  }
 0x50c   : > { %v962_v32 = vpop.f32.mrb[8].mxu0  ;;  %v2221_v62 = vpop.eup %2220 }
 0x50d   : > { %v2046_v33 = vpop.f32.mrb[9].mxu0 }
 0x50e   : > { %v965_v34 = vpop.f32.mrb[10].mxu0 }
 0x50f   : > { %v2047_v35 = vpop.f32.mrb[11].mxu0 }
 0x510   : > { %v2223_v10 = vpop.eup %2222 }
 0x511   : > { %v2225_v13 = vpop.eup %2224  ;;  %v972_v18 = vmul.f32 %v2223_v10, %v965_v34  ;;  %v2187_v10 = vld [vmem:[%s2409_s27 + $0x28] sm:$0xff]  }
 0x512   : > { %v971_v16 = vmul.f32 %v2225_v13, %v962_v32  ;;  %v1968_v13 = vld [vmem:[%s679_s8] ss:$0 sm:$0xff] }
 0x514   : > { %v1086_v37 = vpop.f32.mrb[12].mxu0 }
 0x515   : > { %v2058_v39 = vpop.f32.mrb[13].mxu0  ;;  %v1095_v42 = vmul.f32 %v2211_v38, %v1086_v37 }
 0x516   : > { %v1089_v41 = vpop.f32.mrb[14].mxu0 }
 0x517   : > { %v1096_v43 = vmul.f32 %v2213_v40, %v1089_v41  ;;  %v2059_v44 = vpop.f32.mrb[15].mxu0 }
 0x519   : > { %v2161_v47 = vpack.i.bf16 %v1096_v43, %v1095_v42 }
 0x51b   : > { %2162 = vrot.lane.b32.xlu0 %v2161_v47, %s2261_s24 }
 0x51c   : > { %v1209_v48 = vpop.f32.mrb[16].mxu0 }
 0x51d   : > { %v2070_v50 = vpop.f32.mrb[17].mxu0  ;;  %v1218_v53 = vmul.f32 %v2215_v49, %v1209_v48  ;;  %v2180_v49 = vld [vmem:[%s2399_s6] sm:$0xff]  }
 0x51e   : > { %v1212_v52 = vpop.f32.mrb[18].mxu0  ;;  %2093 = vmatpush3.bf16.msra.mxu0 %v2180_v49  ;;  %v2181_v50 = vld [vmem:[%s2399_s6 + $0x8] sm:$0xff]   ;;  %s2668_s6 = scalar_lea.vmem %s2638_s10, %s2359_s23 }
 0x51f   : > { %v1219_v54 = vmul.f32 %v2217_v51, %v1212_v52  ;;  %v2071_v45 = vpop.f32.mrb[19].mxu0  ;;  %2094 = vmatprep.subr.bf16.mxu0 %v2246_v17  ;;  %v1966_v58 = vld [vmem:[%s2668_s6] ss:$0 sm:$0xff] }
 0x521   : > { %v2166_v55 = vpack.i.bf16 %v1219_v54, %v1218_v53 }
 0x522   : > { %2095 = vmatpush3.bf16.msra.mxu0 %v2181_v50 }
 0x523   : > { %2167 = vrot.lane.b32.xlu1 %v2166_v55, %s2262_s29  ;;  %s2670_s29 = sld [smem:[#allocation8_spill]] }
 0x548   : > { %v1332_v59 = vpop.f32.mrb[20].mxu0 }
 0x549   : > { %v2082_v61 = vpop.f32.mrb[21].mxu0  ;;  %v1341_v0 = vmul.f32 %v2219_v60, %v1332_v59 }
 0x54a   : > { %v1335_v63 = vpop.f32.mrb[22].mxu0 }
 0x54b   : > { %v1342_v1 = vmul.f32 %v2221_v62, %v1335_v63  ;;  %v2083_v4 = vpop.f32.mrb[23].mxu0  ;;  %v1967_v62 = vld [vmem:[%s2669_s22] ss:$0 sm:$0xff] }
 0x54d   : > { %v2171_v5 = vpack.i.bf16 %v1342_v1, %v1341_v0 }
 0x54f   : > { %2172 = vrot.lane.b32.xlu1 %v2171_v5, %s2263_s28  ;;  %v2182_v5 = vld [vmem:[%s2409_s27] sm:$0xff]  }
 0x58d   : > { %v2163_v8 = vpop.permute.xlu0 %2162 }
 0x58e   : > { %v2165_v11 = vunpack.i.h.bf16 %v2163_v8  ;;  %v2164_v12 = vunpack.i.l.bf16 %v2163_v8  ;;  %v2185_v8 = vld [vmem:[%s2409_s27 + $0x18] sm:$0xff]  }
 0x590   : > { %v1368_v20 = vsel %vm850_vm5, %v972_v18, %v2165_v11  ;;  %v1367_v21 = vsel %vm850_vm5, %v971_v16, %v2164_v12  ;;  %v2188_v11 = vld [vmem:[%s2409_s27 + $0x30] sm:$0xff]   ;;  %v2189_v12 = vld [vmem:[%s2409_s27 + $0x38] sm:$0xff]  }
 0x595   : > { %v2168_v9 = vpop.permute.xlu1 %2167 }
 0x596   : > { %v2170_v14 = vunpack.i.h.bf16 %v2168_v9  ;;  %v2169_v15 = vunpack.i.l.bf16 %v2168_v9  ;;  %v2186_v9 = vld [vmem:[%s2409_s27 + $0x20] sm:$0xff]  }
 0x598   : > { %v1371_v24 = vsel %vm1369_vm11, %v1368_v20, %v2170_v14  ;;  %v1370_v25 = vsel %vm1369_vm11, %v1367_v21, %v2169_v15 }
 0x5c1   : > { %v2173_v19 = vpop.permute.xlu1 %2172 }
 0x5c2   : > { %v2175_v22 = vunpack.i.h.bf16 %v2173_v19  ;;  %v2174_v23 = vunpack.i.l.bf16 %v2173_v19 }
 0x5c4   : > { %v1374_v26 = vsel %vm1372_vm12, %v1371_v24, %v2175_v22  ;;  %v1373_v27 = vsel %vm1372_vm12, %v1370_v25, %v2174_v23 }
 0x5c5   : > { %v1375_v28 = vpack.c.bf16 %v1374_v26, %v1373_v27 }
 0x5c7   : > { %2089 = vmatmul.mubr.msk.bf16.vlgmr.msra.gmra.mrb[12].mxu1 %vm707_vm2, %v1375_v28 }
 0x5c8   : > { %2116 = vmatprep.mubr.msk.bf16.mxu1 %vm2247_vm4, %v2246_v17  ;;  %2101 = vmatpush3.bf16.msra.mxu1 %v2182_v5 }
 0x5c9   : > { %2102 = vmatprep.subr.bf16.mxu1 %v2246_v17 }
 0x5cc   : > { %2103 = vmatpush3.bf16.msra.mxu1 %v2183_v6 }
 0x5cd   : > { %2104 = vmatprep.subr.bf16.mxu1 %v2246_v17 }
 0x5d0   : > { %2105 = vmatpush3.bf16.msra.mxu1 %v2184_v7 }
 0x5d1   : > { %2106 = vmatprep.subr.bf16.mxu1 %v2246_v17 }
 0x5d4   : > { %2107 = vmatpush3.bf16.msra.mxu1 %v2185_v8 }
 0x5d5   : > { %2108 = vmatprep.subr.bf16.mxu1 %v2246_v17 }
 0x5d8   : > { %2109 = vmatpush3.bf16.msra.mxu1 %v2186_v9 }
 0x5d9   : > { %2110 = vmatprep.subr.bf16.mxu1 %v2246_v17 }
 0x5dc   : > { %2111 = vmatpush3.bf16.msra.mxu1 %v2187_v10 }
 0x5dd   : > { %2112 = vmatprep.subr.bf16.mxu1 %v2246_v17 }
 0x5e0   : > { %2113 = vmatpush3.bf16.msra.mxu1 %v2188_v11 }
 0x5e1   : > { %2114 = vmatprep.subr.bf16.mxu1 %v2246_v17 }
 0x5e4   : > { %2115 = vmatpush3.bf16.msra.mxu1 %v2189_v12 }
 0x69a   : > { %v1436_v30 = vpop.f32.mrb[12].mxu1 }
 0x69b   : > { %v1437_v31 = vadd.f32 %v1962_v29, %v1436_v30  ;;  %v2090_v32 = vpop.f32.mrb[13].mxu1 }
 0x69c   : > { %v1439_v33 = vpop.f32.mrb[14].mxu1 }
 0x69d   : > { %v2561_v34 = vadd.f32 %v1437_v31, %v2427_v2  ;;  %v1440_v35 = vadd.f32 %v1962_v29, %v1439_v33  ;;  %v2091_v36 = vpop.f32.mrb[15].mxu1  ;;  %v2264_v33 = vmov 0.0|0.0  }
 0x69e   : > { %2127 = vmatprep.subr.bf16.mxu0 %v2264_v33  ;;  %v1982_v36 = vld [vmem:[%s687_s0] ss:$0 sm:$0xff] }
 0x69f   : > { %v2564_v37 = vadd.f32 %v1440_v35, %v2429_v3  ;;  %v1447_v38 = vsel %vm707_vm2, %v2561_v34, 0.0 }
 0x6a0   : > { %1448 = vadd.xlane.f32.xlu1 %v1447_v38 }
 0x6a1   : > { %v1450_v39 = vsel %vm711_vm3, %v2564_v37, 0.0 }
 0x6a2   : > { %1451 = vadd.xlane.f32.xlu0 %v1450_v39 }
 0x72d   : > { %v1449_v40 = vpop.xlane.xlu1 %1448 }
 0x72e   : > { %v1453_v41 = vmul.f32 0.03125, %v1449_v40 }
 0x72f   : > { %v1452_v42 = vpop.xlane.xlu0 %1451 }
 0x730   : > { %v1455_v2 = vsub.f32 %v2561_v34, %v1453_v41  ;;  %v1454_v43 = vmul.f32 0.03125, %v1452_v42 }
 0x732   : > { %v1456_v44 = vsub.f32 %v2564_v37, %v1454_v43  ;;  %v1457_v3 = vmul.f32 %v1455_v2, %v1455_v2 }
 0x734   : > { %v1459_v46 = vsel %vm707_vm2, %v1457_v3, 0.0  ;;  %v1458_v47 = vmul.f32 %v1456_v44, %v1456_v44 }
 0x735   : > { %1460 = vadd.xlane.f32.xlu0 %v1459_v46 }
 0x736   : > { %v1462_v48 = vsel %vm711_vm3, %v1458_v47, 0.0 }
 0x739   : > { %1463 = vadd.xlane.f32.xlu0 %v1462_v48 }
 0x7c2   : > { %v1461_v51 = vpop.xlane.xlu0 %1460 }
 0x7c3   : > { %v1465_v52 = vmul.f32 0.03125, %v1461_v51 }
 0x7c5   : > { %v1467_v53 = vadd.f32 1e-05, %v1465_v52 }
 0x7c6   : > { %v1464_v54 = vpop.xlane.xlu0 %1463 }
 0x7c7   : > { %2226 = vrsqrt.f32 %v1467_v53  ;;  %v1466_v45 = vmul.f32 0.03125, %v1464_v54 }
 0x7c9   : > { %v1468_v55 = vadd.f32 1e-05, %v1466_v45 }
 0x7cb   : > { %2228 = vrsqrt.f32 %v1468_v55 }
 0x7d1   : > { %v2227_v56 = vpop.eup %2226 }
 0x7d2   : > { %v1471_v57 = vmul.f32 %v2227_v56, %v1455_v2 }
 0x7d4   : > { %v1479_v60 = vmul.f32 %v1966_v58, %v1471_v57 }
 0x7d5   : > { %v2229_v59 = vpop.eup %2228 }
 0x7d6   : > { %v1472_v61 = vmul.f32 %v2229_v59, %v1456_v44  ;;  %v1487_v0 = vadd.f32 %v1967_v62, %v1479_v60 }
 0x7d8   : > { %v1480_v63 = vmul.f32 %v1966_v58, %v1472_v61 }
 0x7da   : > { %v1488_v1 = vadd.f32 %v1967_v62, %v1480_v63 }
 0x7dc   : > { %v1489_v4 = vpack.c.bf16 %v1488_v1, %v1487_v0 }
 0x7de   : > { %2097 = vmatmul.mubr.msk.bf16.vlgmr.msra.gmra.mrb[24].mxu0 %vm707_vm2, %v1489_v4 }
 0x7df   : > { %2124 = vmatprep.mubr.msk.f32.mxu0 %vm2247_vm4, %v2246_v17 }
 0x8b1   : > { %v1550_v14 = vpop.f32.mrb[24].mxu0 }
 0x8b2   : > { %v1551_v15 = vadd.f32 %v1968_v13, %v1550_v14  ;;  %v2098_v16 = vpop.f32.mrb[25].mxu0 }
 0x8b3   : > { %v1553_v18 = vpop.f32.mrb[26].mxu0 }
 0x8b4   : > { %v1972_v19 = vmul.f32 -1.702, %v1551_v15  ;;  %v1554_v20 = vadd.f32 %v1968_v13, %v1553_v18  ;;  %v2099_v21 = vpop.f32.mrb[27].mxu0 }
 0x8b6   : > { %v1561_v22 = vmul.f32 1.442695, %v1972_v19  ;;  %v1973_v23 = vmul.f32 -1.702, %v1554_v20 }
 0x8b8   : > { %2230 = vpow2.f32 %v1561_v22  ;;  %v1563_v24 = vmul.f32 1.442695, %v1973_v23 }
 0x8ba   : > { %2232 = vpow2.f32 %v1563_v24 }
 0x8c2   : > { %v2231_v17 = vpop.eup %2230 }
 0x8c3   : > { %v1565_v25 = vadd.f32 1.0, %v2231_v17 }
 0x8c4   : > { %v2233_v26 = vpop.eup %2232 }
 0x8c5   : > { %2234 = vrcp.f32 %v1565_v25  ;;  %v1566_v27 = vadd.f32 1.0, %v2233_v26 }
 0x8c7   : > { %2236 = vrcp.f32 %v1566_v27 }
 0x8cf   : > { %v2235_v28 = vpop.eup %2234 }
 0x8d0   : > { %v1571_v30 = vmul.f32 %v2235_v28, %v1551_v15 }
 0x8d1   : > { %v2237_v29 = vpop.eup %2236 }
 0x8d2   : > { %v1572_v31 = vmul.f32 %v2237_v29, %v1554_v20 }
 0x8d4   : > { %v1573_v32 = vpack.c.bf16 %v1572_v31, %v1571_v30 }
 0x8d6   : > { %2117 = vmatmul.mubr.bf16.vlgmr.msra.gmra.mrb[16].mxu1 %v1573_v32 }
 0x9a9   : > { %v1672_v35 = vpop.f32.mrb[16].mxu1 }
 0x9aa   : > { %v1679_v38 = vadd.f32 %v1672_v35, %v2561_v34  ;;  %v2118_v39 = vpop.f32.mrb[17].mxu1  ;;  %v1692_v34 = vld [vmem:[%s2670_s29] sm:$0x3] }
 0x9ab   : > { %v1675_v40 = vpop.f32.mrb[18].mxu1 }
 0x9ac   : > { %v1688_v41 = vadd.f32 %v1982_v36, %v1679_v38  ;;  %v1680_v42 = vadd.f32 %v1675_v40, %v2564_v37  ;;  %v2119_v2 = vpop.f32.mrb[19].mxu1 }
 0x9ae   : > { %1690 = vst.msk [vmem:[#allocation2] sm:$0xff] %vm707_vm2, %v1688_v41  ;;  %v1689_v43 = vadd.f32 %v1982_v36, %v1680_v42 }
 0x9b0   : > { %1691 = vst.msk [vmem:[#allocation2 + $0x8] sm:$0x3] %vm711_vm3, %v1689_v43  ;;  %v2128_v44 = vpack.c.bf16 %v1689_v43, %v1688_v41 }
 0x9b2   : > { %2130 = vmatpush3.bf16.msk.msra.mxu0 %vm2129_vm15, %v2128_v44 }
 0x9b5   : > { %2125 = vmatmul.mubr.msk.f32.vlgmr.msra.gmra.mrb[28].mxu0 %vm898_vm8, %v1692_v34 }
 0xa88   : > { %v1766_v3 = vpop.f32.mrb[28].mxu0 }
 0xa89   : > { %1770 = vst.msk [vmem:[%s2419_s30] sm:$0x3] %vm711_vm3, %v1766_v3  ;;  %v2126_v37 = vpop.f32.mrb[29].mxu0 }
 0xa8a PF: > { %s2671_s28 = sld [smem:[#allocation3_spill]] }
 0xa90   : > { %s26_s21 = sadd.s32 1, %s2671_s28  }
 0xa91   : > { %p23_p5 = scmp.ge.s32.totalorder %s26_s21, 14  }
 0xa93   :  { %25 = sbr.rel (!%p23_p5) target bundleno = 7 (0x7), region = 151 }

// kernel: mint_forward.4
= control target key start
LH: loop header
LB: loop body
LE: loop exit
PB: predicated region body
PF: predicated region fallthrough
CT: control target
= control target key end

     0   :  { %s3840_s0 = inlined_call_operand.vmem [shape: f32[10,32], index: 0, kind: input, shape index: {}]   ;;  %s3841_s1 = inlined_call_operand.vmem [shape: f32[10,1], index: 1, kind: input, shape index: {}]   ;;  %s3842_s2 = inlined_call_operand.vmem [shape: f32[1,10], index: 2, kind: input, shape index: {}]   ;;  %s3843_s3 = inlined_call_operand.vmem [shape: f32[2,32], index: 3, kind: input, shape index: {}]   ;;  %s3844_s4 = inlined_call_operand.vmem [shape: f32[2,32], index: 4, kind: input, shape index: {}]   ;;  %s3845_s5 = inlined_call_operand.vmem [shape: f32[1,2], index: 5, kind: input, shape index: {}]   ;;  %s3846_s6 = inlined_call_operand.vmem [shape: f32[2,10], index: 6, kind: input, shape index: {}]   ;;  %s3847_s7 = inlined_call_operand.vmem [shape: f32[1,32], index: 7, kind: input, shape index: {}]   ;;  %s3848_s8 = inlined_call_operand.vmem [shape: f32[1,32], index: 8, kind: input, shape index: {}]   ;;  %s3849_s9 = inlined_call_operand.vmem [shape: f32[32,32], index: 9, kind: input, shape index: {}]   ;;  %s3850_s10 = inlined_call_operand.vmem [shape: f32[12,1,32], index: 10, kind: input, shape index: {}]   ;;  %s3851_s11 = inlined_call_operand.vmem [shape: f32[12,1,32], index: 11, kind: input, shape index: {}]   ;;  %s3852_s12 = inlined_call_operand.vmem [shape: bf16[12,32,96], index: 12, kind: input, shape index: {}]   ;;  %s3853_s13 = inlined_call_operand.vmem [shape: f32[12,1,96], index: 13, kind: input, shape index: {}]   ;;  %s3854_s14 = inlined_call_operand.vmem [shape: bf16[12,32,32], index: 14, kind: input, shape index: {}]   ;;  %s3855_s15 = inlined_call_operand.vmem [shape: f32[12,1,32], index: 15, kind: input, shape index: {}]   ;;  %s3856_s16 = inlined_call_operand.vmem [shape: f32[12,1,32], index: 16, kind: input, shape index: {}]   ;;  %s3857_s17 = inlined_call_operand.vmem [shape: f32[12,1,32], index: 17, kind: input, shape index: {}]   ;;  %s3858_s18 = inlined_call_operand.vmem [shape: bf16[12,32,128], index: 18, kind: input, shape index: {}]   ;;  %s3859_s19 = inlined_call_operand.vmem [shape: f32[12,1,128], index: 19, kind: input, shape index: {}]   ;;  %s3860_s20 = inlined_call_operand.vmem [shape: bf16[12,128,32], index: 20, kind: input, shape index: {}]   ;;  %s3861_s21 = inlined_call_operand.vmem [shape: f32[12,1,32], index: 21, kind: input, shape index: {}]   ;;  %s3862_s22 = inlined_call_operand.vmem [shape: f32[2,32], index: 22, kind: output, shape index: {}]  }
   0x1   :  { %3867 = sst [smem:[#allocation4_spill]] %s3840_s0 }
   0x2   :  { %3868 = sst [smem:[#allocation5_spill]] %s3841_s1 }
   0x3   :  { %3869 = sst [smem:[#allocation6_spill]] %s3842_s2 }
   0x4   :  { %3870 = sst [smem:[#allocation7_spill]] %s3843_s3  ;;  %s3360_s3 = smov 0  }
   0x5   :  { %3871 = sst [smem:[#allocation8_spill]] %s3844_s4 }
   0x6   :  { %3872 = sst [smem:[#allocation9_spill]] %s3845_s5 }
   0x7   :  { %3873 = sst [smem:[#allocation10_spill]] %s3846_s6 }
   0x8   :  { %3874 = sst [smem:[#allocation11_spill]] %s3847_s7 }
   0x9   :  { %3875 = sst [smem:[#allocation12_spill]] %s3848_s8 }
   0xa   :  { %3876 = sst [smem:[#allocation13_spill]] %s3849_s9 }
   0xb   :  { %3877 = sst [smem:[#allocation14_spill]] %s3852_s12 }
   0xc   :  { %3878 = sst [smem:[#allocation15_spill]] %s3854_s14 }
   0xd   :  { %3879 = sst [smem:[#allocation16_spill]] %s3862_s22 }
   0xe LB: > { %3880 = sst [smem:[#allocation3_spill]] %s3221_s3  ;;  %s3366_s28 = sadd.s32 4294967295, %s3221_s3   ;;  %s3221_s3 = sphi %s3360_s3, %s32_s3  }
   0xf   : > { %p2753_p0 = scmp.ge.s32.totalorder %s3221_s3, 1  ;;  %p701_p1 = scmp.lt.s32.totalorder %s3221_s3, 13 }
  0x11   : > { %p702_p2 = pnand %p2753_p0, %p701_p1 }
  0x12   : > { %p797_p3 = scmp.lt.s32.totalorder (!%p702_p2), %s3366_s28, 11  ;;  %p842_p4 = scmp.eq.s32.totalorder (!%p702_p2), %s3366_s28, 0 }
  0x13   : > { %705 = sbr.rel (%p702_p2) target bundleno = 3270 (0xcc6), region = 108  ;;  %s3881_s12 = sld [smem:[#allocation14_spill]] (!%p702_p2) }
  0x14   : > { %s3882_s14 = sld [smem:[#allocation15_spill]] (!%p702_p2)  ;;  %p2762_p5 = scmp.ne.s32.totalorder (!%p702_p2), %s3366_s28, 0 }
  0x1a   : > { %s3373_s29 = scalar_select %p797_p3, %s3366_s28, 11 }
  0x1b   : > { %845 = sbr.rel (%p2762_p5) target bundleno = 36 (0x24), region = 112  ;;  %s3883_s2 = sld [smem:[#allocation4_spill]] (!%p2762_p5)  ;;  %vm848_vm0 = vcmask (!%p2762_p5), 261120   ;;  %vm850_vm1 = vcmask (!%p2762_p5), 254976  }
  0x1c   : > { %s2818_s24 = sshll.u32 %s3373_s29, 4  ;;  %s821_s7 = scalar_lea.vmem %s3856_s16, %s3373_s29 }
  0x1d   : > { %s3391_s30 = scalar_lea.vmem %s3881_s12, %s2818_s24  ;;  %s3396_s22 = scalar_lea.vmem %s3882_s14, %s2818_s24 }
  0x1e   : > { %s824_s26 = scalar_lea.vmem %s3857_s17, %s3373_s29  ;;  %s3413_s12 = scalar_lea.vmem %s3858_s18, %s2818_s24 }
  0x1f   : > { %s832_s14 = scalar_lea.vmem %s3859_s19, %s3373_s29  ;;  %s2821_s9 = sshll.u32 %s3373_s29, 6 }
  0x20   : > { %s3423_s23 = scalar_lea.vmem %s3860_s20, %s2821_s9  ;;  %s840_s6 = scalar_lea.vmem %s3861_s21, %s3373_s29 }
  0x21   : > { %v846_v0 = vld [vmem:[%s3883_s2] sm:$0xff] (!%p2762_p5)  ;;  %v847_v1 = vld [vmem:[%s3883_s2 + $0x8] sm:$0x3] (!%p2762_p5) }
  0x22   : > { %849 = vst.msk [vmem:[#allocation2] sm:$0xff] %vm848_vm0, %v846_v0 }
  0x23   : > { %851 = vst.msk [vmem:[#allocation2 + $0x8] sm:$0x3] %vm850_vm1, %v847_v1 }
  0x24 PF: > { %vm856_vm2 = vcmask 261120   ;;  %vm860_vm3 = vcmask 254976   ;;  %v3133_v16 = vld [vmem:[%s3391_s30] sm:$0xff]   ;;  %v3223_v17 = vmov 0.0   ;;  %v3134_v18 = vld [vmem:[%s3391_s30 + $0x8] sm:$0xff]   ;;  %vm3224_vm4 = vmmov 0   ;;  %s3884_s4 = scalar_lea.vmem %s3850_s10, %s3373_s29  ;;  %s3885_s5 = scalar_lea.vmem %s3851_s11, %s3373_s29 }
  0x25   : > { %2886 = vmatprep.subr.bf16.mxu0 %v3223_v17  ;;  %2910 = vmatprep.subr.bf16.mxu1 %v3223_v17  ;;  %v2763_v27 = vld [vmem:[%s3884_s4] ss:$0 sm:$0xff]  ;;  %s3886_s24 = sld [smem:[#allocation7_spill]]  ;;  %v3225_v38 = vmov 0   ;;  %s3887_s9 = sld [smem:[#allocation8_spill]]  ;;  %vm1106_vm5 = vcmask 64512  }
  0x26   : > { %2887 = vmatpush3.bf16.msra.mxu0 %v3133_v16  ;;  %2890 = vmatprep.mubr.msk.bf16.mxu0 %vm3224_vm4, %v3223_v17  ;;  %v2764_v31 = vld [vmem:[%s3885_s5] ss:$0 sm:$0xff]  ;;  %s3888_s8 = scalar_lea.vmem %s3853_s13, %s3373_s29  ;;  %s3226_s0 = smov 96   ;;  %vm1253_vm6 = vcmask 1040384   ;;  %vm1154_vm11 = vcmask 80896   ;;  %vm1158_vm12 = vcmask 74752  }
  0x27   : > { %2888 = vmatprep.subr.bf16.mxu0 %v3223_v17  ;;  %2912 = vmatprep.mubr.msk.bf16.mxu1 %vm3224_vm4, %v3223_v17  ;;  %v2766_v41 = vld [vmem:[%s3888_s8] ss:$0 sm:$0xff]  ;;  %s3227_s5 = smov 88   ;;  %s3228_s1 = smov 112   ;;  %vm1209_vm13 = vcmask 15360   ;;  %vm1213_vm14 = vcmask 9216  }
  0x28   : > { %3116 = vset.pattern.permute.xlu1 %v3225_v38  ;;  %3117 = vset.pattern.permute.xlu0 %v3225_v38  ;;  %s3229_s25 = smov 72   ;;  %s3231_s27 = smov 80   ;;  %vm1303_vm15 = vcmask 1044480   ;;  %vm2102_vm0 = vcmask 130048   ;;  %vm2105_vm1 = vcmask 195584  }
  0x29   : > { %s3232_s3 = smov 104   ;;  %s3889_s4 = sld [smem:[#allocation5_spill]] }
  0x2a   : > { %v853_v3 = vld [vmem:[#allocation2 + $0x8] sm:$0x3]  ;;  %2889 = vmatpush3.bf16.msra.mxu0 %v3134_v18  ;;  %s3233_s8 = smov 64   ;;  %s3891_s30 = sld [smem:[#allocation9_spill]] }
  0x2b   : > { %v852_v2 = vld [vmem:[#allocation2] sm:$0xff]  ;;  %v861_v5 = vsel %vm860_vm3, %v853_v3, 0.0  ;;  %2894 = vmatprep.subr.bf16.mxu0 %v3223_v17  ;;  %p2810_p6 = scmp.ne.s32.totalorder %s3366_s28, 11 }
  0x2c   : > { %v857_v4 = vsel %vm856_vm2, %v852_v2, 0.0  ;;  %v996_v36 = vld [vmem:[%s3886_s24] sm:$0x3]  ;;  %s3230_s24 = smov 120  }
  0x2d   : > { %858 = vadd.xlane.f32.xlu0 %v857_v4  ;;  %v997_v37 = vpack.c.bf16 %v996_v36, %v996_v36  ;;  %v1041_v39 = vld [vmem:[%s3887_s9] sm:$0x3] }
  0x2e   : > { %v1042_v40 = vpack.c.bf16 %v1041_v39, %v1041_v39 }
  0x2f   : > { %v901_v58 = vld [vmem:[%s3889_s4] sm:$0xff]  ;;  %v902_v59 = vld [vmem:[%s3889_s4 + $0x8] sm:$0x3] }
  0x31   : > { %862 = vadd.xlane.f32.xlu0 %v861_v5 }
  0xba   : > { %v859_v6 = vpop.xlane.xlu0 %858 }
  0xbb   : > { %v865_v7 = vmul.f32 0.03125, %v859_v6 }
  0xbd   : > { %v867_v8 = vsub.f32 %v852_v2, %v865_v7 }
  0xbe   : > { %v863_v9 = vpop.xlane.xlu0 %862 }
  0xbf   : > { %v866_v10 = vmul.f32 0.03125, %v863_v9  ;;  %v869_v11 = vmul.f32 %v867_v8, %v867_v8 }
  0xc1   : > { %v868_v12 = vsub.f32 %v853_v3, %v866_v10  ;;  %v871_v13 = vsel %vm856_vm2, %v869_v11, 0.0 }
  0xc2   : > { %872 = vadd.xlane.f32.xlu1 %v871_v13 }
  0xc3   : > { %v870_v14 = vmul.f32 %v868_v12, %v868_v12 }
  0xc5   : > { %v874_v15 = vsel %vm860_vm3, %v870_v14, 0.0 }
  0xc6   : > { %875 = vadd.xlane.f32.xlu1 %v874_v15 }
 0x14f   : > { %v873_v19 = vpop.xlane.xlu1 %872 }
 0x150   : > { %v877_v20 = vmul.f32 0.03125, %v873_v19 }
 0x152   : > { %v879_v21 = vadd.f32 1e-05, %v877_v20 }
 0x153   : > { %v876_v22 = vpop.xlane.xlu1 %875 }
 0x154   : > { %3147 = vrsqrt.f32 %v879_v21  ;;  %v878_v23 = vmul.f32 0.03125, %v876_v22 }
 0x156   : > { %v880_v24 = vadd.f32 1e-05, %v878_v23 }
 0x158   : > { %3149 = vrsqrt.f32 %v880_v24 }
 0x15e   : > { %v3148_v25 = vpop.eup %3147 }
 0x15f   : > { %v883_v26 = vmul.f32 %v3148_v25, %v867_v8 }
 0x161   : > { %v891_v30 = vmul.f32 %v2763_v27, %v883_v26  ;;  %v2772_v26 = vld [vmem:[%s3891_s30] ss:$0 sm:$0xff] }
 0x162   : > { %v3150_v28 = vpop.eup %3149 }
 0x163   : > { %v884_v29 = vmul.f32 %v3150_v28, %v868_v12  ;;  %v899_v33 = vadd.f32 %v2764_v31, %v891_v30  ;;  %v3235_v28 = vmov -1e+30  }
 0x165   : > { %v892_v32 = vmul.f32 %v2763_v27, %v884_v29 }
 0x167   : > { %v900_v34 = vadd.f32 %v2764_v31, %v892_v32 }
 0x169   : > { %v929_v35 = vpack.c.bf16 %v900_v34, %v899_v33 }
 0x16b   : > { %2891 = vmatmul.mubr.msk.bf16.vlgmr.msra.gmra.mrb[0].mxu0 %vm856_vm2, %v929_v35 }
 0x16c   : > { %2895 = vmatpush3.bf16.msra.mxu0 %v3133_v16  ;;  %2898 = vmatprep.mubr.msk.bf16.mxu0 %vm3224_vm4, %v3223_v17 }
 0x16d   : > { %2896 = vmatprep.subr.bf16.mxu0 %v3223_v17 }
 0x170   : > { %2897 = vmatpush3.bf16.msra.mxu0 %v3134_v18 }
 0x171   : > { %2902 = vmatprep.subr.bf16.mxu0 %v3223_v17 }
 0x173   : > { %2899 = vmatmul.mubr.msk.bf16.vlgmr.msra.gmra.mrb[4].mxu0 %vm856_vm2, %v997_v37 }
 0x174   : > { %2903 = vmatpush3.bf16.msra.mxu0 %v3133_v16  ;;  %2906 = vmatprep.mubr.msk.bf16.mxu0 %vm3224_vm4, %v3223_v17 }
 0x175   : > { %2904 = vmatprep.subr.bf16.mxu0 %v3223_v17 }
 0x178   : > { %2905 = vmatpush3.bf16.msra.mxu0 %v3134_v18 }
 0x179   : > { %2916 = vmatprep.subr.bf16.mxu0 %v3223_v17 }
 0x17b   : > { %2907 = vmatmul.mubr.msk.bf16.vlgmr.msra.gmra.mrb[8].mxu0 %vm856_vm2, %v1042_v40 }
 0x17c   : > { %2918 = vmatprep.mubr.msk.bf16.mxu0 %vm3224_vm4, %v3223_v17 }
 0x23e   : > { %v985_v42 = vpop.f32.mrb[0].mxu0 }
 0x23f   : > { %v986_v43 = vadd.f32 %v2766_v41, %v985_v42  ;;  %v2892_v44 = vpop.f32.mrb[1].mxu0 }
 0x240   : > { %v988_v45 = vpop.f32.mrb[2].mxu0 }
 0x241   : > { %v989_v46 = vadd.f32 %v2766_v41, %v988_v45  ;;  %v2893_v47 = vpop.f32.mrb[3].mxu0  ;;  %v992_v48 = vmul.f32 0.35355338, %v986_v43 }
 0x243   : > { %v993_v49 = vmul.f32 0.35355338, %v989_v46  ;;  %v3484_v50 = vpack.c.bf16 %v989_v46, %v986_v43 }
 0x245   : > { %v994_v51 = vpack.c.bf16 %v993_v49, %v992_v48  ;;  %1104 = vrot.lane.b32.xlu0 %v3484_v50, %s3226_s0 }
 0x246   : > { %v1035_v52 = vpop.f32.mrb[4].mxu0 }
 0x247   : > { %v1036_v53 = vadd.f32 %v2766_v41, %v1035_v52  ;;  %v2900_v54 = vpop.f32.mrb[5].mxu0 }
 0x248   : > { %v1038_v55 = vpop.f32.mrb[6].mxu0 }
 0x249   : > { %v1086_v56 = vpack.c.bf16 %v1036_v53, %v1036_v53  ;;  %v2901_v57 = vpop.f32.mrb[7].mxu0 }
 0x24b   : > { %1410 = vrot.lane.b32.xlu0 %v1086_v56, %s3227_s5  ;;  %1163 = vrot.lane.b32.xlu1 %v1086_v56, %s3226_s0  ;;  %s3236_s0 = smov 48  }
 0x24e   : > { %v1080_v0 = vpop.f32.mrb[8].mxu0 }
 0x24f   : > { %1594 = vrot.lane.b32.xlu0 %v994_v51, %s3228_s1  ;;  %1355 = vrot.lane.b32.xlu1 %v3484_v50, %s3227_s5  ;;  %v1081_v1 = vadd.f32 %v2766_v41, %v1080_v0  ;;  %v2908_v2 = vpop.f32.mrb[9].mxu0  ;;  %s3234_s1 = smov 56   ;;  %s3237_s5 = smov 40  }
 0x250   : > { %v1083_v3 = vpop.f32.mrb[10].mxu0 }
 0x251   : > { %v3502_v4 = vpack.c.bf16 %v1081_v1, %v1081_v1  ;;  %v2909_v5 = vpop.f32.mrb[11].mxu0 }
 0x253   : > { %1837 = vrot.lane.b32.xlu0 %v3484_v50, %s3229_s25  ;;  %1353 = vrot.lane.b32.xlu1 %v994_v51, %s3230_s24  ;;  %s3240_s24 = smov 24  }
 0x257   : > { %1892 = vrot.lane.b32.xlu0 %v1086_v56, %s3229_s25  ;;  %1596 = vrot.lane.b32.xlu1 %v3484_v50, %s3231_s27  ;;  %s3239_s25 = smov 16  }
 0x25b   : > { %1651 = vrot.lane.b32.xlu1 %v1086_v56, %s3231_s27  ;;  %911 = vperm.xlu0 %3117, %v902_v59   ;;  %s3890_s27 = sld [smem:[#allocation6_spill]] }
 0x25f   : > { %1835 = vrot.lane.b32.xlu1 %v994_v51, %s3232_s3  ;;  %1248 = vrot.lane.b32.xlu0 %v3502_v4, %s3233_s8  ;;  %s3892_s3 = scalar_lea.vmem %s3855_s15, %s3373_s29 }
 0x261   : > { %v2765_v25 = vld [vmem:[%s3890_s27] ss:$0 sm:$0xff] }
 0x263   : > { %906 = vperm.xlu1 %3116, %v901_v58   ;;  %1492 = vrot.lane.b32.xlu0 %v3502_v4, %s3234_s1 }
 0x267   : > { %1298 = vrot.lane.b32.xlu1 %v3484_v50, %s3233_s8  ;;  %s1088_s8 = scalar_select %p842_p4, 0.0, -1e+30 }
 0x269   : > { %v1100_v30 = vstv %s1088_s8  ;;  %s3895_s8 = sld [smem:[#allocation11_spill]] (!%p2810_p6) }
 0x2b7   : > { %v1105_v60 = vpop.permute.xlu0 %1104 }
 0x2b8   : > { %v1111_v61 = vsel %vm1106_vm5, %v1105_v60, 0 }
 0x2b9   : > { %2911 = vmatpush3.bf16.xpose.msra.mxu1 %v1111_v61 }
 0x2ba   : > { %2922 = vmatprep.subr.bf16.mxu1 %v3223_v17 }
 0x2bd   : > { %v1164_v62 = vpop.permute.xlu1 %1163  ;;  %v1411_v8 = vpop.permute.xlu0 %1410 }
 0x2be   : > { %v1166_v63 = vsel %vm1106_vm5, %v1164_v62, 0  ;;  %v1413_v10 = vsel %vm1106_vm5, %v1411_v8, 0 }
 0x2bf   : > { %2917 = vmatpush3.bf16.xpose.msra.mxu0 %v1166_v63 }
 0x2c0   : > { %2913 = vmatmul.mubr.msk.bf16.vlgmr.msra.gmra.mrb[0].mxu1 %vm1106_vm5, %v994_v51  ;;  %2934 = vmatprep.subr.bf16.mxu0 %v3223_v17 }
 0x2c1   : > { %2924 = vmatprep.mubr.msk.bf16.mxu1 %vm3224_vm4, %v3223_v17  ;;  %v1356_v6 = vpop.permute.xlu1 %1355  ;;  %v1595_v14 = vpop.permute.xlu0 %1594 }
 0x2c2   : > { %v1361_v7 = vsel %vm1106_vm5, %v1356_v6, 0 }
 0x2c5   : > { %v1354_v9 = vpop.permute.xlu1 %1353  ;;  %v1838_v16 = vpop.permute.xlu0 %1837 }
 0x2c6   : > { %2919 = vmatmul.mubr.msk.bf16.vlgmr.msra.gmra.mrb[12].mxu0 %vm1106_vm5, %v994_v51  ;;  %v1843_v18 = vsel %vm1106_vm5, %v1838_v16, 0 }
 0x2c7   : > { %2935 = vmatpush3.bf16.xpose.msra.mxu0 %v1361_v7  ;;  %2936 = vmatprep.mubr.msk.bf16.mxu0 %vm3224_vm4, %v3223_v17 }
 0x2c8   : > { %2940 = vmatprep.subr.bf16.mxu0 %v3223_v17 }
 0x2c9   : > { %v1597_v11 = vpop.permute.xlu1 %1596  ;;  %v1893_v19 = vpop.permute.xlu0 %1892 }
 0x2ca   : > { %v1602_v12 = vsel %vm1106_vm5, %v1597_v11, 0  ;;  %v1895_v21 = vsel %vm1106_vm5, %v1893_v19, 0 }
 0x2cd   : > { %v1652_v13 = vpop.permute.xlu1 %1651 }
 0x2ce   : > { %2937 = vmatmul.mubr.msk.bf16.vlgmr.msra.gmra.mrb[16].mxu0 %vm1106_vm5, %v1354_v9  ;;  %v1654_v15 = vsel %vm1106_vm5, %v1652_v13, 0 }
 0x2cf   : > { %2941 = vmatpush3.bf16.xpose.msra.mxu0 %v1413_v10  ;;  %2942 = vmatprep.mubr.msk.bf16.mxu0 %vm3224_vm4, %v3223_v17 }
 0x2d0   : > { %2958 = vmatprep.subr.bf16.mxu0 %v3223_v17 }
 0x2d1   : > { %v1836_v20 = vpop.permute.xlu1 %1835 }
 0x2d6   : > { %2943 = vmatmul.mubr.msk.bf16.vlgmr.msra.gmra.mrb[20].mxu0 %vm1106_vm5, %v1354_v9 }
 0x2d7   : > { %2959 = vmatpush3.bf16.xpose.msra.mxu0 %v1602_v12  ;;  %2960 = vmatprep.mubr.msk.bf16.mxu0 %vm3224_vm4, %v3223_v17 }
 0x2d8   : > { %2964 = vmatprep.subr.bf16.mxu0 %v3223_v17 }
 0x2da   : > { %v912_v22 = vpop.permute.xlu0 %911 }
 0x2db   : > { %vm921_vm9 = vcmp.eq.f32.partialorder %v912_v22, %v2765_v25  ;;  %vm1097_vm10 = vcmp.eq.f32.partialorder %v912_v22, %v2772_v26 }
 0x2dc   : > { %v3554_v33 = vsel %vm921_vm9, 0.0, %v3235_v28  ;;  %v1099_v36 = vsel %vm1097_vm10, 0.0, %v3235_v28 }
 0x2dd   : > { %v3566_v42 = vadd.f32 %v1100_v30, %v1099_v36 }
 0x2de   : > { %2961 = vmatmul.mubr.msk.bf16.vlgmr.msra.gmra.mrb[24].mxu0 %vm1106_vm5, %v1595_v14  ;;  %v1249_v23 = vpop.permute.xlu0 %1248 }
 0x2df   : > { %2965 = vmatpush3.bf16.xpose.msra.mxu0 %v1654_v15  ;;  %2966 = vmatprep.mubr.msk.bf16.mxu0 %vm3224_vm4, %v3223_v17  ;;  %v1255_v24 = vsel %vm1253_vm6, %v1249_v23, 0 }
 0x2e0   : > { %2982 = vmatprep.subr.bf16.mxu0 %v3223_v17  ;;  %2923 = vmatpush3.bf16.msra.mxu1 %v1255_v24 }
 0x2e1   : > { %2928 = vmatprep.subr.bf16.mxu1 %v3223_v17 }
 0x2e2   : > { %v907_v27 = vpop.permute.xlu1 %906 }
 0x2e3   : > { %vm920_vm7 = vcmp.eq.f32.partialorder %v907_v27, %v2765_v25  ;;  %vm1096_vm8 = vcmp.eq.f32.partialorder %v907_v27, %v2772_v26 }
 0x2e4   : > { %v3552_v29 = vsel %vm920_vm7, 0.0, %v3235_v28  ;;  %v1098_v31 = vsel %vm1096_vm8, 0.0, %v3235_v28  ;;  %vm3243_vm7 = vmmov (!%p2810_p6), 0  }
 0x2e5   : > { %v3559_v38 = vadd.f32 %v1100_v30, %v1098_v31 }
 0x2e6   : > { %2967 = vmatmul.mubr.msk.bf16.vlgmr.msra.gmra.mrb[28].mxu0 %vm1106_vm5, %v1595_v14 }
 0x2e7   : > { %2983 = vmatpush3.bf16.xpose.msra.mxu0 %v1843_v18  ;;  %2984 = vmatprep.mubr.msk.bf16.mxu0 %vm3224_vm4, %v3223_v17 }
 0x2e8   : > { %2988 = vmatprep.subr.bf16.mxu0 %v3223_v17 }
 0x2ee   : > { %2985 = vmatmul.mubr.msk.bf16.vlgmr.msra.gmra.mrb[32].mxu0 %vm1106_vm5, %v1836_v20 }
 0x2ef   : > { %2989 = vmatpush3.bf16.xpose.msra.mxu0 %v1895_v21  ;;  %2990 = vmatprep.mubr.msk.bf16.mxu0 %vm3224_vm4, %v3223_v17 }
 0x2f0   : > { %3006 = vmatprep.subr.bf16.mxu0 %v3223_v17 }
 0x2f6   : > { %2991 = vmatmul.mubr.msk.bf16.vlgmr.msra.gmra.mrb[36].mxu0 %vm1106_vm5, %v1836_v20 }
 0x2f7   : > { %3010 = vmatprep.mubr.msk.bf16.mxu0 %vm3224_vm4, %v3223_v17 }
 0x393   : > { %v1147_v32 = vpop.f32.mrb[0].mxu1 }
 0x394   : > { %v3557_v34 = vadd.f32 %v1147_v32, %v3552_v29  ;;  %v2914_v35 = vpop.f32.mrb[1].mxu1 }
 0x395   : > { %v1150_v37 = vpop.f32.mrb[2].mxu1 }
 0x396   : > { %v3562_v39 = vadd.f32 %v1150_v37, %v3554_v33  ;;  %v2915_v40 = vpop.f32.mrb[3].mxu1  ;;  %v1155_v41 = vsel %vm1154_vm11, %v3557_v34, -inf }
 0x397   : > { %1156 = vmax.xlane.f32.xlu1 %v1155_v41  ;;  %v1493_v41 = vpop.permute.xlu0 %1492 }
 0x398   : > { %v1159_v43 = vsel %vm1158_vm12, %v3562_v39, -inf }
 0x399   : > { %1160 = vmax.xlane.f32.xlu0 %v1159_v43  ;;  %v1202_v44 = vpop.f32.mrb[12].mxu0 }
 0x39a   : > { %v3571_v45 = vadd.f32 %v1202_v44, %v3559_v38  ;;  %v2920_v46 = vpop.f32.mrb[13].mxu0 }
 0x39b   : > { %v1205_v47 = vpop.f32.mrb[14].mxu0 }
 0x39c   : > { %v3574_v48 = vadd.f32 %v1205_v47, %v3566_v42  ;;  %v2921_v49 = vpop.f32.mrb[15].mxu0  ;;  %v1210_v51 = vsel %vm1209_vm13, %v3571_v45, -inf }
 0x39d   : > { %1211 = vmax.xlane.f32.xlu0 %v1210_v51 }
 0x39e   : > { %v1214_v52 = vsel %vm1213_vm14, %v3574_v48, -inf }
 0x39f   : > { %1215 = vmax.xlane.f32.xlu1 %v1214_v52 }
 0x3a1   : > { %v1397_v53 = vpop.f32.mrb[16].mxu0 }
 0x3a2   : > { %v3581_v54 = vadd.f32 %v1397_v53, %v3552_v29  ;;  %v2938_v55 = vpop.f32.mrb[17].mxu0 }
 0x3a3   : > { %v1400_v56 = vpop.f32.mrb[18].mxu0 }
 0x3a4   : > { %v3584_v57 = vadd.f32 %v1400_v56, %v3554_v33  ;;  %v2939_v58 = vpop.f32.mrb[19].mxu0  ;;  %v1404_v59 = vsel %vm1154_vm11, %v3581_v54, -inf }
 0x3a5   : > { %1405 = vmax.xlane.f32.xlu0 %v1404_v59 }
 0x3a6   : > { %v1407_v60 = vsel %vm1158_vm12, %v3584_v57, -inf }
 0x3a7   : > { %1408 = vmax.xlane.f32.xlu1 %v1407_v60 }
 0x3a9   : > { %v1449_v61 = vpop.f32.mrb[20].mxu0 }
 0x3aa   : > { %v3591_v62 = vadd.f32 %v1449_v61, %v3559_v38  ;;  %v2944_v63 = vpop.f32.mrb[21].mxu0 }
 0x3ab   : > { %v1452_v0 = vpop.f32.mrb[22].mxu0 }
 0x3ac   : > { %v3594_v1 = vadd.f32 %v1452_v0, %v3566_v42  ;;  %v2945_v2 = vpop.f32.mrb[23].mxu0  ;;  %v1456_v3 = vsel %vm1209_vm13, %v3591_v62, -inf }
 0x3ad   : > { %1457 = vmax.xlane.f32.xlu0 %v1456_v3 }
 0x3ae   : > { %v1459_v5 = vsel %vm1213_vm14, %v3594_v1, -inf }
 0x3af   : > { %1460 = vmax.xlane.f32.xlu1 %v1459_v5 }
 0x3b1   : > { %v1638_v6 = vpop.f32.mrb[24].mxu0 }
 0x3b2   : > { %v3601_v7 = vadd.f32 %v1638_v6, %v3552_v29  ;;  %v2962_v8 = vpop.f32.mrb[25].mxu0 }
 0x3b3   : > { %v1641_v9 = vpop.f32.mrb[26].mxu0 }
 0x3b4   : > { %v3604_v10 = vadd.f32 %v1641_v9, %v3554_v33  ;;  %v2963_v11 = vpop.f32.mrb[27].mxu0  ;;  %v1645_v12 = vsel %vm1154_vm11, %v3601_v7, -inf }
 0x3b5   : > { %1646 = vmax.xlane.f32.xlu1 %v1645_v12 }
 0x3b6   : > { %v1648_v13 = vsel %vm1158_vm12, %v3604_v10, -inf }
 0x3b9   : > { %1649 = vmax.xlane.f32.xlu1 %v1648_v13  ;;  %v1690_v14 = vpop.f32.mrb[28].mxu0 }
 0x3ba   : > { %v3611_v15 = vadd.f32 %v1690_v14, %v3559_v38  ;;  %v2968_v16 = vpop.f32.mrb[29].mxu0 }
 0x3bb   : > { %v1693_v18 = vpop.f32.mrb[30].mxu0 }
 0x3bc   : > { %v3614_v19 = vadd.f32 %v1693_v18, %v3566_v42  ;;  %v2969_v20 = vpop.f32.mrb[31].mxu0  ;;  %v1697_v21 = vsel %vm1209_vm13, %v3611_v15, -inf }
 0x3bd   : > { %1698 = vmax.xlane.f32.xlu1 %v1697_v21 }
 0x3be   : > { %v1700_v22 = vsel %vm1213_vm14, %v3614_v19, -inf }
 0x3c1   : > { %1701 = vmax.xlane.f32.xlu1 %v1700_v22  ;;  %v1879_v23 = vpop.f32.mrb[32].mxu0 }
 0x3c2   : > { %v3621_v24 = vadd.f32 %v1879_v23, %v3552_v29  ;;  %v2986_v25 = vpop.f32.mrb[33].mxu0 }
 0x3c3   : > { %1541 = vrot.lane.b32.xlu0 %v3484_v50, %s3234_s1  ;;  %v1882_v26 = vpop.f32.mrb[34].mxu0  ;;  %s3238_s1 = smov 8  }
 0x3c4   : > { %v3626_v27 = vadd.f32 %v1882_v26, %v3554_v33  ;;  %v2987_v28 = vpop.f32.mrb[35].mxu0  ;;  %v1886_v37 = vsel %vm1154_vm11, %v3621_v24, -inf }
 0x3c6   : > { %v1889_v40 = vsel %vm1158_vm12, %v3626_v27, -inf }
 0x3c9   : > { %v1931_v30 = vpop.f32.mrb[36].mxu0 }
 0x3ca   : > { %v3629_v31 = vadd.f32 %v1931_v30, %v3559_v38  ;;  %v2992_v32 = vpop.f32.mrb[37].mxu0  ;;  %v1498_v30 = vsel %vm1253_vm6, %v1493_v41, 0 }
 0x3cb   : > { %v1934_v35 = vpop.f32.mrb[38].mxu0 }
 0x3cc   : > { %v3632_v36 = vadd.f32 %v1934_v35, %v3566_v42  ;;  %v2993_v29 = vpop.f32.mrb[39].mxu0  ;;  %v1938_v33 = vsel %vm1209_vm13, %v3629_v31, -inf  ;;  %v1299_v42 = vpop.permute.xlu1 %1298 }
 0x3ce   : > { %v1941_v38 = vsel %vm1213_vm14, %v3632_v36, -inf }
 0x3d2   : > { %1733 = vrot.lane.b32.xlu1 %v3502_v4, %s3236_s0 }
 0x3e2   : > { %1887 = vmax.xlane.f32.xlu0 %v1886_v37 }
 0x3e6   : > { %1939 = vmax.xlane.f32.xlu0 %v1938_v33 }
 0x3ea   : > { %1942 = vmax.xlane.f32.xlu0 %v1941_v38 }
 0x3f6   : > { %1890 = vmax.xlane.f32.xlu1 %v1889_v40 }
 0x400   : > { %1974 = vrot.lane.b32.xlu0 %v3502_v4, %s3237_s5 }
 0x407   : > { %1782 = vrot.lane.b32.xlu1 %v3484_v50, %s3236_s0  ;;  %s3893_s0 = sld [smem:[#allocation10_spill]] (!%p2810_p6) }
 0x40b   : > { %2023 = vrot.lane.b32.xlu1 %v3484_v50, %s3237_s5 }
 0x424   : > { %v1157_v44 = vpop.xlane.xlu1 %1156 }
 0x426   : > { %v1161_v43 = vpop.xlane.xlu0 %1160 }
 0x42a   : > { %v1212_v46 = vpop.xlane.xlu0 %1211 }
 0x42b   : > { %v1217_v47 = vmax.f32 %v1157_v44, %v1212_v46 }
 0x42c   : > { %v1216_v49 = vpop.xlane.xlu1 %1215 }
 0x42d   : > { %v1232_v51 = vsub.f32 %v3571_v45, %v1217_v47  ;;  %v1218_v52 = vmax.f32 %v1161_v43, %v1216_v49  ;;  %v1219_v50 = vsub.f32 %v3557_v34, %v1217_v47 }
 0x42f   : > { %v1233_v53 = vsub.f32 %v3574_v48, %v1218_v52  ;;  %v1234_v55 = vmul.f32 1.442695, %v1232_v51  ;;  %v1220_v4 = vsub.f32 %v3562_v39, %v1218_v52  ;;  %v1221_v0 = vmul.f32 1.442695, %v1219_v50 }
 0x431   : > { %v1236_v56 = vmul.f32 1.442695, %v1233_v53  ;;  %v1223_v60 = vmul.f32 1.442695, %v1220_v4 }
 0x432   : > { %v1406_v58 = vpop.xlane.xlu0 %1405 }
 0x433   : > { %3151 = vpow2.f32 %v1236_v56 }
 0x434   : > { %3153 = vpow2.f32 %v1234_v55  ;;  %v1409_v59 = vpop.xlane.xlu1 %1408 }
 0x435   : > { %3155 = vpow2.f32 %v1223_v60 }
 0x436   : > { %3157 = vpow2.f32 %v1221_v0 }
 0x43a   : > { %v1458_v61 = vpop.xlane.xlu0 %1457 }
 0x43b   : > { %v1462_v63 = vmax.f32 %v1406_v58, %v1458_v61 }
 0x43c   : > { %v1461_v2 = vpop.xlane.xlu1 %1460 }
 0x43d   : > { %v1464_v45 = vsub.f32 %v3581_v54, %v1462_v63  ;;  %v1477_v3 = vsub.f32 %v3591_v62, %v1462_v63  ;;  %v1463_v48 = vmax.f32 %v1409_v59, %v1461_v2  ;;  %v3652_v5 = vpop.eup %3151  ;;  %v1305_v62 = vsel %vm1303_vm15, %v1299_v42, 0 }
 0x43e   : > { %v3654_v6 = vpop.eup %3153  ;;  %v1542_v41 = vpop.permute.xlu0 %1541 }
 0x43f   : > { %v1466_v39 = vmul.f32 1.442695, %v1464_v45  ;;  %v1479_v8 = vmul.f32 1.442695, %v1477_v3  ;;  %v1465_v34 = vsub.f32 %v3584_v57, %v1463_v48  ;;  %v1478_v9 = vsub.f32 %v3594_v1, %v1463_v48  ;;  %v3665_v1 = vpop.eup %3155 }
 0x440   : > { %v1246_v11 = vpack.c.bf16 %v3652_v5, %v3654_v6  ;;  %v3667_v14 = vpop.eup %3157  ;;  %v1547_v47 = vsel %vm1303_vm15, %v1542_v41, 0 }
 0x441   : > { %3159 = vpow2.f32 %v1466_v39  ;;  %v1468_v54 = vmul.f32 1.442695, %v1465_v34  ;;  %v1481_v13 = vmul.f32 1.442695, %v1478_v9  ;;  %v1231_v22 = vpack.c.bf16 %v3665_v1, %v3667_v14 }
 0x442   : > { %3161 = vpow2.f32 %v1479_v8  ;;  %2925 = vmatmul.mubr.msk.bf16.vlgmr.msra.gmra.mrb[4].mxu1 %vm1209_vm13, %v1246_v11  ;;  %v1647_v12 = vpop.xlane.xlu1 %1646 }
 0x443   : > { %3163 = vpow2.f32 %v1468_v54  ;;  %2929 = vmatpush3.bf16.msra.mxu1 %v1305_v62  ;;  %2930 = vmatprep.mubr.msk.bf16.mxu1 %vm3224_vm4, %v3223_v17 }
 0x444   : > { %2946 = vmatprep.subr.bf16.mxu1 %v3223_v17  ;;  %3165 = vpow2.f32 %v1481_v13 }
 0x446   : > { %v1650_v57 = vpop.xlane.xlu1 %1649 }
 0x44a   : > { %v1699_v16 = vpop.xlane.xlu1 %1698 }
 0x44b   : > { %v3160_v18 = vpop.eup %3159  ;;  %v1703_v20 = vmax.f32 %v1647_v12, %v1699_v16 }
 0x44c   : > { %v3162_v21 = vpop.eup %3161  ;;  %v1470_v23 = vsel %vm1154_vm11, %v3160_v18, 0.0 }
 0x44d   : > { %v3164_v25 = vpop.eup %3163  ;;  %v1705_v26 = vsub.f32 %v3601_v7, %v1703_v20  ;;  %v1718_v28 = vsub.f32 %v3611_v15, %v1703_v20  ;;  %1471 = vadd.xlane.f32.xlu0 %v1470_v23  ;;  %v1483_v38 = vsel %vm1209_vm13, %v3162_v21, 0.0  ;;  %v1238_v20 = vsel %vm1209_vm13, %v3654_v6, 0.0 }
 0x44e   : > { %2931 = vmatmul.mubr.msk.bf16.vlgmr.msra.gmra.mrb[4].mxu1 %vm1154_vm11, %v1231_v22  ;;  %v1702_v32 = vpop.xlane.xlu1 %1701  ;;  %v1473_v35 = vsel %vm1158_vm12, %v3164_v25, 0.0  ;;  %v3166_v7 = vpop.eup %3165  ;;  %v1476_v53 = vpack.c.bf16 %v3164_v25, %v3160_v18  ;;  %v1228_v6 = vsel %vm1158_vm12, %v3665_v1, 0.0 }
 0x44f   : > { %v1707_v29 = vmul.f32 1.442695, %v1705_v26  ;;  %v1720_v37 = vmul.f32 1.442695, %v1718_v28  ;;  %2947 = vmatpush3.bf16.msra.mxu1 %v1498_v30  ;;  %v1704_v33 = vmax.f32 %v1650_v57, %v1702_v32  ;;  %1474 = vadd.xlane.f32.xlu1 %v1473_v35  ;;  %v1491_v44 = vpack.c.bf16 %v3166_v7, %v3162_v21 }
 0x450   : > { %2948 = vmatprep.mubr.msk.bf16.mxu1 %vm3224_vm4, %v3223_v17  ;;  %2952 = vmatprep.subr.bf16.mxu1 %v3223_v17  ;;  %v1486_v46 = vsel %vm1213_vm14, %v3166_v7, 0.0  ;;  %v1241_v30 = vsel %vm1213_vm14, %v3652_v5, 0.0 }
 0x451   : > { %3167 = vpow2.f32 %v1707_v29  ;;  %v1706_v15 = vsub.f32 %v3604_v10, %v1704_v33  ;;  %v1719_v40 = vsub.f32 %v3614_v19, %v1704_v33  ;;  %1484 = vadd.xlane.f32.xlu0 %v1483_v38 }
 0x452   : > { %3169 = vpow2.f32 %v1720_v37  ;;  %v1734_v52 = vpop.permute.xlu1 %1733 }
 0x453   : > { %v1709_v42 = vmul.f32 1.442695, %v1706_v15  ;;  %v1722_v43 = vmul.f32 1.442695, %v1719_v40  ;;  %v1739_v58 = vsel %vm1253_vm6, %v1734_v52, 0 }
 0x455   : > { %3171 = vpow2.f32 %v1709_v42  ;;  %1487 = vadd.xlane.f32.xlu0 %v1486_v46 }
 0x456   : > { %2949 = vmatmul.mubr.msk.bf16.vlgmr.msra.gmra.mrb[8].mxu1 %vm1209_vm13, %v1491_v44  ;;  %3173 = vpow2.f32 %v1722_v43 }
 0x457   : > { %2953 = vmatpush3.bf16.msra.mxu1 %v1547_v47  ;;  %2954 = vmatprep.mubr.msk.bf16.mxu1 %vm3224_vm4, %v3223_v17 }
 0x458   : > { %2970 = vmatprep.subr.bf16.mxu1 %v3223_v17 }
 0x45b   : > { %v3168_v10 = vpop.eup %3167 }
 0x45c   : > { %v1711_v19 = vsel %vm1154_vm11, %v3168_v10, 0.0  ;;  %v3170_v49 = vpop.eup %3169 }
 0x45d   : > { %1712 = vadd.xlane.f32.xlu0 %v1711_v19  ;;  %v1724_v56 = vsel %vm1209_vm13, %v3170_v49, 0.0 }
 0x45f   : > { %v3172_v51 = vpop.eup %3171 }
 0x460   : > { %v1714_v55 = vsel %vm1158_vm12, %v3172_v51, 0.0  ;;  %v3174_v4 = vpop.eup %3173  ;;  %v1717_v18 = vpack.c.bf16 %v3172_v51, %v3168_v10 }
 0x461   : > { %1715 = vadd.xlane.f32.xlu1 %v1714_v55  ;;  %1725 = vadd.xlane.f32.xlu0 %v1724_v56  ;;  %v1727_v50 = vsel %vm1213_vm14, %v3174_v4, 0.0  ;;  %v1732_v59 = vpack.c.bf16 %v3174_v4, %v3170_v49 }
 0x462   : > { %2955 = vmatmul.mubr.msk.bf16.vlgmr.msra.gmra.mrb[8].mxu1 %vm1154_vm11, %v1476_v53 }
 0x463   : > { %2971 = vmatpush3.bf16.msra.mxu1 %v1739_v58  ;;  %2972 = vmatprep.mubr.msk.bf16.mxu1 %vm3224_vm4, %v3223_v17  ;;  %v3135_v58 = vld [vmem:[%s3396_s22] sm:$0xff]  }
 0x464   : > { %2976 = vmatprep.subr.bf16.mxu1 %v3223_v17  ;;  %3007 = vmatpush3.bf16.msra.mxu0 %v3135_v58 }
 0x465   : > { %1728 = vadd.xlane.f32.xlu1 %v1727_v50  ;;  %3008 = vmatprep.subr.bf16.mxu0 %v3223_v17 }
 0x46a   : > { %2973 = vmatmul.mubr.msk.bf16.vlgmr.msra.gmra.mrb[12].mxu1 %vm1209_vm13, %v1732_v59 }
 0x46b   : > { %2978 = vmatprep.mubr.msk.bf16.mxu1 %vm3224_vm4, %v3223_v17 }
 0x46f   : > { %v1888_v60 = vpop.xlane.xlu0 %1887 }
 0x473   : > { %v1940_v61 = vpop.xlane.xlu0 %1939 }
 0x474   : > { %v1944_v63 = vmax.f32 %v1888_v60, %v1940_v61 }
 0x476   : > { %v1946_v0 = vsub.f32 %v3621_v24, %v1944_v63  ;;  %v1959_v2 = vsub.f32 %v3629_v31, %v1944_v63 }
 0x477   : > { %v1943_v48 = vpop.xlane.xlu0 %1942 }
 0x478   : > { %v1948_v45 = vmul.f32 1.442695, %v1946_v0  ;;  %v1961_v3 = vmul.f32 1.442695, %v1959_v2 }
 0x47a   : > { %3175 = vpow2.f32 %v1948_v45 }
 0x47b   : > { %3177 = vpow2.f32 %v1961_v3  ;;  %v1975_v57 = vpop.permute.xlu0 %1974 }
 0x483   : > { %v1891_v39 = vpop.xlane.xlu1 %1890 }
 0x484   : > { %v3176_v8 = vpop.eup %3175  ;;  %v1945_v34 = vmax.f32 %v1891_v39, %v1943_v48 }
 0x485   : > { %v1952_v9 = vsel %vm1154_vm11, %v3176_v8, 0.0  ;;  %v3178_v11 = vpop.eup %3177 }
 0x486   : > { %v1947_v54 = vsub.f32 %v3626_v27, %v1945_v34  ;;  %v1960_v62 = vsub.f32 %v3632_v36, %v1945_v34  ;;  %1953 = vadd.xlane.f32.xlu0 %v1952_v9  ;;  %v1965_v16 = vsel %vm1209_vm13, %v3178_v11, 0.0  ;;  %v1980_v27 = vsel %vm1253_vm6, %v1975_v57, 0 }
 0x487   : > { %v1783_v12 = vpop.permute.xlu1 %1782  ;;  %v1225_v36 = vsel %vm1154_vm11, %v3667_v14, 0.0 }
 0x488   : > { %v1950_v24 = vmul.f32 1.442695, %v1947_v54  ;;  %v1963_v13 = vmul.f32 1.442695, %v1960_v62  ;;  %v1788_v31 = vsel %vm1303_vm15, %v1783_v12, 0  ;;  %v3136_v54 = vld [vmem:[%s3396_s22 + $0x8] sm:$0xff]  }
 0x489   : > { %2977 = vmatpush3.bf16.msra.mxu1 %v1788_v31  ;;  %3009 = vmatpush3.bf16.msra.mxu0 %v3136_v54 }
 0x48a   : > { %3179 = vpow2.f32 %v1950_v24  ;;  %1966 = vadd.xlane.f32.xlu0 %v1965_v16  ;;  %2994 = vmatprep.subr.bf16.mxu1 %v3223_v17 }
 0x48b   : > { %3181 = vpow2.f32 %v1963_v13  ;;  %v2024_v23 = vpop.permute.xlu1 %2023  ;;  %3014 = vmatprep.subr.bf16.mxu0 %v3223_v17 }
 0x48c   : > { %2979 = vmatmul.mubr.msk.bf16.vlgmr.msra.gmra.mrb[12].mxu1 %vm1154_vm11, %v1717_v18  ;;  %v2029_v28 = vsel %vm1303_vm15, %v2024_v23, 0 }
 0x48d   : > { %2995 = vmatpush3.bf16.msra.mxu1 %v1980_v27  ;;  %2996 = vmatprep.mubr.msk.bf16.mxu1 %vm3224_vm4, %v3223_v17 }
 0x48e   : > { %1226 = vadd.xlane.f32.xlu0 %v1225_v36  ;;  %3000 = vmatprep.subr.bf16.mxu1 %v3223_v17 }
 0x492   : > { %1239 = vadd.xlane.f32.xlu0 %v1238_v20 }
 0x494   : > { %v3180_v21 = vpop.eup %3179 }
 0x495   : > { %v3182_v22 = vpop.eup %3181  ;;  %v1955_v25 = vsel %vm1158_vm12, %v3180_v21, 0.0  ;;  %v1958_v32 = vpack.c.bf16 %v3180_v21, %v3176_v8 }
 0x496   : > { %1956 = vadd.xlane.f32.xlu1 %v1955_v25  ;;  %v1973_v26 = vpack.c.bf16 %v3182_v22, %v3178_v11  ;;  %v1968_v14 = vsel %vm1213_vm14, %v3182_v22, 0.0 }
 0x498   : > { %2997 = vmatmul.mubr.msk.bf16.vlgmr.msra.gmra.mrb[16].mxu1 %vm1209_vm13, %v1973_v26 }
 0x499   : > { %3001 = vmatpush3.bf16.msra.mxu1 %v2029_v28  ;;  %3002 = vmatprep.mubr.msk.bf16.mxu1 %vm3224_vm4, %v3223_v17 }
 0x49a   : > { %1969 = vadd.xlane.f32.xlu1 %v1968_v14  ;;  %3022 = vmatprep.subr.bf16.mxu1 %v3223_v17 }
 0x49e   : > { %1229 = vadd.xlane.f32.xlu1 %v1228_v6 }
 0x4a2   : > { %1242 = vadd.xlane.f32.xlu1 %v1241_v30 }
 0x4a4   : > { %3003 = vmatmul.mubr.msk.bf16.vlgmr.msra.gmra.mrb[16].mxu1 %vm1154_vm11, %v1958_v32 }
 0x4a5   : > { %3038 = vmatprep.mubr.msk.bf16.mxu1 %vm3224_vm4, %v3223_v17 }
 0x4da   : > { %v1472_v35 = vpop.xlane.xlu0 %1471 }
 0x4dc   : > { %v1475_v15 = vpop.xlane.xlu1 %1474 }
 0x4de   : > { %v1485_v29 = vpop.xlane.xlu0 %1484 }
 0x4df   : > { %v1489_v40 = vadd.f32 %v1485_v29, %v1472_v35 }
 0x4e1   : > { %3183 = vrcp.f32 %v1489_v40 }
 0x4e2   : > { %v1488_v1 = vpop.xlane.xlu0 %1487 }
 0x4e3   : > { %v1490_v41 = vadd.f32 %v1488_v1, %v1475_v15 }
 0x4e5   : > { %3185 = vrcp.f32 %v1490_v41 }
 0x4ea   : > { %v1713_v51 = vpop.xlane.xlu0 %1712 }
 0x4eb   : > { %v3184_v42 = vpop.eup %3183 }
 0x4ee   : > { %v1716_v52 = vpop.xlane.xlu1 %1715  ;;  %v1726_v53 = vpop.xlane.xlu0 %1725 }
 0x4ef   : > { %v3186_v44 = vpop.eup %3185  ;;  %v1730_v56 = vadd.f32 %v1726_v53, %v1713_v51  ;;  %v3211_v51 = vld [vmem:[#allocation2] sm:$0xff] }
 0x4f1   : > { %3187 = vrcp.f32 %v1730_v56  ;;  %v3212_v56 = vld [vmem:[#allocation2 + $0x8] sm:$0x3] }
 0x4f2   : > { %v1729_v55 = vpop.xlane.xlu1 %1728 }
 0x4f3   : > { %v1731_v4 = vadd.f32 %v1729_v55, %v1716_v52 }
 0x4f5   : > { %3189 = vrcp.f32 %v1731_v4 }
 0x4fb   : > { %v3188_v59 = vpop.eup %3187 }
 0x4ff   : > { %v3190_v61 = vpop.eup %3189 }
 0x513   : > { %v1954_v63 = vpop.xlane.xlu0 %1953 }
 0x517   : > { %v1967_v8 = vpop.xlane.xlu0 %1966 }
 0x518   : > { %v1971_v9 = vadd.f32 %v1967_v8, %v1954_v63  ;;  %v3137_v8 = vld [vmem:[%s3413_s12] sm:$0xff]  }
 0x51a   : > { %3191 = vrcp.f32 %v1971_v9 }
 0x51b   : > { %v1227_v36 = vpop.xlane.xlu0 %1226 }
 0x51f   : > { %v1240_v21 = vpop.xlane.xlu0 %1239 }
 0x520   : > { %v1244_v23 = vadd.f32 %v1240_v21, %v1227_v36  ;;  %v2794_v36 = vld [vmem:[%s824_s26] ss:$0 sm:$0xff] }
 0x521   : > { %v3732_v37 = vpop.f32.mrb[4].mxu1 }
 0x522   : > { %v2932_v33 = vpop.f32.mrb[5].mxu1 }
 0x523   : > { %v3734_v38 = vpop.f32.mrb[6].mxu1  ;;  %v1957_v2 = vpop.xlane.xlu1 %1956 }
 0x524   : > { %v2933_v7 = vpop.f32.mrb[7].mxu1  ;;  %v3192_v12 = vpop.eup %3191 }
 0x527   : > { %v1970_v34 = vpop.xlane.xlu1 %1969 }
 0x528   : > { %v1972_v11 = vadd.f32 %v1970_v34, %v1957_v2  ;;  %v3138_v34 = vld [vmem:[%s3413_s12 + $0x8] sm:$0xff]  }
 0x52a   : > { %3193 = vrcp.f32 %v1972_v11 }
 0x52b   : > { %v1230_v20 = vpop.xlane.xlu1 %1229  ;;  %3195 = vrcp.f32 %v1244_v23 }
 0x52f   : > { %v1243_v22 = vpop.xlane.xlu1 %1242 }
 0x530   : > { %v1245_v25 = vadd.f32 %v1243_v22, %v1230_v20 }
 0x532   : > { %3197 = vrcp.f32 %v1245_v25  ;;  %v3139_v25 = vld [vmem:[%s3423_s23] sm:$0xff]  }
 0x533   : > { %3023 = vmatpush3.bf16.msra.mxu1 %v3139_v25 }
 0x534   : > { %v3194_v13 = vpop.eup %3193  ;;  %3024 = vmatprep.subr.bf16.mxu1 %v3223_v17 }
 0x535   : > { %v1583_v5 = vpop.f32.mrb[8].mxu1  ;;  %v3196_v28 = vpop.eup %3195 }
 0x536   : > { %v2956_v43 = vpop.f32.mrb[9].mxu1  ;;  %v1592_v47 = vmul.f32 %v3184_v42, %v1583_v5  ;;  %v1350_v33 = vmul.f32 %v3196_v28, %v3732_v37  ;;  %v2789_v37 = vld [vmem:[%s3892_s3] ss:$0 sm:$0xff]  ;;  %v3141_v28 = vld [vmem:[%s3423_s23 + $0x10] sm:$0xff]  }
 0x537   : > { %v1586_v46 = vpop.f32.mrb[10].mxu1 }
 0x538   : > { %v1593_v10 = vmul.f32 %v3186_v44, %v1586_v46  ;;  %v2957_v19 = vpop.f32.mrb[11].mxu1 }
 0x53a   : > { %v3118_v49 = vpack.i.bf16 %v1593_v10, %v1592_v47 }
 0x53c   : > { %3119 = vrot.lane.b32.xlu0 %v3118_v49, %s3238_s1  ;;  %v3198_v6 = vpop.eup %3197  ;;  %s3894_s1 = sld [smem:[#allocation13_spill]] (!%p2810_p6) }
 0x53d   : > { %v1351_v7 = vmul.f32 %v3198_v6, %v3734_v38  ;;  %v3143_v6 = vld [vmem:[%s3423_s23 + $0x20] sm:$0xff]  }
 0x55f   : > { %v1824_v50 = vpop.f32.mrb[12].mxu1 }
 0x560   : > { %v2980_v60 = vpop.f32.mrb[13].mxu1  ;;  %v1833_v45 = vmul.f32 %v3188_v59, %v1824_v50 }
 0x561   : > { %v1827_v0 = vpop.f32.mrb[14].mxu1 }
 0x562   : > { %v1834_v3 = vmul.f32 %v3190_v61, %v1827_v0  ;;  %v2981_v48 = vpop.f32.mrb[15].mxu1 }
 0x564   : > { %v3123_v39 = vpack.i.bf16 %v1834_v3, %v1833_v45 }
 0x566   : > { %3124 = vrot.lane.b32.xlu1 %v3123_v39, %s3239_s25 }
 0x577   : > { %v2065_v62 = vpop.f32.mrb[16].mxu1 }
 0x578   : > { %v3004_v24 = vpop.f32.mrb[17].mxu1  ;;  %v2074_v57 = vmul.f32 %v3192_v12, %v2065_v62 }
 0x579   : > { %v2068_v31 = vpop.f32.mrb[18].mxu1 }
 0x57a   : > { %v2075_v16 = vmul.f32 %v3194_v13, %v2068_v31  ;;  %v3005_v18 = vpop.f32.mrb[19].mxu1 }
 0x57c   : > { %v3128_v27 = vpack.i.bf16 %v2075_v16, %v2074_v57  ;;  %v2793_v57 = vld [vmem:[%s821_s7] ss:$0 sm:$0xff] }
 0x57e   : > { %3129 = vrot.lane.b32.xlu1 %v3128_v27, %s3240_s24 }
 0x5ae   : > { %v3120_v26 = vpop.permute.xlu0 %3119 }
 0x5af   : > { %v3122_v30 = vunpack.i.h.bf16 %v3120_v26  ;;  %v3121_v32 = vunpack.i.l.bf16 %v3120_v26  ;;  %v3140_v26 = vld [vmem:[%s3423_s23 + $0x8] sm:$0xff]  }
 0x5b0   : > { %3025 = vmatpush3.bf16.msra.mxu1 %v3140_v26 }
 0x5b1   : > { %v2101_v15 = vsel %vm1106_vm5, %v1351_v7, %v3122_v30  ;;  %v2100_v40 = vsel %vm1106_vm5, %v1350_v33, %v3121_v32  ;;  %3026 = vmatprep.subr.bf16.mxu1 %v3223_v17  ;;  %v3144_v30 = vld [vmem:[%s3423_s23 + $0x28] sm:$0xff]   ;;  %v3145_v32 = vld [vmem:[%s3423_s23 + $0x30] sm:$0xff]   ;;  %vm3242_vm5 = vmmov (!%p2810_p6), 1  }
 0x5b4   : > { %3027 = vmatpush3.bf16.msra.mxu1 %v3141_v28 }
 0x5b5   : > { %3028 = vmatprep.subr.bf16.mxu1 %v3223_v17 }
 0x5d8   : > { %v3125_v14 = vpop.permute.xlu1 %3124 }
 0x5d9   : > { %v3127_v35 = vunpack.i.h.bf16 %v3125_v14  ;;  %v3126_v29 = vunpack.i.l.bf16 %v3125_v14  ;;  %v3142_v14 = vld [vmem:[%s3423_s23 + $0x18] sm:$0xff]  }
 0x5da   : > { %3029 = vmatpush3.bf16.msra.mxu1 %v3142_v14 }
 0x5db   : > { %v2103_v42 = vsel %vm2102_vm0, %v2100_v40, %v3126_v29  ;;  %v2104_v43 = vsel %vm2102_vm0, %v2101_v15, %v3127_v35  ;;  %3030 = vmatprep.subr.bf16.mxu1 %v3223_v17  ;;  %v3146_v35 = vld [vmem:[%s3423_s23 + $0x38] sm:$0xff]   ;;  %v2795_v29 = vld [vmem:[%s832_s14] ss:$0 sm:$0xff]  ;;  %s3896_s14 = sld [smem:[#allocation12_spill]] (!%p2810_p6) }
 0x5de   : > { %3031 = vmatpush3.bf16.msra.mxu1 %v3143_v6 }
 0x5df   : > { %3032 = vmatprep.subr.bf16.mxu1 %v3223_v17 }
 0x5e2   : > { %3033 = vmatpush3.bf16.msra.mxu1 %v3144_v30 }
 0x5e3   : > { %3034 = vmatprep.subr.bf16.mxu1 %v3223_v17 }
 0x5e6   : > { %3035 = vmatpush3.bf16.msra.mxu1 %v3145_v32 }
 0x5e7   : > { %3036 = vmatprep.subr.bf16.mxu1 %v3223_v17 }
 0x5ea   : > { %3037 = vmatpush3.bf16.msra.mxu1 %v3146_v35 }
 0x5f0   : > { %v3130_v1 = vpop.permute.xlu1 %3129 }
 0x5f1   : > { %v3132_v41 = vunpack.i.h.bf16 %v3130_v1  ;;  %v3131_v5 = vunpack.i.l.bf16 %v3130_v1 }
 0x5f3   : > { %v2106_v44 = vsel %vm2105_vm1, %v2103_v42, %v3131_v5  ;;  %v2107_v46 = vsel %vm2105_vm1, %v2104_v43, %v3132_v41 }
 0x5f4   : > { %v2108_v47 = vpack.c.bf16 %v2107_v46, %v2106_v44 }
 0x5f6   : > { %3011 = vmatmul.mubr.msk.bf16.vlgmr.msra.gmra.mrb[40].mxu0 %vm856_vm2, %v2108_v47 }
 0x5f7   : > { %3018 = vmatprep.mubr.msk.bf16.mxu0 %vm3224_vm4, %v3223_v17  ;;  %3015 = vmatpush3.bf16.msra.mxu0 %v3137_v8  ;;  %vm2433_vm4 = vcmask (!%p2810_p6), 1041408  }
 0x5f8   : > { %3016 = vmatprep.subr.bf16.mxu0 %v3223_v17  ;;  %vm3062_vm6 = vmpackc.low (!%p2810_p6), %vm2433_vm4, %vm3242_vm5 }
 0x5fb   : > { %3017 = vmatpush3.bf16.msra.mxu0 %v3138_v34 }
 0x6c9   : > { %v2169_v38 = vpop.f32.mrb[40].mxu0 }
 0x6ca   : > { %v2170_v10 = vadd.f32 %v2789_v37, %v2169_v38  ;;  %v3012_v19 = vpop.f32.mrb[41].mxu0 }
 0x6cb   : > { %v2172_v49 = vpop.f32.mrb[42].mxu0 }
 0x6cc   : > { %v3752_v52 = vadd.f32 %v3211_v51, %v2170_v10  ;;  %v2173_v53 = vadd.f32 %v2789_v37, %v2172_v49  ;;  %v3013_v55 = vpop.f32.mrb[43].mxu0 }
 0x6cd   : > { %v2809_v55 = vld [vmem:[%s840_s6] ss:$0 sm:$0xff]  ;;  %s3897_s6 = sld [smem:[#allocation16_spill]] (!%p2810_p6) }
 0x6ce   : > { %v3754_v4 = vadd.f32 %v3212_v56, %v2173_v53  ;;  %v2180_v58 = vsel %vm856_vm2, %v3752_v52, 0.0 }
 0x6cf   : > { %2181 = vadd.xlane.f32.xlu1 %v2180_v58 }
 0x6d0   : > { %v2183_v50 = vsel %vm860_vm3, %v3754_v4, 0.0 }
 0x6d1   : > { %2184 = vadd.xlane.f32.xlu0 %v2183_v50 }
 0x75c   : > { %v2182_v59 = vpop.xlane.xlu1 %2181 }
 0x75d   : > { %v2186_v60 = vmul.f32 0.03125, %v2182_v59 }
 0x75e   : > { %v2185_v61 = vpop.xlane.xlu0 %2184 }
 0x75f   : > { %v2188_v63 = vsub.f32 %v3752_v52, %v2186_v60  ;;  %v2187_v0 = vmul.f32 0.03125, %v2185_v61 }
 0x761   : > { %v2189_v2 = vsub.f32 %v3754_v4, %v2187_v0  ;;  %v2190_v45 = vmul.f32 %v2188_v63, %v2188_v63 }
 0x763   : > { %v2192_v3 = vsel %vm856_vm2, %v2190_v45, 0.0  ;;  %v2191_v48 = vmul.f32 %v2189_v2, %v2189_v2 }
 0x764   : > { %2193 = vadd.xlane.f32.xlu0 %v2192_v3 }
 0x765   : > { %v2195_v39 = vsel %vm860_vm3, %v2191_v48, 0.0 }
 0x768   : > { %2196 = vadd.xlane.f32.xlu0 %v2195_v39 }
 0x7f1   : > { %v2194_v9 = vpop.xlane.xlu0 %2193 }
 0x7f2   : > { %v2198_v11 = vmul.f32 0.03125, %v2194_v9 }
 0x7f4   : > { %v2200_v54 = vadd.f32 1e-05, %v2198_v11 }
 0x7f5   : > { %v2197_v62 = vpop.xlane.xlu0 %2196 }
 0x7f6   : > { %3199 = vrsqrt.f32 %v2200_v54  ;;  %v2199_v12 = vmul.f32 0.03125, %v2197_v62  ;;  %v2536_v54 = vld [vmem:[%s3894_s1] sm:$0xff] (!%p2810_p6)  ;;  %v2537_v62 = vld [vmem:[%s3894_s1 + $0x8] sm:$0xff] (!%p2810_p6) }
 0x7f8   : > { %v2201_v24 = vadd.f32 1e-05, %v2199_v12  ;;  %v2538_v12 = vld [vmem:[%s3894_s1 + $0x10] sm:$0xff] (!%p2810_p6) }
 0x7fa   : > { %3201 = vrsqrt.f32 %v2201_v24  ;;  %v3065_v24 = vpack.c.bf16 (!%p2810_p6), %v2537_v62, %v2536_v54 }
 0x800   : > { %v3200_v13 = vpop.eup %3199 }
 0x801   : > { %v2204_v31 = vmul.f32 %v3200_v13, %v2188_v63  ;;  %v2539_v13 = vld [vmem:[%s3894_s1 + $0x18] sm:$0xff] (!%p2810_p6) }
 0x803   : > { %v2212_v18 = vmul.f32 %v2793_v57, %v2204_v31  ;;  %v3068_v31 = vpack.c.bf16 (!%p2810_p6), %v2539_v13, %v2538_v12 }
 0x804   : > { %v3202_v16 = vpop.eup %3201 }
 0x805   : > { %v2205_v27 = vmul.f32 %v3202_v16, %v2189_v2  ;;  %v2220_v21 = vadd.f32 %v2794_v36, %v2212_v18  ;;  %v3241_v2 = vmov (!%p2810_p6), 0.0|0.0  }
 0x806   : > { %3060 = vmatprep.subr.bf16.mxu0 (!%p2810_p6), %v3241_v2  ;;  %3064 = vmatprep.subr.bf16.mxu1 (!%p2810_p6), %v3241_v2 }
 0x807   : > { %v2213_v20 = vmul.f32 %v2793_v57, %v2205_v27 }
 0x809   : > { %v2221_v22 = vadd.f32 %v2794_v36, %v2213_v20  ;;  %v2813_v36 = vld [vmem:[%s3895_s8] ss:$0 sm:$0xff] (!%p2810_p6) }
 0x80b   : > { %v2222_v23 = vpack.c.bf16 %v2221_v22, %v2220_v21  ;;  %v2814_v21 = vld [vmem:[%s3896_s14] ss:$0 sm:$0xff] (!%p2810_p6) }
 0x80d   : > { %3019 = vmatmul.mubr.msk.bf16.vlgmr.msra.gmra.mrb[44].mxu0 %vm856_vm2, %v2222_v23 }
 0x8e0   : > { %v2283_v33 = vpop.f32.mrb[44].mxu0 }
 0x8e1   : > { %v2284_v7 = vadd.f32 %v2795_v29, %v2283_v33  ;;  %v3020_v1 = vpop.f32.mrb[45].mxu0 }
 0x8e2   : > { %v2286_v15 = vpop.f32.mrb[46].mxu0 }
 0x8e3   : > { %v2799_v40 = vmul.f32 -1.702, %v2284_v7  ;;  %v2287_v41 = vadd.f32 %v2795_v29, %v2286_v15  ;;  %v3021_v5 = vpop.f32.mrb[47].mxu0 }
 0x8e5   : > { %v2294_v42 = vmul.f32 1.442695, %v2799_v40  ;;  %v2800_v43 = vmul.f32 -1.702, %v2287_v41 }
 0x8e7   : > { %3203 = vpow2.f32 %v2294_v42  ;;  %v2296_v44 = vmul.f32 1.442695, %v2800_v43 }
 0x8e9   : > { %3205 = vpow2.f32 %v2296_v44 }
 0x8f1   : > { %v3204_v17 = vpop.eup %3203 }
 0x8f2   : > { %v2298_v46 = vadd.f32 1.0, %v3204_v17 }
 0x8f3   : > { %v3206_v47 = vpop.eup %3205 }
 0x8f4   : > { %3207 = vrcp.f32 %v2298_v46  ;;  %v2299_v37 = vadd.f32 1.0, %v3206_v47 }
 0x8f6   : > { %3209 = vrcp.f32 %v2299_v37 }
 0x8fe   : > { %v3208_v38 = vpop.eup %3207 }
 0x8ff   : > { %v2304_v19 = vmul.f32 %v3208_v38, %v2284_v7 }
 0x900   : > { %v3210_v10 = vpop.eup %3209 }
 0x901   : > { %v2305_v49 = vmul.f32 %v3210_v10, %v2287_v41 }
 0x903   : > { %v2306_v51 = vpack.c.bf16 %v2305_v49, %v2304_v19 }
 0x905   : > { %3039 = vmatmul.mubr.bf16.vlgmr.msra.gmra.mrb[20].mxu1 %v2306_v51 }
 0x906   : > { %3066 = vmatpush3.bf16.msra.mxu1 (!%p2810_p6), %v3065_v24 }
 0x907   : > { %3067 = vmatprep.subr.bf16.mxu1 (!%p2810_p6), %v3241_v2 }
 0x90a   : > { %3069 = vmatpush3.bf16.msra.mxu1 (!%p2810_p6), %v3068_v31 }
 0x9d8   : > { %v2405_v53 = vpop.f32.mrb[20].mxu1 }
 0x9d9   : > { %v2412_v56 = vadd.f32 %v2405_v53, %v3752_v52  ;;  %v3040_v58 = vpop.f32.mrb[21].mxu1  ;;  %2428 = sbr.rel (%p2810_p6) target bundleno = 3270 (0xcc6), region = 116  ;;  %v3244_v52 = vmov (!%p2810_p6), 0.0  }
 0x9da   : > { %v2408_v50 = vpop.f32.mrb[22].mxu1  ;;  %3046 = vmatprep.mubr.msk.f32.mxu0 (!%p2810_p6), %vm3243_vm7, %v3244_v52  ;;  %3057 = vmatprep.mubr.msk.f32.mxu1 (!%p2810_p6), %vm3243_vm7, %v3244_v52 }
 0x9db   : > { %v2421_v59 = vadd.f32 %v2809_v55, %v2412_v56  ;;  %v2413_v60 = vadd.f32 %v2408_v50, %v3754_v4  ;;  %v3041_v61 = vpop.f32.mrb[23].mxu1  ;;  %v2429_v4 = vld [vmem:[%s3893_s0] sm:$0x3] (!%p2810_p6) }
 0x9dd   : > { %2423 = vst.msk [vmem:[#allocation2] sm:$0xff] %vm856_vm2, %v2421_v59  ;;  %v2422_v63 = vadd.f32 %v2809_v55, %v2413_v60 }
 0x9df   : > { %2424 = vst.msk [vmem:[#allocation2 + $0x8] sm:$0x3] %vm860_vm3, %v2422_v63  ;;  %v3061_v0 = vpack.c.bf16 (!%p2810_p6), %v2422_v63, %v2421_v59 }
 0x9e1   : > { %3063 = vmatpush3.bf16.msk.msra.mxu0 %vm3062_vm6, %v3061_v0 }
 0x9e4   : > { %3047 = vmatmul.mubr.msk.f32.vlgmr.msra.gmra.mrb[0].mxu0 %vm1154_vm11, %v2429_v4 }
 0xab7   : > { %v2503_v45 = vpop.f32.mrb[0].mxu0 }
 0xab8   : > { %v3048_v3 = vpop.f32.mrb[1].mxu0  ;;  %v2509_v48 = vsel %vm860_vm3, %v2503_v45, 0.0 }
 0xab9   : > { %2510 = vadd.xlane.f32.xlu0 %v2509_v48 }
 0xb46   : > { %v2511_v39 = vpop.xlane.xlu0 %2510 }
 0xb47   : > { %v2512_v8 = vmul.f32 0.03125, %v2511_v39 }
 0xb49   : > { %v2513_v34 = vsub.f32 %v2503_v45, %v2512_v8 }
 0xb4b   : > { %v2514_v9 = vmul.f32 %v2513_v34, %v2513_v34 }
 0xb4d   : > { %v2515_v11 = vsel %vm860_vm3, %v2514_v9, 0.0 }
 0xb4e   : > { %2516 = vadd.xlane.f32.xlu0 %v2515_v11 }
 0xbdb   : > { %v2517_v57 = vpop.xlane.xlu0 %2516 }
 0xbdc   : > { %v2518_v16 = vmul.f32 0.03125, %v2517_v57 }
 0xbde   : > { %v2519_v18 = vadd.f32 1e-05, %v2518_v16 }
 0xbe0   : > { %3213 = vrsqrt.f32 %v2519_v18 }
 0xbea   : > { %v3214_v27 = vpop.eup %3213 }
 0xbeb   : > { %v2521_v20 = vmul.f32 %v3214_v27, %v2513_v34 }
 0xbed   : > { %v2528_v22 = vmul.f32 %v2813_v36, %v2521_v20 }
 0xbef   : > { %v2535_v23 = vadd.f32 %v2814_v21, %v2528_v22 }
 0xbf1   : > { %3058 = vmatmul.mubr.msk.f32.vlgmr.msra.gmra.mrb[0].mxu1 %vm856_vm2, %v2535_v23 }
 0xcc4   : > { %v2609_v25 = vpop.f32.mrb[0].mxu1 }
 0xcc5   : > { %2613 = vst.msk [vmem:[%s3897_s6] sm:$0x3] %vm860_vm3, %v2609_v25  ;;  %v3059_v26 = vpop.f32.mrb[1].mxu1 }
 0xcc6 PF: > { %s3898_s0 = sld [smem:[#allocation3_spill]] }
 0xccc   : > { %s32_s3 = sadd.s32 1, %s3898_s0  }
 0xccd   : > { %p29_p7 = scmp.ge.s32.totalorder %s32_s3, 14  }
 0xccf   :  { %31 = sbr.rel (!%p29_p7) target bundleno = 14 (0xe), region = 175 }

// kernel: mint_forward.5
= control target key start
LH: loop header
LB: loop body
LE: loop exit
PB: predicated region body
PF: predicated region fallthrough
CT: control target
= control target key end

     0   :  { %s3400_s0 = inlined_call_operand.vmem [shape: f32[24,32], index: 0, kind: input, shape index: {}]   ;;  %s3401_s1 = inlined_call_operand.vmem [shape: f32[24,1], index: 1, kind: input, shape index: {}]   ;;  %s3402_s2 = inlined_call_operand.vmem [shape: f32[1,24], index: 2, kind: input, shape index: {}]   ;;  %s3403_s3 = inlined_call_operand.vmem [shape: f32[24,1], index: 3, kind: input, shape index: {}]   ;;  %s3404_s4 = inlined_call_operand.vmem [shape: f32[1,24], index: 4, kind: input, shape index: {}]   ;;  %s3405_s5 = inlined_call_operand.vmem [shape: f32[3,24], index: 5, kind: input, shape index: {}]   ;;  %s3406_s6 = inlined_call_operand.vmem [shape: f32[1,32], index: 6, kind: input, shape index: {}]   ;;  %s3407_s7 = inlined_call_operand.vmem [shape: f32[1,32], index: 7, kind: input, shape index: {}]   ;;  %s3408_s8 = inlined_call_operand.vmem [shape: f32[32,32], index: 8, kind: input, shape index: {}]   ;;  %s3409_s9 = inlined_call_operand.vmem [shape: f32[2,1,32], index: 9, kind: input, shape index: {}]   ;;  %s3410_s10 = inlined_call_operand.vmem [shape: f32[2,1,32], index: 10, kind: input, shape index: {}]   ;;  %s3411_s11 = inlined_call_operand.vmem [shape: bf16[2,32,96], index: 11, kind: input, shape index: {}]   ;;  %s3412_s12 = inlined_call_operand.vmem [shape: f32[2,1,96], index: 12, kind: input, shape index: {}]   ;;  %s3413_s13 = inlined_call_operand.vmem [shape: bf16[2,32,32], index: 13, kind: input, shape index: {}]   ;;  %s3414_s14 = inlined_call_operand.vmem [shape: f32[2,1,32], index: 14, kind: input, shape index: {}]   ;;  %s3415_s15 = inlined_call_operand.vmem [shape: f32[2,1,32], index: 15, kind: input, shape index: {}]   ;;  %s3416_s16 = inlined_call_operand.vmem [shape: f32[2,1,32], index: 16, kind: input, shape index: {}]   ;;  %s3417_s17 = inlined_call_operand.vmem [shape: bf16[2,32,128], index: 17, kind: input, shape index: {}]   ;;  %s3418_s18 = inlined_call_operand.vmem [shape: f32[2,1,128], index: 18, kind: input, shape index: {}]   ;;  %s3419_s19 = inlined_call_operand.vmem [shape: bf16[2,128,32], index: 19, kind: input, shape index: {}]   ;;  %s3420_s20 = inlined_call_operand.vmem [shape: f32[2,1,32], index: 20, kind: input, shape index: {}]   ;;  %s3421_s21 = inlined_call_operand.vmem [shape: f32[3,32], index: 21, kind: output, shape index: {}]  }
   0x1   :  { %3427 = sst [smem:[#allocation4_spill]] %s3400_s0 }
   0x2   :  { %3428 = sst [smem:[#allocation5_spill]] %s3401_s1 }
   0x3   :  { %3429 = sst [smem:[#allocation6_spill]] %s3402_s2  ;;  %s3000_s2 = smov 0  }
   0x4   :  { %3430 = sst [smem:[#allocation7_spill]] %s3403_s3 }
   0x5   :  { %3431 = sst [smem:[#allocation8_spill]] %s3404_s4 }
   0x6   :  { %3432 = sst [smem:[#allocation9_spill]] %s3405_s5 }
   0x7   :  { %3433 = sst [smem:[#allocation10_spill]] %s3406_s6 }
   0x8   :  { %3434 = sst [smem:[#allocation11_spill]] %s3407_s7 }
   0x9   :  { %3435 = sst [smem:[#allocation12_spill]] %s3408_s8 }
   0xa   :  { %3436 = sst [smem:[#allocation13_spill]] %s3411_s11 }
   0xb   :  { %3437 = sst [smem:[#allocation14_spill]] %s3413_s13 }
   0xc   :  { %3438 = sst [smem:[#allocation15_spill]] %s3421_s21 }
   0xd LB: > { %3439 = sst [smem:[#allocation3_spill]] %s2869_s2  ;;  %s3006_s25 = sadd.s32 4294967295, %s2869_s2   ;;  %s2869_s2 = sphi %s3000_s2, %s31_s2  }
   0xe   : > { %p2446_p0 = scmp.ge.s32.totalorder %s2869_s2, 1  ;;  %p676_p1 = scmp.lt.s32.totalorder %s2869_s2, 3 }
  0x10   : > { %p677_p2 = pnand %p2446_p0, %p676_p1 }
  0x11   : > { %p770_p3 = scmp.lt.s32.totalorder (!%p677_p2), %s3006_s25, 1  ;;  %s3440_s11 = sld [smem:[#allocation13_spill]] (!%p677_p2) }
  0x12   : > { %680 = sbr.rel (%p677_p2) target bundleno = 4370 (0x1112), region = 104  ;;  %s3441_s13 = sld [smem:[#allocation14_spill]] (!%p677_p2) }
  0x13   : > { %p2455_p4 = scmp.ne.s32.totalorder (!%p677_p2), %s3006_s25, 0 }
  0x19   : > { %s3012_s26 = scalar_select %p770_p3, %s3006_s25, 1 }
  0x1a   : > { %818 = sbr.rel (%p2455_p4) target bundleno = 35 (0x23), region = 108  ;;  %s3442_s1 = sld [smem:[#allocation4_spill]] (!%p2455_p4)  ;;  %vm822_vm0 = vcmask (!%p2455_p4), 261120  }
  0x1b   : > { %s2512_s30 = sshll.u32 %s3012_s26, 4  ;;  %s794_s6 = scalar_lea.vmem %s3415_s15, %s3012_s26 }
  0x1c   : > { %s3030_s27 = scalar_lea.vmem %s3440_s11, %s2512_s30  ;;  %s3035_s21 = scalar_lea.vmem %s3441_s13, %s2512_s30 }
  0x1d   : > { %s797_s23 = scalar_lea.vmem %s3416_s16, %s3012_s26  ;;  %s3052_s11 = scalar_lea.vmem %s3417_s17, %s2512_s30 }
  0x1e   : > { %s805_s13 = scalar_lea.vmem %s3418_s18, %s3012_s26  ;;  %s2515_s8 = sshll.u32 %s3012_s26, 6 }
  0x1f   : > { %s3062_s29 = scalar_lea.vmem %s3419_s19, %s2515_s8  ;;  %s813_s5 = scalar_lea.vmem %s3420_s20, %s3012_s26 }
  0x20   : > { %v819_v0 = vld [vmem:[%s3442_s1] sm:$0xff] (!%p2455_p4)  ;;  %v820_v1 = vld [vmem:[%s3442_s1 + $0x8] sm:$0xff] (!%p2455_p4)  ;;  %v821_v2 = vld [vmem:[%s3442_s1 + $0x10] sm:$0xff] (!%p2455_p4) }
  0x21   : > { %823 = vst.msk [vmem:[#allocation2] sm:$0xff] %vm822_vm0, %v819_v0  ;;  %824 = vst.msk [vmem:[#allocation2 + $0x8] sm:$0xff] %vm822_vm0, %v820_v1 }
  0x22   : > { %825 = vst.msk [vmem:[#allocation2 + $0x10] sm:$0xff] %vm822_vm0, %v821_v2 }
  0x23 PF: > { %vm831_vm1 = vcmask 261120   ;;  %v2772_v24 = vld [vmem:[%s3030_s27] sm:$0xff]   ;;  %v2773_v25 = vld [vmem:[%s3030_s27 + $0x8] sm:$0xff]   ;;  %s3443_s28 = scalar_lea.vmem %s3409_s9, %s3012_s26  ;;  %s3444_s22 = scalar_lea.vmem %s3410_s10, %s3012_s26  ;;  %vm1044_vm2 = vcmask 64512   ;;  %v2872_v1 = vmov 0   ;;  %vm1105_vm12 = vcmask 195584  }
  0x24   : > { %2579 = vmatprep.subr.bf16.mxu0 %v2772_v24  ;;  %v2456_v37 = vld [vmem:[%s3443_s28] ss:$0 sm:$0xff]  ;;  %s3445_s2 = scalar_lea.vmem %s3412_s12, %s3012_s26  ;;  %s2871_s3 = smov 96   ;;  %2755 = vset.pattern.permute.xlu1 %v2872_v1  ;;  %vm1146_vm13 = vcmask 1043456   ;;  %vm1740_vm14 = vcmask 130048  }
  0x25   : > { %2580 = vmatpush3.bf16.msra.mxu0 %v2772_v24  ;;  %v2457_v43 = vld [vmem:[%s3444_s22] ss:$0 sm:$0xff]  ;;  %s3446_s27 = sld [smem:[#allocation5_spill]]  ;;  %2756 = vset.pattern.permute.xlu0 %v2872_v1  ;;  %s3447_s0 = sld [smem:[#allocation7_spill]] }
  0x26   : > { %2581 = vmatprep.subr.bf16.mxu0 %v2773_v25  ;;  %v2460_v51 = vld [vmem:[%s3445_s2] ss:$0 sm:$0xff]  ;;  %s3448_s30 = sld [smem:[#allocation6_spill]]  ;;  %s2874_s7 = smov 64  }
  0x27   : > { %s2875_s8 = smov 88   ;;  %s2876_s28 = smov 120  }
  0x28   : > { %s2877_s4 = smov 56   ;;  %s2878_s22 = smov 80  }
  0x29   : > { %v828_v4 = vld [vmem:[#allocation2 + $0x10] sm:$0xff]  ;;  %2582 = vmatpush3.bf16.msra.mxu0 %v2773_v25  ;;  %s2880_s24 = smov 48   ;;  %s2881_s2 = smov 72  }
  0x2a   : > { %v826_v3 = vld [vmem:[#allocation2] sm:$0xff]  ;;  %v827_v5 = vld [vmem:[#allocation2 + $0x8] sm:$0xff]  ;;  %v838_v7 = vsel %vm831_vm1, %v828_v4, 0.0  ;;  %p2505_p5 = scmp.ne.s32.totalorder %s3006_s25, 1 }
  0x2b   : > { %v832_v6 = vsel %vm831_vm1, %v826_v3, 0.0  ;;  %v835_v8 = vsel %vm831_vm1, %v827_v5, 0.0  ;;  %839 = vadd.xlane.f32.xlu1 %v838_v7  ;;  %v890_v0 = vld [vmem:[%s3446_s27] sm:$0xff]  ;;  %vm2888_vm15 = vmmov (!%p2505_p5), 0   ;;  %vm2201_vm0 = vcmask (!%p2505_p5), 256000  }
  0x2c   : > { %833 = vadd.xlane.f32.xlu0 %v832_v6  ;;  %v919_v2 = vld [vmem:[%s3447_s0] sm:$0xff]  ;;  %v892_v6 = vld [vmem:[%s3446_s27 + $0x10] sm:$0xff] }
  0x30   : > { %836 = vadd.xlane.f32.xlu0 %v835_v8 }
  0xb8   : > { %v840_v10 = vpop.xlane.xlu1 %839 }
  0xb9   : > { %v834_v9 = vpop.xlane.xlu0 %833  ;;  %v844_v12 = vmul.f32 0.03125, %v840_v10 }
  0xba   : > { %v842_v11 = vmul.f32 0.03125, %v834_v9 }
  0xbb   : > { %v847_v14 = vsub.f32 %v828_v4, %v844_v12  ;;  %v921_v4 = vld [vmem:[%s3447_s0 + $0x10] sm:$0xff] }
  0xbc   : > { %v845_v13 = vsub.f32 %v826_v3, %v842_v11  ;;  %v891_v3 = vld [vmem:[%s3446_s27 + $0x8] sm:$0xff] }
  0xbd   : > { %v837_v15 = vpop.xlane.xlu0 %836  ;;  %v850_v18 = vmul.f32 %v847_v14, %v847_v14 }
  0xbe   : > { %v843_v16 = vmul.f32 0.03125, %v837_v15  ;;  %v848_v17 = vmul.f32 %v845_v13, %v845_v13 }
  0xbf   : > { %v857_v21 = vsel %vm831_vm1, %v850_v18, 0.0 }
  0xc0   : > { %v846_v19 = vsub.f32 %v827_v5, %v843_v16  ;;  %v851_v20 = vsel %vm831_vm1, %v848_v17, 0.0  ;;  %v920_v5 = vld [vmem:[%s3447_s0 + $0x8] sm:$0xff]  ;;  %v2458_v17 = vld [vmem:[%s3448_s30] ss:$0 sm:$0xff]  ;;  %s2879_s30 = smov 112  }
  0xc1   : > { %852 = vadd.xlane.f32.xlu1 %v851_v20 }
  0xc2   : > { %v849_v22 = vmul.f32 %v846_v19, %v846_v19 }
  0xc4   : > { %v854_v23 = vsel %vm831_vm1, %v849_v22, 0.0 }
  0xc5   : > { %858 = vadd.xlane.f32.xlu1 %v857_v21  ;;  %855 = vadd.xlane.f32.xlu0 %v854_v23  ;;  %v2873_v21 = vmov -1e+30  }
 0x14e   : > { %v853_v26 = vpop.xlane.xlu1 %852 }
 0x14f   : > { %v860_v27 = vmul.f32 0.03125, %v853_v26 }
 0x151   : > { %v863_v28 = vadd.f32 1e-05, %v860_v27 }
 0x152   : > { %v859_v29 = vpop.xlane.xlu1 %858  ;;  %v856_v30 = vpop.xlane.xlu0 %855 }
 0x153   : > { %2786 = vrsqrt.f32 %v863_v28  ;;  %v862_v31 = vmul.f32 0.03125, %v859_v29  ;;  %v861_v32 = vmul.f32 0.03125, %v856_v30 }
 0x155   : > { %v865_v33 = vadd.f32 1e-05, %v862_v31  ;;  %v864_v34 = vadd.f32 1e-05, %v861_v32 }
 0x157   : > { %2788 = vrsqrt.f32 %v865_v33 }
 0x158   : > { %2790 = vrsqrt.f32 %v864_v34 }
 0x15d   : > { %v2787_v35 = vpop.eup %2786 }
 0x15e   : > { %v869_v36 = vmul.f32 %v2787_v35, %v845_v13 }
 0x160   : > { %v878_v42 = vmul.f32 %v2456_v37, %v869_v36 }
 0x161   : > { %v2789_v38 = vpop.eup %2788 }
 0x162   : > { %v2791_v39 = vpop.eup %2790  ;;  %v871_v40 = vmul.f32 %v2789_v38, %v847_v14  ;;  %v887_v47 = vadd.f32 %v2457_v43, %v878_v42 }
 0x163   : > { %v870_v41 = vmul.f32 %v2791_v39, %v846_v19 }
 0x164   : > { %v880_v44 = vmul.f32 %v2456_v37, %v871_v40 }
 0x165   : > { %v879_v45 = vmul.f32 %v2456_v37, %v870_v41 }
 0x166   : > { %v889_v46 = vadd.f32 %v2457_v43, %v880_v44 }
 0x167   : > { %v888_v48 = vadd.f32 %v2457_v43, %v879_v45 }
 0x168   : > { %v958_v49 = vpack.c.bf16 %v889_v46, %v889_v46 }
 0x169   : > { %v957_v50 = vpack.c.bf16 %v888_v48, %v887_v47 }
 0x16b   : > { %2583 = vmatprep.mubr.msk.bf16.mxu0 %vm831_vm1, %v957_v50 }
 0x16c   : > { %2584 = vmatmul.mubr.msk.bf16.vlgmr.msra.gmra.mrb[0].mxu0 %vm831_vm1, %v958_v49 }
 0x23f   : > { %v2585_v52 = vpop.f32.mrb[0].mxu0 }
 0x240   : > { %v1026_v53 = vadd.f32 %v2585_v52, %v2460_v51  ;;  %v1017_v54 = vpop.f32.mrb[1].mxu0 }
 0x241   : > { %v1018_v55 = vadd.f32 %v2460_v51, %v1017_v54  ;;  %v2586_v56 = vpop.f32.mrb[2].mxu0 }
 0x242   : > { %v3103_v57 = vpack.c.bf16 %v1026_v53, %v1026_v53  ;;  %v1020_v58 = vpop.f32.mrb[3].mxu0  ;;  %v1033_v11 = vmul.f32 0.35355338, %v1026_v53 }
 0x243   : > { %v1021_v59 = vadd.f32 %v2460_v51, %v1020_v58  ;;  %v1031_v60 = vmul.f32 0.35355338, %v1018_v55 }
 0x244   : > { %1042 = vrot.lane.b32.xlu1 %v3103_v57, %s2871_s3  ;;  %v3135_v12 = vpack.c.bf16 %v1033_v11, %v1033_v11 }
 0x245   : > { %v1032_v61 = vmul.f32 0.35355338, %v1021_v59  ;;  %v3106_v62 = vpack.c.bf16 %v1021_v59, %v1018_v55 }
 0x247   : > { %v3108_v63 = vpack.c.bf16 %v1032_v61, %v1031_v60  ;;  %1040 = vrot.lane.b32.xlu0 %v3106_v62, %s2871_s3  ;;  %s3449_s3 = sld [smem:[#allocation8_spill]] }
 0x248   : > { %896 = vperm.xlu1 %2755, %v890_v0  }
 0x249   : > { %2591 = vmatprep.mubr.msk.bf16.mxu0 %vm1044_vm2, %v3108_v63 }
 0x24b   : > { %930 = vperm.xlu0 %2756, %v919_v2  }
 0x24c   : > { %901 = vperm.xlu1 %2755, %v891_v3  }
 0x24d   : > { %v2459_v18 = vld [vmem:[%s3449_s3] ss:$0 sm:$0xff]  ;;  %s2882_s3 = smov 104  }
 0x24f   : > { %940 = vperm.xlu0 %2756, %v921_v4  }
 0x250   : > { %935 = vperm.xlu1 %2755, %v920_v5  }
 0x254   : > { %906 = vperm.xlu1 %2755, %v892_v6  }
 0x2b6   : > { %v1043_v9 = vpop.permute.xlu1 %1042 }
 0x2b7   : > { %v1055_v10 = vsel %vm1044_vm2, %v1043_v9, 0 }
 0x2b9   : > { %v1041_v7 = vpop.permute.xlu0 %1040 }
 0x2ba   : > { %v1052_v8 = vsel %vm1044_vm2, %v1041_v7, 0  ;;  %2716 = vmatprep.subr.msk.bf16.mxu0 %vm1044_vm2, %v1041_v7 }
 0x2bb   : > { %2588 = vmatpush3.bf16.xpose.msra.mxu0 %v1052_v8 }
 0x2bc   : > { %2717 = vmatprep.subr.msk.bf16.mxu0 %vm1044_vm2, %v1043_v9 }
 0x2c3   : > { %2590 = vmatpush3.bf16.xpose.msra.mxu0 %v1055_v10 }
 0x2c7   : > { %v897_v13 = vpop.permute.xlu1 %896 }
 0x2c8   : > { %vm915_vm5 = vcmp.eq.f32.partialorder %v897_v13, %v2458_v17 }
 0x2ca   : > { %2592 = vmatmul.mubr.msk.bf16.vlgmr.msra.gmra.mrb[4].mxu0 %vm1044_vm2, %v3135_v12  ;;  %v931_v16 = vpop.permute.xlu0 %930 }
 0x2cb   : > { %v902_v14 = vpop.permute.xlu1 %901  ;;  %vm943_vm6 = vcmp.le.f32.partialorder %v2459_v18, %v931_v16 }
 0x2cc   : > { %vm916_vm7 = vcmp.eq.f32.partialorder %v902_v14, %v2458_v17  ;;  %vm946_vm10 = vmand %vm915_vm5, %vm943_vm6 }
 0x2cd   : > { %v3147_v24 = vsel %vm946_vm10, 0.0, %v2873_v21 }
 0x2ce   : > { %v941_v20 = vpop.permute.xlu0 %940 }
 0x2cf   : > { %v936_v15 = vpop.permute.xlu1 %935  ;;  %vm945_vm4 = vcmp.le.f32.partialorder %v2459_v18, %v941_v20 }
 0x2d0   : > { %vm944_vm8 = vcmp.le.f32.partialorder %v2459_v18, %v936_v15 }
 0x2d1   : > { %vm947_vm11 = vmand %vm916_vm7, %vm944_vm8 }
 0x2d2   : > { %v3151_v29 = vsel %vm947_vm11, 0.0, %v2873_v21 }
 0x2d3   : > { %v907_v19 = vpop.permute.xlu1 %906 }
 0x2d4   : > { %vm917_vm3 = vcmp.eq.f32.partialorder %v907_v19, %v2458_v17 }
 0x2d5   : > { %vm948_vm9 = vmand %vm917_vm3, %vm945_vm4 }
 0x2d6   : > { %v3145_v22 = vsel %vm948_vm9, 0.0, %v2873_v21 }
 0x39d   : > { %v2593_v23 = vpop.f32.mrb[4].mxu0 }
 0x39e   : > { %v1100_v25 = vadd.f32 %v2593_v23, %v3145_v22  ;;  %v1091_v26 = vpop.f32.mrb[5].mxu0 }
 0x39f   : > { %v1092_v27 = vadd.f32 %v1091_v26, %v3147_v24  ;;  %v2594_v28 = vpop.f32.mrb[6].mxu0 }
 0x3a0   : > { %v1094_v30 = vpop.f32.mrb[7].mxu0  ;;  %v1112_v31 = vsel %vm1105_vm12, %v1100_v25, -inf }
 0x3a1   : > { %v1095_v32 = vadd.f32 %v1094_v30, %v3151_v29  ;;  %1113 = vmax.xlane.f32.xlu0 %v1112_v31  ;;  %v1106_v33 = vsel %vm1105_vm12, %v1092_v27, -inf }
 0x3a2   : > { %1107 = vmax.xlane.f32.xlu1 %v1106_v33 }
 0x3a3   : > { %v1109_v34 = vsel %vm1105_vm12, %v1095_v32, -inf }
 0x3a5   : > { %1110 = vmax.xlane.f32.xlu0 %v1109_v34 }
 0x3b3   : > { %1137 = vrot.lane.b32.xlu1 %v3103_v57, %s2874_s7 }
 0x3b7   : > { %1210 = vrot.lane.b32.xlu1 %v3106_v62, %s2875_s8 }
 0x3bb   : > { %1135 = vrot.lane.b32.xlu0 %v3106_v62, %s2874_s7  ;;  %1212 = vrot.lane.b32.xlu1 %v3103_v57, %s2875_s8  ;;  %s2883_s7 = smov 40   ;;  %s2884_s8 = smov 8  }
 0x3bf   : > { %1206 = vrot.lane.b32.xlu0 %v3108_v63, %s2876_s28  ;;  %1208 = vrot.lane.b32.xlu1 %v3135_v12, %s2876_s28  ;;  %s2885_s28 = smov 16  }
 0x3c3   : > { %1305 = vrot.lane.b32.xlu1 %v3103_v57, %s2877_s4 }
 0x42e   : > { %v1114_v35 = vpop.xlane.xlu0 %1113 }
 0x42f   : > { %v1117_v36 = vsub.f32 %v1100_v25, %v1114_v35  ;;  %v1108_v37 = vpop.xlane.xlu1 %1107 }
 0x430   : > { %v1115_v38 = vsub.f32 %v1092_v27, %v1108_v37 }
 0x431   : > { %v1122_v39 = vmul.f32 1.442695, %v1117_v36 }
 0x432   : > { %v1118_v40 = vmul.f32 1.442695, %v1115_v38  ;;  %v1111_v41 = vpop.xlane.xlu0 %1110 }
 0x433   : > { %v1116_v42 = vsub.f32 %v1095_v32, %v1111_v41  ;;  %2792 = vpow2.f32 %v1122_v39  ;;  %v1138_v44 = vpop.permute.xlu1 %1137 }
 0x434   : > { %2794 = vpow2.f32 %v1118_v40  ;;  %v1148_v46 = vsel %vm1146_vm13, %v1138_v44, 0 }
 0x435   : > { %v1120_v43 = vmul.f32 1.442695, %v1116_v42 }
 0x436   : > { %v1136_v45 = vpop.permute.xlu0 %1135 }
 0x437   : > { %2796 = vpow2.f32 %v1120_v43  ;;  %2595 = vmatprep.subr.bf16.mxu0 %v1136_v45  ;;  %v1211_v47 = vpop.permute.xlu1 %1210 }
 0x438   : > { %2596 = vmatpush3.bf16.msra.mxu0 %v1136_v45  ;;  %v1221_v53 = vsel %vm1044_vm2, %v1211_v47, 0 }
 0x439   : > { %2718 = vmatprep.subr.msk.bf16.mxu0 %vm1146_vm13, %v1138_v44 }
 0x43a   : > { %v1207_v54 = vpop.permute.xlu0 %1206 }
 0x43b   : > { %v1213_v55 = vpop.permute.xlu1 %1212 }
 0x43c   : > { %2598 = vmatpush3.bf16.msra.mxu0 %v1148_v46  ;;  %v1224_v56 = vsel %vm1044_vm2, %v1213_v55, 0 }
 0x43d   : > { %2719 = vmatprep.subr.msk.bf16.mxu0 %vm1044_vm2, %v1211_v47  ;;  %v3168_v48 = vpop.eup %2792 }
 0x43e   : > { %v3170_v49 = vpop.eup %2794  ;;  %v1134_v52 = vpack.c.bf16 %v3168_v48, %v3168_v48 }
 0x43f   : > { %v1209_v58 = vpop.permute.xlu1 %1208 }
 0x441   : > { %v3172_v50 = vpop.eup %2796 }
 0x442   : > { %v1133_v51 = vpack.c.bf16 %v3172_v50, %v3170_v49 }
 0x443   : > { %v1306_v11 = vpop.permute.xlu1 %1305 }
 0x444   : > { %2599 = vmatprep.mubr.msk.bf16.mxu0 %vm1105_vm12, %v1133_v51  ;;  %v1315_v25 = vsel %vm1146_vm13, %v1306_v11, 0 }
 0x445   : > { %2600 = vmatmul.mubr.msk.bf16.vlgmr.msra.gmra.mrb[8].mxu0 %vm1105_vm12, %v1134_v52 }
 0x446   : > { %2604 = vmatpush3.bf16.xpose.msra.mxu0 %v1221_v53  ;;  %2607 = vmatprep.mubr.msk.bf16.mxu0 %vm1044_vm2, %v1207_v54 }
 0x447   : > { %2720 = vmatprep.subr.msk.bf16.mxu0 %vm1044_vm2, %v1213_v55 }
 0x44e   : > { %2606 = vmatpush3.bf16.xpose.msra.mxu0 %v1224_v56 }
 0x455   : > { %2608 = vmatmul.mubr.msk.bf16.vlgmr.msra.gmra.mrb[12].mxu0 %vm1044_vm2, %v1209_v58 }
 0x518   : > { %v3185_v59 = vpop.f32.mrb[8].mxu0 }
 0x519   : > { %v3187_v60 = vpop.f32.mrb[9].mxu0 }
 0x51a   : > { %v2602_v61 = vpop.f32.mrb[10].mxu0 }
 0x51b   : > { %v3189_v0 = vpop.f32.mrb[11].mxu0 }
 0x528   : > { %v2609_v1 = vpop.f32.mrb[12].mxu0 }
 0x529   : > { %v1269_v2 = vadd.f32 %v2609_v1, %v3145_v22  ;;  %v1260_v3 = vpop.f32.mrb[13].mxu0 }
 0x52a   : > { %v2610_v4 = vpop.f32.mrb[14].mxu0  ;;  %v1261_v5 = vadd.f32 %v1260_v3, %v3147_v24 }
 0x52b   : > { %v1263_v6 = vpop.f32.mrb[15].mxu0  ;;  %v1280_v7 = vsel %vm1105_vm12, %v1269_v2, -inf }
 0x52c   : > { %v1264_v8 = vadd.f32 %v1263_v6, %v3151_v29  ;;  %1281 = vmax.xlane.f32.xlu0 %v1280_v7  ;;  %v1274_v10 = vsel %vm1105_vm12, %v1261_v5, -inf }
 0x52e   : > { %v1277_v9 = vsel %vm1105_vm12, %v1264_v8, -inf }
 0x52f   : > { %1278 = vmax.xlane.f32.xlu1 %v1277_v9 }
 0x530   : > { %1275 = vmax.xlane.f32.xlu0 %v1274_v10 }
 0x540   : > { %1375 = vrot.lane.b32.xlu1 %v3106_v62, %s2878_s22 }
 0x544   : > { %1371 = vrot.lane.b32.xlu1 %v3108_v63, %s2879_s30 }
 0x546   : > { %1303 = vrot.lane.b32.xlu0 %v3106_v62, %s2877_s4  ;;  %s2886_s4 = smov 24  }
 0x54a   : > { %1377 = vrot.lane.b32.xlu0 %v3103_v57, %s2878_s22 }
 0x54e   : > { %1373 = vrot.lane.b32.xlu0 %v3135_v12, %s2879_s30  ;;  %s3450_s30 = scalar_lea.vmem %s3414_s14, %s3012_s26 }
 0x5b9   : > { %v1282_v13 = vpop.xlane.xlu0 %1281 }
 0x5ba   : > { %v1285_v14 = vsub.f32 %v1269_v2, %v1282_v13 }
 0x5bc   : > { %v1290_v15 = vmul.f32 1.442695, %v1285_v14  ;;  %v1279_v16 = vpop.xlane.xlu1 %1278 }
 0x5bd   : > { %v1284_v17 = vsub.f32 %v1264_v8, %v1279_v16  ;;  %v1276_v18 = vpop.xlane.xlu0 %1275 }
 0x5be   : > { %v1283_v19 = vsub.f32 %v1261_v5, %v1276_v18  ;;  %2798 = vpow2.f32 %v1290_v15 }
 0x5bf   : > { %v1288_v20 = vmul.f32 1.442695, %v1284_v17 }
 0x5c0   : > { %v1286_v21 = vmul.f32 1.442695, %v1283_v19  ;;  %v1376_v26 = vpop.permute.xlu1 %1375 }
 0x5c1   : > { %2800 = vpow2.f32 %v1288_v20  ;;  %v1304_v23 = vpop.permute.xlu0 %1303  ;;  %v1386_v33 = vsel %vm1044_vm2, %v1376_v26, 0 }
 0x5c2   : > { %2802 = vpow2.f32 %v1286_v21  ;;  %2611 = vmatprep.subr.bf16.mxu1 %v1304_v23 }
 0x5c3   : > { %2612 = vmatpush3.bf16.msra.mxu1 %v1304_v23 }
 0x5c4   : > { %2721 = vmatprep.subr.msk.bf16.mxu1 %vm1146_vm13, %v1306_v11  ;;  %v1372_v34 = vpop.permute.xlu1 %1371 }
 0x5c5   : > { %v1378_v35 = vpop.permute.xlu0 %1377 }
 0x5c6   : > { %v1389_v36 = vsel %vm1044_vm2, %v1378_v35, 0 }
 0x5c7   : > { %2614 = vmatpush3.bf16.msra.mxu1 %v1315_v25 }
 0x5c8   : > { %2722 = vmatprep.subr.msk.bf16.mxu1 %vm1044_vm2, %v1376_v26  ;;  %v3206_v27 = vpop.eup %2798 }
 0x5c9   : > { %v1302_v32 = vpack.c.bf16 %v3206_v27, %v3206_v27  ;;  %v1374_v37 = vpop.permute.xlu0 %1373 }
 0x5cb   : > { %v3208_v28 = vpop.eup %2800 }
 0x5cc   : > { %v3210_v30 = vpop.eup %2802 }
 0x5cd   : > { %v1301_v31 = vpack.c.bf16 %v3208_v28, %v3210_v30 }
 0x5cf   : > { %2615 = vmatprep.mubr.msk.bf16.mxu1 %vm1105_vm12, %v1301_v31 }
 0x5d0   : > { %2616 = vmatmul.mubr.msk.bf16.vlgmr.msra.gmra.mrb[0].mxu1 %vm1105_vm12, %v1302_v32 }
 0x5d1   : > { %2620 = vmatpush3.bf16.xpose.msra.mxu1 %v1386_v33  ;;  %2623 = vmatprep.mubr.msk.bf16.mxu1 %vm1044_vm2, %v1372_v34 }
 0x5d2   : > { %2723 = vmatprep.subr.msk.bf16.mxu1 %vm1044_vm2, %v1378_v35 }
 0x5d9   : > { %2622 = vmatpush3.bf16.xpose.msra.mxu1 %v1389_v36 }
 0x5e0   : > { %2624 = vmatmul.mubr.msk.bf16.vlgmr.msra.gmra.mrb[4].mxu1 %vm1044_vm2, %v1374_v37 }
 0x6a3   : > { %v3223_v38 = vpop.f32.mrb[0].mxu1 }
 0x6a4   : > { %v3225_v39 = vpop.f32.mrb[1].mxu1 }
 0x6a5   : > { %v2618_v40 = vpop.f32.mrb[2].mxu1 }
 0x6a6   : > { %v3227_v41 = vpop.f32.mrb[3].mxu1 }
 0x6b3   : > { %v2625_v42 = vpop.f32.mrb[4].mxu1 }
 0x6b4   : > { %v1434_v43 = vadd.f32 %v2625_v42, %v3145_v22  ;;  %v1425_v44 = vpop.f32.mrb[5].mxu1  ;;  %v1298_v42 = vsel %vm1105_vm12, %v3206_v27, 0.0 }
 0x6b5   : > { %v1426_v45 = vadd.f32 %v1425_v44, %v3147_v24  ;;  %v2626_v46 = vpop.f32.mrb[6].mxu1 }
 0x6b6   : > { %v1428_v47 = vpop.f32.mrb[7].mxu1  ;;  %v1445_v51 = vsel %vm1105_vm12, %v1434_v43, -inf }
 0x6b7   : > { %v1429_v52 = vadd.f32 %v1428_v47, %v3151_v29  ;;  %1446 = vmax.xlane.f32.xlu0 %v1445_v51  ;;  %v1439_v53 = vsel %vm1105_vm12, %v1426_v45, -inf }
 0x6b8   : > { %1440 = vmax.xlane.f32.xlu1 %v1439_v53 }
 0x6b9   : > { %v1442_v54 = vsel %vm1105_vm12, %v1429_v52, -inf }
 0x6bb   : > { %1443 = vmax.xlane.f32.xlu0 %v1442_v54 }
 0x6c9   : > { %1470 = vrot.lane.b32.xlu1 %v3103_v57, %s2880_s24 }
 0x6cd   : > { %1540 = vrot.lane.b32.xlu1 %v3106_v62, %s2881_s2 }
 0x6d1   : > { %1468 = vrot.lane.b32.xlu0 %v3106_v62, %s2880_s24  ;;  %1542 = vrot.lane.b32.xlu1 %v3103_v57, %s2881_s2 }
 0x6d5   : > { %1536 = vrot.lane.b32.xlu0 %v3108_v63, %s2882_s3  ;;  %1538 = vrot.lane.b32.xlu1 %v3135_v12, %s2882_s3 }
 0x744   : > { %v1447_v55 = vpop.xlane.xlu0 %1446 }
 0x745   : > { %v1450_v56 = vsub.f32 %v1434_v43, %v1447_v55  ;;  %v1441_v58 = vpop.xlane.xlu1 %1440 }
 0x746   : > { %v1448_v61 = vsub.f32 %v1426_v45, %v1441_v58 }
 0x747   : > { %v1455_v1 = vmul.f32 1.442695, %v1450_v56 }
 0x748   : > { %v1451_v2 = vmul.f32 1.442695, %v1448_v61  ;;  %v1444_v3 = vpop.xlane.xlu0 %1443 }
 0x749   : > { %v1449_v4 = vsub.f32 %v1429_v52, %v1444_v3  ;;  %2804 = vpow2.f32 %v1455_v1  ;;  %v1471_v6 = vpop.permute.xlu1 %1470 }
 0x74a   : > { %2806 = vpow2.f32 %v1451_v2  ;;  %v1480_v63 = vsel %vm1146_vm13, %v1471_v6, 0 }
 0x74b   : > { %v1453_v5 = vmul.f32 1.442695, %v1449_v4  ;;  %v1124_v4 = vsel %vm1105_vm12, %v3170_v49, 0.0 }
 0x74c   : > { %v1469_v7 = vpop.permute.xlu0 %1468 }
 0x74d   : > { %2808 = vpow2.f32 %v1453_v5  ;;  %2627 = vmatprep.subr.bf16.mxu0 %v1469_v7  ;;  %v1541_v12 = vpop.permute.xlu1 %1540 }
 0x74e   : > { %2628 = vmatpush3.bf16.msra.mxu0 %v1469_v7  ;;  %v1551_v14 = vsel %vm1044_vm2, %v1541_v12, 0  ;;  %v1127_v7 = vsel %vm1105_vm12, %v3172_v50, 0.0 }
 0x74f   : > { %2724 = vmatprep.subr.msk.bf16.mxu0 %vm1146_vm13, %v1471_v6  ;;  %v1130_v6 = vsel %vm1105_vm12, %v3168_v48, 0.0 }
 0x750   : > { %v1537_v15 = vpop.permute.xlu0 %1536 }
 0x751   : > { %v1543_v16 = vpop.permute.xlu1 %1542 }
 0x752   : > { %2630 = vmatpush3.bf16.msra.mxu0 %v1480_v63  ;;  %v1554_v17 = vsel %vm1044_vm2, %v1543_v16, 0 }
 0x753   : > { %2725 = vmatprep.subr.msk.bf16.mxu0 %vm1044_vm2, %v1541_v12  ;;  %v2805_v8 = vpop.eup %2804 }
 0x754   : > { %v2807_v9 = vpop.eup %2806  ;;  %v1467_v13 = vpack.c.bf16 %v2805_v8, %v2805_v8 }
 0x755   : > { %v1539_v18 = vpop.permute.xlu1 %1538  ;;  %v1457_v43 = vsel %vm1105_vm12, %v2807_v9, 0.0 }
 0x757   : > { %v2809_v10 = vpop.eup %2808 }
 0x758   : > { %v1466_v11 = vpack.c.bf16 %v2809_v10, %v2807_v9 }
 0x75a   : > { %2631 = vmatprep.mubr.msk.bf16.mxu0 %vm1105_vm12, %v1466_v11 }
 0x75b   : > { %2632 = vmatmul.mubr.msk.bf16.vlgmr.msra.gmra.mrb[16].mxu0 %vm1105_vm12, %v1467_v13 }
 0x75c   : > { %2636 = vmatpush3.bf16.xpose.msra.mxu0 %v1551_v14  ;;  %2639 = vmatprep.mubr.msk.bf16.mxu0 %vm1044_vm2, %v1537_v15 }
 0x75d   : > { %2726 = vmatprep.subr.msk.bf16.mxu0 %vm1044_vm2, %v1543_v16 }
 0x764   : > { %2638 = vmatpush3.bf16.xpose.msra.mxu0 %v1554_v17 }
 0x76b   : > { %2640 = vmatmul.mubr.msk.bf16.vlgmr.msra.gmra.mrb[20].mxu0 %vm1044_vm2, %v1539_v18 }
 0x82e   : > { %v3251_v19 = vpop.f32.mrb[16].mxu0 }
 0x82f   : > { %v3253_v20 = vpop.f32.mrb[17].mxu0 }
 0x830   : > { %v2634_v21 = vpop.f32.mrb[18].mxu0 }
 0x831   : > { %v3255_v23 = vpop.f32.mrb[19].mxu0 }
 0x83e   : > { %v2641_v25 = vpop.f32.mrb[20].mxu0 }
 0x83f   : > { %v1599_v26 = vadd.f32 %v2641_v25, %v3145_v22  ;;  %v1590_v31 = vpop.f32.mrb[21].mxu0  ;;  %v1292_v22 = vsel %vm1105_vm12, %v3210_v30, 0.0 }
 0x840   : > { %v2642_v32 = vpop.f32.mrb[22].mxu0  ;;  %v1591_v33 = vadd.f32 %v1590_v31, %v3147_v24  ;;  %v1295_v24 = vsel %vm1105_vm12, %v3208_v28, 0.0 }
 0x841   : > { %v1593_v34 = vpop.f32.mrb[23].mxu0  ;;  %v1610_v35 = vsel %vm1105_vm12, %v1599_v26, -inf }
 0x842   : > { %v1594_v36 = vadd.f32 %v1593_v34, %v3151_v29  ;;  %1611 = vmax.xlane.f32.xlu0 %v1610_v35  ;;  %v1604_v40 = vsel %vm1105_vm12, %v1591_v33, -inf  ;;  %v1460_v29 = vsel %vm1105_vm12, %v2809_v10, 0.0 }
 0x844   : > { %v1607_v37 = vsel %vm1105_vm12, %v1594_v36, -inf }
 0x845   : > { %1608 = vmax.xlane.f32.xlu1 %v1607_v37 }
 0x846   : > { %1605 = vmax.xlane.f32.xlu0 %v1604_v40 }
 0x856   : > { %1635 = vrot.lane.b32.xlu1 %v3103_v57, %s2883_s7  ;;  %v1463_v57 = vsel %vm1105_vm12, %v2805_v8, 0.0 }
 0x85c   : > { %1633 = vrot.lane.b32.xlu0 %v3106_v62, %s2883_s7  ;;  %s3451_s7 = sld [smem:[#allocation9_spill]] (!%p2505_p5) }
 0x87a   : > { %1293 = vadd.xlane.f32.xlu1 %v1292_v22 }
 0x87b   : > { %1296 = vadd.xlane.f32.xlu0 %v1295_v24 }
 0x87e   : > { %1461 = vadd.xlane.f32.xlu1 %v1460_v29 }
 0x87f   : > { %1299 = vadd.xlane.f32.xlu0 %v1298_v42 }
 0x883   : > { %1458 = vadd.xlane.f32.xlu0 %v1457_v43 }
 0x887   : > { %1464 = vadd.xlane.f32.xlu0 %v1463_v57 }
 0x8cf   : > { %v1612_v62 = vpop.xlane.xlu0 %1611 }
 0x8d0   : > { %v1615_v30 = vsub.f32 %v1599_v26, %v1612_v62 }
 0x8d2   : > { %v1620_v44 = vmul.f32 1.442695, %v1615_v30  ;;  %v1609_v45 = vpop.xlane.xlu1 %1608 }
 0x8d3   : > { %v1614_v46 = vsub.f32 %v1594_v36, %v1609_v45  ;;  %v1606_v28 = vpop.xlane.xlu0 %1605 }
 0x8d4   : > { %v1613_v47 = vsub.f32 %v1591_v33, %v1606_v28  ;;  %2810 = vpow2.f32 %v1620_v44 }
 0x8d5   : > { %v1618_v51 = vmul.f32 1.442695, %v1614_v46 }
 0x8d6   : > { %v1616_v52 = vmul.f32 1.442695, %v1613_v47  ;;  %v1636_v27 = vpop.permute.xlu1 %1635 }
 0x8d7   : > { %2812 = vpow2.f32 %v1618_v51  ;;  %v1634_v53 = vpop.permute.xlu0 %1633  ;;  %v1645_v54 = vsel %vm1146_vm13, %v1636_v27, 0 }
 0x8d8   : > { %2814 = vpow2.f32 %v1616_v52  ;;  %2643 = vmatprep.subr.bf16.mxu1 %v1634_v53 }
 0x8d9   : > { %2644 = vmatpush3.bf16.msra.mxu1 %v1634_v53 }
 0x8da   : > { %2727 = vmatprep.subr.msk.bf16.mxu1 %vm1146_vm13, %v1636_v27 }
 0x8dd   : > { %2646 = vmatpush3.bf16.msra.mxu1 %v1645_v54 }
 0x8de   : > { %v2811_v55 = vpop.eup %2810 }
 0x8df   : > { %v1632_v3 = vpack.c.bf16 %v2811_v55, %v2811_v55  ;;  %v1628_v5 = vsel %vm1105_vm12, %v2811_v55, 0.0 }
 0x8e1   : > { %v2813_v56 = vpop.eup %2812 }
 0x8e2   : > { %v2815_v58 = vpop.eup %2814  ;;  %v1625_v61 = vsel %vm1105_vm12, %v2813_v56, 0.0 }
 0x8e3   : > { %1626 = vadd.xlane.f32.xlu0 %v1625_v61  ;;  %v1622_v1 = vsel %vm1105_vm12, %v2815_v58, 0.0  ;;  %v1631_v2 = vpack.c.bf16 %v2813_v56, %v2815_v58 }
 0x8e4   : > { %1623 = vadd.xlane.f32.xlu1 %v1622_v1 }
 0x8e5   : > { %2647 = vmatprep.mubr.msk.bf16.mxu1 %vm1105_vm12, %v1631_v2 }
 0x8e6   : > { %2648 = vmatmul.mubr.msk.bf16.vlgmr.msra.gmra.mrb[8].mxu1 %vm1105_vm12, %v1632_v3 }
 0x8e7   : > { %1125 = vadd.xlane.f32.xlu0 %v1124_v4 }
 0x8e8   : > { %1629 = vadd.xlane.f32.xlu1 %v1628_v5 }
 0x8eb   : > { %1131 = vadd.xlane.f32.xlu0 %v1130_v6 }
 0x8ec   : > { %1128 = vadd.xlane.f32.xlu1 %v1127_v7 }
 0x907   : > { %v1294_v63 = vpop.xlane.xlu1 %1293 }
 0x908   : > { %2816 = vrcp.f32 %v1294_v63  ;;  %v1297_v12 = vpop.xlane.xlu0 %1296 }
 0x909   : > { %2818 = vrcp.f32 %v1297_v12 }
 0x90b   : > { %v1462_v8 = vpop.xlane.xlu1 %1461 }
 0x90c   : > { %v1300_v9 = vpop.xlane.xlu0 %1299 }
 0x90d   : > { %2820 = vrcp.f32 %v1300_v9 }
 0x90e   : > { %2822 = vrcp.f32 %v1462_v8 }
 0x910   : > { %v1459_v49 = vpop.xlane.xlu0 %1458 }
 0x911   : > { %2824 = vrcp.f32 %v1459_v49  ;;  %v2481_v49 = vld [vmem:[%s3450_s30] ss:$0 sm:$0xff] }
 0x912   : > { %v2817_v10 = vpop.eup %2816 }
 0x913   : > { %v2819_v11 = vpop.eup %2818  ;;  %v1368_v13 = vmul.f32 %v2817_v10, %v3225_v39 }
 0x914   : > { %v1465_v48 = vpop.xlane.xlu0 %1464  ;;  %v1369_v14 = vmul.f32 %v2819_v11, %v3227_v41 }
 0x915   : > { %2826 = vrcp.f32 %v1465_v48 }
 0x916   : > { %v2757_v50 = vpack.i.bf16 %v1369_v14, %v1368_v13 }
 0x917   : > { %v2821_v15 = vpop.eup %2820 }
 0x918   : > { %2758 = vrot.lane.b32.xlu1 %v2757_v50, %s2884_s8  ;;  %v1370_v16 = vmul.f32 %v2821_v15, %v3223_v38  ;;  %v2823_v17 = vpop.eup %2822  ;;  %v2774_v38 = vld [vmem:[%s3035_s21] sm:$0xff]  }
 0x919   : > { %v1534_v25 = vmul.f32 %v2823_v17, %v3255_v23  ;;  %2651 = vmatprep.subr.bf16.mxu1 %v2774_v38  ;;  %v2858_v15 = vld [vmem:[#allocation2] sm:$0xff] }
 0x91a   : > { %1708 = vrot.lane.b32.xlu0 %v1370_v16, %s2884_s8  ;;  %2652 = vmatpush3.bf16.msra.mxu1 %v2774_v38 }
 0x91b   : > { %v2825_v18 = vpop.eup %2824 }
 0x91c   : > { %v1533_v21 = vmul.f32 %v2825_v18, %v3253_v20  ;;  %v2775_v20 = vld [vmem:[%s3035_s21 + $0x8] sm:$0xff]  }
 0x91d   : > { %2653 = vmatprep.subr.bf16.mxu1 %v2775_v20  ;;  %v2859_v18 = vld [vmem:[#allocation2 + $0x8] sm:$0xff] }
 0x91e   : > { %v2762_v39 = vpack.i.bf16 %v1534_v25, %v1533_v21  ;;  %2654 = vmatpush3.bf16.msra.mxu1 %v2775_v20 }
 0x91f   : > { %v2827_v26 = vpop.eup %2826 }
 0x920   : > { %2763 = vrot.lane.b32.xlu1 %v2762_v39, %s2885_s28  ;;  %v1535_v41 = vmul.f32 %v2827_v26, %v3251_v19  ;;  %v2860_v39 = vld [vmem:[#allocation2 + $0x10] sm:$0xff] }
 0x924   : > { %1720 = vrot.lane.b32.xlu1 %v1535_v41, %s2885_s28  ;;  %s3452_s28 = sld [smem:[#allocation12_spill]] (!%p2505_p5) }
 0x970   : > { %v1627_v33 = vpop.xlane.xlu0 %1626 }
 0x971   : > { %v1624_v31 = vpop.xlane.xlu1 %1623 }
 0x974   : > { %v1126_v43 = vpop.xlane.xlu0 %1125 }
 0x975   : > { %v1630_v32 = vpop.xlane.xlu1 %1629 }
 0x976   : > { %2828 = vrcp.f32 %v1630_v32 }
 0x977   : > { %2830 = vrcp.f32 %v1627_v33 }
 0x978   : > { %2832 = vrcp.f32 %v1624_v31  ;;  %v1132_v57 = vpop.xlane.xlu0 %1131 }
 0x979   : > { %v1129_v62 = vpop.xlane.xlu1 %1128  ;;  %2834 = vrcp.f32 %v1132_v57  ;;  %v2777_v57 = vld [vmem:[%s3052_s11 + $0x8] sm:$0xff]  }
 0x97a   : > { %2836 = vrcp.f32 %v1129_v62 }
 0x97b   : > { %2838 = vrcp.f32 %v1126_v43  ;;  %v2776_v43 = vld [vmem:[%s3052_s11] sm:$0xff]  }
 0x97c   : > { %2659 = vmatprep.subr.bf16.mxu0 %v2776_v43 }
 0x97d   : > { %2660 = vmatpush3.bf16.msra.mxu0 %v2776_v43 }
 0x97e   : > { %2661 = vmatprep.subr.bf16.mxu0 %v2777_v57 }
 0x980   : > { %v2829_v23 = vpop.eup %2828 }
 0x981   : > { %v2831_v37 = vpop.eup %2830  ;;  %2662 = vmatpush3.bf16.msra.mxu0 %v2777_v57 }
 0x982   : > { %v2833_v19 = vpop.eup %2832 }
 0x983   : > { %v2835_v45 = vpop.eup %2834 }
 0x984   : > { %v2837_v46 = vpop.eup %2836  ;;  %v1203_v54 = vmul.f32 %v2835_v45, %v3185_v59 }
 0x985   : > { %v2839_v47 = vpop.eup %2838  ;;  %v1202_v27 = vmul.f32 %v2837_v46, %v3189_v0 }
 0x986   : > { %v1201_v58 = vmul.f32 %v2839_v47, %v3187_v60 }
 0x98a   : > { %v2759_v30 = vpop.permute.xlu1 %2758 }
 0x98b   : > { %v2761_v51 = vunpack.i.h.bf16 %v2759_v30  ;;  %v2760_v53 = vunpack.i.l.bf16 %v2759_v30 }
 0x98c   : > { %v1709_v28 = vpop.permute.xlu0 %1708 }
 0x98d   : > { %v1738_v1 = vsel %vm1044_vm2, %v1202_v27, %v2761_v51  ;;  %v1739_v2 = vsel %vm1044_vm2, %v1203_v54, %v1709_v28  ;;  %v1737_v4 = vsel %vm1044_vm2, %v1201_v58, %v2760_v53  ;;  %v2486_v27 = vld [vmem:[%s794_s6] ss:$0 sm:$0xff]  ;;  %s3453_s6 = sld [smem:[#allocation10_spill]] (!%p2505_p5) }
 0x992   : > { %v2764_v44 = vpop.permute.xlu1 %2763 }
 0x993   : > { %v2766_v55 = vunpack.i.h.bf16 %v2764_v44  ;;  %v2765_v56 = vunpack.i.l.bf16 %v2764_v44 }
 0x995   : > { %v1742_v0 = vsel %vm1740_vm14, %v1738_v1, %v2766_v55  ;;  %v1741_v63 = vsel %vm1740_vm14, %v1737_v4, %v2765_v56 }
 0x996   : > { %v1721_v52 = vpop.permute.xlu1 %1720 }
 0x997   : > { %v1743_v5 = vsel %vm1740_vm14, %v1739_v2, %v1721_v52 }
 0x9b9   : > { %v2649_v34 = vpop.f32.mrb[8].mxu1 }
 0x9ba   : > { %v1700_v35 = vmul.f32 %v2829_v23, %v2649_v34  ;;  %v1681_v36 = vpop.f32.mrb[9].mxu1 }
 0x9bb   : > { %v2650_v40 = vpop.f32.mrb[10].mxu1  ;;  %v1698_v24 = vmul.f32 %v2833_v19, %v1681_v36 }
 0x9bc   : > { %v1684_v22 = vpop.f32.mrb[11].mxu1  ;;  %1732 = vrot.lane.b32.xlu0 %v1700_v35, %s2886_s4 }
 0x9bd   : > { %v1699_v29 = vmul.f32 %v2831_v37, %v1684_v22 }
 0x9bf   : > { %v2767_v42 = vpack.i.bf16 %v1699_v29, %v1698_v24 }
 0x9c1   : > { %2768 = vrot.lane.b32.xlu1 %v2767_v42, %s2886_s4 }
 0xa2e   : > { %v1733_v61 = vpop.permute.xlu0 %1732 }
 0xa2f   : > { %v1746_v59 = vsel %vm1105_vm12, %v1743_v5, %v1733_v61  ;;  %v2487_v61 = vld [vmem:[%s797_s23] ss:$0 sm:$0xff] }
 0xa30   : > { %v1748_v9 = vpack.c.bf16 %v1746_v59, %v1746_v59  ;;  %v2778_v59 = vld [vmem:[%s3062_s29] sm:$0xff]  }
 0xa31   : > { %2667 = vmatprep.subr.bf16.mxu1 %v2778_v59 }
 0xa33   : > { %v2769_v3 = vpop.permute.xlu1 %2768 }
 0xa34   : > { %v2771_v6 = vunpack.i.h.bf16 %v2769_v3  ;;  %v2770_v7 = vunpack.i.l.bf16 %v2769_v3 }
 0xa36   : > { %v1745_v12 = vsel %vm1105_vm12, %v1742_v0, %v2771_v6  ;;  %v1744_v60 = vsel %vm1105_vm12, %v1741_v63, %v2770_v7 }
 0xa37   : > { %v1747_v8 = vpack.c.bf16 %v1745_v12, %v1744_v60  ;;  %v2779_v12 = vld [vmem:[%s3062_s29 + $0x8] sm:$0xff]   ;;  %v2780_v60 = vld [vmem:[%s3062_s29 + $0x10] sm:$0xff]  }
 0xa39   : > { %2655 = vmatprep.mubr.msk.bf16.mxu1 %vm831_vm1, %v1747_v8  ;;  %v2781_v8 = vld [vmem:[%s3062_s29 + $0x18] sm:$0xff]  }
 0xa3a   : > { %2656 = vmatmul.mubr.msk.bf16.vlgmr.msra.gmra.mrb[12].mxu1 %vm831_vm1, %v1748_v9  ;;  %v2782_v9 = vld [vmem:[%s3062_s29 + $0x20] sm:$0xff]  }
 0xa3b   : > { %2668 = vmatpush3.bf16.msra.mxu1 %v2778_v59 }
 0xa3c   : > { %2669 = vmatprep.subr.bf16.mxu1 %v2779_v12 }
 0xa3f   : > { %2670 = vmatpush3.bf16.msra.mxu1 %v2779_v12 }
 0xa40   : > { %2671 = vmatprep.subr.bf16.mxu1 %v2780_v60 }
 0xa43   : > { %2672 = vmatpush3.bf16.msra.mxu1 %v2780_v60 }
 0xa44   : > { %2673 = vmatprep.subr.bf16.mxu1 %v2781_v8 }
 0xa47   : > { %2674 = vmatpush3.bf16.msra.mxu1 %v2781_v8 }
 0xa48   : > { %2675 = vmatprep.subr.bf16.mxu1 %v2782_v9 }
 0xa4b   : > { %2676 = vmatpush3.bf16.msra.mxu1 %v2782_v9 }
 0xb0d   : > { %v2657_v10 = vpop.f32.mrb[12].mxu1 }
 0xb0e   : > { %v1812_v11 = vpop.f32.mrb[13].mxu1  ;;  %v1821_v50 = vadd.f32 %v2657_v10, %v2481_v49  ;;  %v2784_v10 = vld [vmem:[%s3062_s29 + $0x30] sm:$0xff]  }
 0xb0f   : > { %v1813_v13 = vadd.f32 %v2481_v49, %v1812_v11  ;;  %v2658_v48 = vpop.f32.mrb[14].mxu1  ;;  %v2785_v11 = vld [vmem:[%s3062_s29 + $0x38] sm:$0xff]  }
 0xb10   : > { %v1815_v14 = vpop.f32.mrb[15].mxu1  ;;  %v3317_v26 = vadd.f32 %v2860_v39, %v1821_v50 }
 0xb11   : > { %v3311_v16 = vadd.f32 %v2858_v15, %v1813_v13  ;;  %v1816_v17 = vadd.f32 %v2481_v49, %v1815_v14  ;;  %v2783_v49 = vld [vmem:[%s3062_s29 + $0x28] sm:$0xff]   ;;  %v2488_v13 = vld [vmem:[%s805_s13] ss:$0 sm:$0xff]  ;;  %s3454_s29 = sld [smem:[#allocation11_spill]] (!%p2505_p5) }
 0xb12   : > { %v1837_v31 = vsel %vm831_vm1, %v3317_v26, 0.0  ;;  %2677 = vmatprep.subr.bf16.mxu1 %v2783_v49 }
 0xb13   : > { %v3313_v21 = vadd.f32 %v2859_v18, %v1816_v17  ;;  %v1831_v25 = vsel %vm831_vm1, %v3311_v16, 0.0  ;;  %2678 = vmatpush3.bf16.msra.mxu1 %v2783_v49  ;;  %v2507_v49 = vld [vmem:[%s3453_s6] ss:$0 sm:$0xff] (!%p2505_p5) }
 0xb14   : > { %1832 = vadd.xlane.f32.xlu1 %v1831_v25  ;;  %2679 = vmatprep.subr.bf16.mxu1 %v2784_v10 }
 0xb15   : > { %v1834_v41 = vsel %vm831_vm1, %v3313_v21, 0.0 }
 0xb16   : > { %1835 = vadd.xlane.f32.xlu0 %v1834_v41 }
 0xb17   : > { %2680 = vmatpush3.bf16.msra.mxu1 %v2784_v10 }
 0xb18   : > { %2681 = vmatprep.subr.bf16.mxu1 %v2785_v11 }
 0xb1a   : > { %1838 = vadd.xlane.f32.xlu0 %v1837_v31 }
 0xb1b   : > { %2682 = vmatpush3.bf16.msra.mxu1 %v2785_v11  ;;  %v2508_v11 = vld [vmem:[%s3454_s29] ss:$0 sm:$0xff] (!%p2505_p5) }
 0xba1   : > { %v1833_v32 = vpop.xlane.xlu1 %1832 }
 0xba2   : > { %v1840_v33 = vmul.f32 0.03125, %v1833_v32 }
 0xba3   : > { %v1836_v38 = vpop.xlane.xlu0 %1835 }
 0xba4   : > { %v1843_v20 = vsub.f32 %v3311_v16, %v1840_v33  ;;  %v1841_v23 = vmul.f32 0.03125, %v1836_v38 }
 0xba6   : > { %v1844_v34 = vsub.f32 %v3313_v21, %v1841_v23  ;;  %v1846_v35 = vmul.f32 %v1843_v20, %v1843_v20 }
 0xba7   : > { %v1839_v36 = vpop.xlane.xlu0 %1838 }
 0xba8   : > { %v1842_v37 = vmul.f32 0.03125, %v1839_v36  ;;  %v1849_v40 = vsel %vm831_vm1, %v1846_v35, 0.0  ;;  %v1847_v19 = vmul.f32 %v1844_v34, %v1844_v34 }
 0xba9   : > { %1850 = vadd.xlane.f32.xlu0 %v1849_v40 }
 0xbaa   : > { %v1845_v22 = vsub.f32 %v3317_v26, %v1842_v37  ;;  %v1852_v24 = vsel %vm831_vm1, %v1847_v19, 0.0 }
 0xbab   : > { %1853 = vadd.xlane.f32.xlu1 %v1852_v24 }
 0xbac   : > { %v1848_v29 = vmul.f32 %v1845_v22, %v1845_v22 }
 0xbae   : > { %v1855_v42 = vsel %vm831_vm1, %v1848_v29, 0.0 }
 0xbaf   : > { %1856 = vadd.xlane.f32.xlu0 %v1855_v42 }
 0xc36   : > { %v1851_v62 = vpop.xlane.xlu0 %1850 }
 0xc37   : > { %v1858_v30 = vmul.f32 0.03125, %v1851_v62 }
 0xc38   : > { %v1854_v44 = vpop.xlane.xlu1 %1853 }
 0xc39   : > { %v1861_v45 = vadd.f32 1e-05, %v1858_v30  ;;  %v1859_v46 = vmul.f32 0.03125, %v1854_v44  ;;  %v2504_v30 = vld [vmem:[%s813_s5] ss:$0 sm:$0xff] }
 0xc3b   : > { %2840 = vrsqrt.f32 %v1861_v45  ;;  %v1862_v28 = vadd.f32 1e-05, %v1859_v46 }
 0xc3c   : > { %v1857_v47 = vpop.xlane.xlu0 %1856 }
 0xc3d   : > { %2842 = vrsqrt.f32 %v1862_v28  ;;  %v1860_v51 = vmul.f32 0.03125, %v1857_v47 }
 0xc3f   : > { %v1863_v52 = vadd.f32 1e-05, %v1860_v51 }
 0xc41   : > { %2844 = vrsqrt.f32 %v1863_v52 }
 0xc45   : > { %v2841_v53 = vpop.eup %2840 }
 0xc46   : > { %v1867_v54 = vmul.f32 %v2841_v53, %v1843_v20 }
 0xc47   : > { %v2843_v55 = vpop.eup %2842 }
 0xc48   : > { %v1868_v56 = vmul.f32 %v2843_v55, %v1844_v34  ;;  %v1876_v58 = vmul.f32 %v2486_v27, %v1867_v54  ;;  %v2887_v54 = vmov (!%p2505_p5), 0.0|0.0  }
 0xc49   : > { %2707 = vmatprep.subr.bf16.mxu0 (!%p2505_p5), %v2887_v54  ;;  %2710 = vmatprep.subr.bf16.mxu1 (!%p2505_p5), %v2887_v54 }
 0xc4a   : > { %v1877_v1 = vmul.f32 %v2486_v27, %v1868_v56  ;;  %v1885_v4 = vadd.f32 %v2487_v61, %v1876_v58 }
 0xc4b   : > { %v2845_v2 = vpop.eup %2844 }
 0xc4c   : > { %v1869_v3 = vmul.f32 %v2845_v2, %v1845_v22  ;;  %v1886_v5 = vadd.f32 %v2487_v61, %v1877_v1 }
 0xc4e   : > { %v1878_v6 = vmul.f32 %v2486_v27, %v1869_v3  ;;  %v1888_v7 = vpack.c.bf16 %v1886_v5, %v1885_v4  ;;  %v2229_v5 = vld [vmem:[%s3452_s28] sm:$0xff] (!%p2505_p5) }
 0xc50   : > { %2663 = vmatprep.mubr.msk.bf16.mxu0 %vm831_vm1, %v1888_v7  ;;  %v1887_v0 = vadd.f32 %v2487_v61, %v1878_v6  ;;  %v2230_v6 = vld [vmem:[%s3452_s28 + $0x8] sm:$0xff] (!%p2505_p5)  ;;  %v2231_v7 = vld [vmem:[%s3452_s28 + $0x10] sm:$0xff] (!%p2505_p5) }
 0xc52   : > { %v1889_v63 = vpack.c.bf16 %v1887_v0, %v1887_v0  ;;  %v2711_v0 = vpack.c.bf16 (!%p2505_p5), %v2230_v6, %v2229_v5 }
 0xc54   : > { %2664 = vmatmul.mubr.msk.bf16.vlgmr.msra.gmra.mrb[24].mxu0 %vm831_vm1, %v1889_v63  ;;  %v2232_v63 = vld [vmem:[%s3452_s28 + $0x18] sm:$0xff] (!%p2505_p5) }
 0xc55   : > { %v2714_v59 = vpack.c.bf16 (!%p2505_p5), %v2232_v63, %v2231_v7 }
 0xd27   : > { %v2665_v48 = vpop.f32.mrb[24].mxu0 }
 0xd28   : > { %v1962_v14 = vadd.f32 %v2665_v48, %v2488_v13  ;;  %v1953_v50 = vpop.f32.mrb[25].mxu0 }
 0xd29   : > { %v1954_v15 = vadd.f32 %v2488_v13, %v1953_v50  ;;  %v2666_v17 = vpop.f32.mrb[26].mxu0 }
 0xd2a   : > { %v2495_v18 = vmul.f32 -1.702, %v1962_v14  ;;  %v1956_v25 = vpop.f32.mrb[27].mxu0 }
 0xd2b   : > { %v2493_v39 = vmul.f32 -1.702, %v1954_v15  ;;  %v1957_v41 = vadd.f32 %v2488_v13, %v1956_v25 }
 0xd2c   : > { %v1977_v31 = vmul.f32 1.442695, %v2495_v18 }
 0xd2d   : > { %v1973_v32 = vmul.f32 1.442695, %v2493_v39  ;;  %v2494_v33 = vmul.f32 -1.702, %v1957_v41 }
 0xd2e   : > { %2846 = vpow2.f32 %v1977_v31 }
 0xd2f   : > { %2848 = vpow2.f32 %v1973_v32  ;;  %v1975_v38 = vmul.f32 1.442695, %v2494_v33 }
 0xd31   : > { %2850 = vpow2.f32 %v1975_v38 }
 0xd38   : > { %v2847_v20 = vpop.eup %2846 }
 0xd39   : > { %v2849_v23 = vpop.eup %2848  ;;  %v1981_v34 = vadd.f32 1.0, %v2847_v20 }
 0xd3a   : > { %v1979_v35 = vadd.f32 1.0, %v2849_v23 }
 0xd3b   : > { %v2851_v36 = vpop.eup %2850  ;;  %2852 = vrcp.f32 %v1981_v34 }
 0xd3c   : > { %2854 = vrcp.f32 %v1979_v35  ;;  %v1980_v37 = vadd.f32 1.0, %v2851_v36 }
 0xd3e   : > { %2856 = vrcp.f32 %v1980_v37 }
 0xd45   : > { %v2853_v40 = vpop.eup %2852 }
 0xd46   : > { %v2855_v19 = vpop.eup %2854  ;;  %v1990_v24 = vmul.f32 %v2853_v40, %v1962_v14 }
 0xd47   : > { %v1988_v29 = vmul.f32 %v2855_v19, %v1954_v15 }
 0xd48   : > { %v2857_v22 = vpop.eup %2856  ;;  %v1992_v57 = vpack.c.bf16 %v1990_v24, %v1990_v24 }
 0xd49   : > { %v1989_v42 = vmul.f32 %v2857_v22, %v1957_v41 }
 0xd4b   : > { %v1991_v43 = vpack.c.bf16 %v1989_v42, %v1988_v29 }
 0xd4d   : > { %2683 = vmatprep.mubr.bf16.mxu1 %v1991_v43 }
 0xd4e   : > { %2684 = vmatmul.mubr.bf16.vlgmr.msra.gmra.mrb[16].mxu1 %v1992_v57 }
 0xd4f   : > { %2712 = vmatpush3.bf16.msra.mxu1 (!%p2505_p5), %v2711_v0 }
 0xd50   : > { %2713 = vmatprep.subr.bf16.mxu1 (!%p2505_p5), %v2887_v54 }
 0xd53   : > { %2715 = vmatpush3.bf16.msra.mxu1 (!%p2505_p5), %v2714_v59 }
 0xe21   : > { %v2685_v62 = vpop.f32.mrb[16].mxu1 }
 0xe22   : > { %v2107_v44 = vadd.f32 %v2685_v62, %v3317_v26  ;;  %v2091_v45 = vpop.f32.mrb[17].mxu1 }
 0xe23   : > { %v2105_v46 = vadd.f32 %v2091_v45, %v3311_v16  ;;  %v2686_v28 = vpop.f32.mrb[18].mxu1  ;;  %2124 = sbr.rel (%p2505_p5) target bundleno = 4370 (0x1112), region = 112  ;;  %v2889_v16 = vmov (!%p2505_p5), 0.0  }
 0xe24   : > { %v2117_v47 = vadd.f32 %v2504_v30, %v2107_v44  ;;  %v2094_v51 = vpop.f32.mrb[19].mxu1  ;;  %2693 = vmatprep.mubr.msk.f32.mxu0 (!%p2505_p5), %vm2888_vm15, %v2889_v16  ;;  %2704 = vmatprep.mubr.msk.f32.mxu1 (!%p2505_p5), %vm2888_vm15, %v2889_v16 }
 0xe25   : > { %v2115_v52 = vadd.f32 %v2504_v30, %v2105_v46  ;;  %v2106_v53 = vadd.f32 %v2094_v51, %v3313_v21  ;;  %v2125_v21 = vld [vmem:[%s3451_s7] sm:$0x7] (!%p2505_p5)  ;;  %s3455_s7 = sld [smem:[#allocation15_spill]] (!%p2505_p5) }
 0xe26   : > { %2120 = vst.msk [vmem:[#allocation2 + $0x10] sm:$0xff] %vm831_vm1, %v2117_v47 }
 0xe27   : > { %2118 = vst.msk [vmem:[#allocation2] sm:$0xff] %vm831_vm1, %v2115_v52  ;;  %v2116_v27 = vadd.f32 %v2504_v30, %v2106_v53 }
 0xe29   : > { %2119 = vst.msk [vmem:[#allocation2 + $0x8] sm:$0xff] %vm831_vm1, %v2116_v27  ;;  %v2708_v26 = vpack.c.bf16 (!%p2505_p5), %v2116_v27, %v2115_v52 }
 0xe2b   : > { %2709 = vmatpush3.bf16.msra.mxu0 %v2708_v26 }
 0xe2c   : > { %2691 = vmatprep.subr.mxu0 %v2889_v16 }
 0xe2f   : > { %2692 = vmatpush3.msra.mxu0 %v2117_v47 }
 0xe30   : > { %2694 = vmatmul.mubr.msk.f32.vlgmr.msra.gmra.mrb[0].mxu0 %vm1105_vm12, %v2125_v21 }
 0xf03   : > { %v2195_v55 = vpop.f32.mrb[0].mxu0 }
 0xf04   : > { %v2695_v56 = vpop.f32.mrb[1].mxu0  ;;  %v2202_v58 = vsel %vm2201_vm0, %v2195_v55, 0.0 }
 0xf05   : > { %2203 = vadd.xlane.f32.xlu0 %v2202_v58 }
 0xf92   : > { %v2204_v61 = vpop.xlane.xlu0 %2203 }
 0xf93   : > { %v2205_v1 = vmul.f32 0.03125, %v2204_v61 }
 0xf95   : > { %v2206_v2 = vsub.f32 %v2195_v55, %v2205_v1 }
 0xf97   : > { %v2207_v3 = vmul.f32 %v2206_v2, %v2206_v2 }
 0xf99   : > { %v2208_v4 = vsel %vm2201_vm0, %v2207_v3, 0.0 }
 0xf9a   : > { %2209 = vadd.xlane.f32.xlu0 %v2208_v4 }
0x1027   : > { %v2210_v12 = vpop.xlane.xlu0 %2209 }
0x1028   : > { %v2211_v60 = vmul.f32 0.03125, %v2210_v12 }
0x102a   : > { %v2212_v8 = vadd.f32 1e-05, %v2211_v60 }
0x102c   : > { %2861 = vrsqrt.f32 %v2212_v8 }
0x1036   : > { %v2862_v9 = vpop.eup %2861 }
0x1037   : > { %v2214_v10 = vmul.f32 %v2862_v9, %v2206_v2 }
0x1039   : > { %v2221_v13 = vmul.f32 %v2507_v49, %v2214_v10 }
0x103b   : > { %v2228_v48 = vadd.f32 %v2508_v11, %v2221_v13 }
0x103d   : > { %2705 = vmatmul.mubr.msk.f32.vlgmr.msra.gmra.mrb[0].mxu1 %vm831_vm1, %v2228_v48 }
0x1110   : > { %v2302_v14 = vpop.f32.mrb[0].mxu1 }
0x1111   : > { %2306 = vst.msk [vmem:[%s3455_s7] sm:$0x7] %vm2201_vm0, %v2302_v14  ;;  %v2706_v50 = vpop.f32.mrb[1].mxu1 }
0x1112 PF: > { %s3456_s25 = sld [smem:[#allocation3_spill]] }
0x1118   : > { %s31_s2 = sadd.s32 1, %s3456_s25  }
0x1119   : > { %p28_p6 = scmp.ge.s32.totalorder %s31_s2, 4  }
0x111b   :  { %30 = sbr.rel (!%p28_p6) target bundleno = 13 (0xd), region = 171 }

</bundles_post_ra>
